<compile_context>
chip_gen: v7x
topology: tpu7x:2x2x1
jax: 0.10.0
libtpu: 0.0.40
codegen_flags: <defaults>
</compile_context>

<pallas_src>
import functools

import jax
import jax.numpy as jnp
import numpy as np
from jax.experimental import pallas as pl
from jax.experimental.pallas import tpu as pltpu


def _round_up(x, m):
    return ((x + m - 1) // m) * m


# ----------------------------------------------------------------------------
# Fused residual-block kernel (one grid step == one batch element)
# ----------------------------------------------------------------------------
def _resblock_kernel(*refs, H, W, Cin, Cout, CP, kernel_sizes, has_proj):
    n_layers = len(kernel_sizes)
    x_ref = refs[0]                                   # (1, Cin, H*W)  NCHW, lane-dense
    eye_ref = refs[1]                                 # (CP, Cin) identity channel-lift
    w_refs = refs[2:2 + n_layers]                     # (K, K, CP, CP) each (HWIO)
    b_refs = refs[2 + n_layers:2 + 2 * n_layers]      # (1, CP) each
    idx = 2 + 2 * n_layers
    if has_proj:
        wsc_ref = refs[idx]                           # (CP, CP)  (out, in) orientation
        idx += 1
    o_ref = refs[idx]                                 # (1, Cout, H*W)
    xpad_ref, acc_ref, sc_ref = refs[idx + 1:idx + 4]

    padm = max(k // 2 for k in kernel_sizes)
    HW = H * W

    # ---- Lift input to lane-dense CP channels, entirely in VMEM ------------
    # x (Cin, HW) --eye--> (CP, HW) (channels-first == output layout), then a
    # single aligned XLU transpose gives the (HW, CP) layout used by the
    # conv-tap matmuls.  No wrapper-side layout passes over HBM.
    x_chw = x_ref[0].astype(jnp.float32)                              # (Cin, HW)
    x_lift_t = jnp.dot(eye_ref[...], x_chw,
                       preferred_element_type=jnp.float32)            # (CP, HW)

    # Shortcut (identity or fused 1x1 projection), kept in the OUTPUT layout.
    if has_proj:
        sc_ref[...] = jnp.dot(wsc_ref[...], x_lift_t,
                              preferred_element_type=jnp.float32)     # (CP, HW)
    else:
        sc_ref[...] = x_lift_t

    # Padded activation scratch (spatial halo + padded channel lanes), zeroed
    # once; only the interior is ever rewritten, so halo / lane zeros persist
    # (weights and biases are zero-padded, so padded channels stay exactly 0).
    xpad_ref[...] = jnp.zeros_like(xpad_ref)
    xpad_ref[padm:padm + H, padm:padm + W, :] = (
        jnp.transpose(x_lift_t).reshape(H, W, CP))

    # ---- Main path: each conv = K*K shifted-window MXU matmuls -------------
    for l in range(n_layers):
        K = kernel_sizes[l]
        off = padm - K // 2
        # Bias folded into the accumulator init (saves one full VPU pass).
        acc_ref[...] = jnp.broadcast_to(b_refs[l][...], (HW, CP))
        for kh in range(K):
            for kw in range(K):
                patch = xpad_ref[off + kh:off + kh + H,
                                 off + kw:off + kw + W, :].reshape(HW, CP)
                acc_ref[...] += jnp.dot(patch, w_refs[l][kh, kw],
                                        preferred_element_type=jnp.float32)
        if l == n_layers - 1:
            # One transpose to output layout, fused residual add + final ReLU,
            # lane-dense (Cout, H*W) store -> already NCHW in HBM.
            out_t = jnp.transpose(acc_ref[...]) + sc_ref[...]
            out_t = jnp.maximum(out_t, 0.0)
            o_ref[0] = out_t[:Cout, :].astype(o_ref.dtype)
        else:
            res = jnp.maximum(acc_ref[...], 0.0)
            xpad_ref[padm:padm + H, padm:padm + W, :] = res.reshape(H, W, CP)


# ----------------------------------------------------------------------------
# ResidualBlock wrapper (parameters initialized deterministically in-script)
# ----------------------------------------------------------------------------
class ResidualBlockPallas:
    def __init__(self, in_channels, channels, kernel_sizes, key):
        assert channels and kernel_sizes
        assert len(channels) == len(kernel_sizes)
        assert all(k % 2 == 1 for k in kernel_sizes)

        self.in_channels = in_channels
        self.channels = list(channels)
        self.kernel_sizes = list(kernel_sizes)
        self.out_channels = channels[-1]
        # Lane-dense channel padding (multiple of 128); padding lives only in
        # the (tiny) weight constants and in VMEM, never in the activations'
        # HBM representation.
        self.cp = _round_up(max([in_channels] + list(channels)), 128)

        self.weights, self.biases = [], []            # raw (for reference)
        self.weights_pad, self.biases_pad = [], []    # zero-padded to CP
        cin = in_channels
        for cout, k in zip(channels, kernel_sizes):
            key, wk, bk = jax.random.split(key, 3)
            fan_in = cin * k * k
            scale = 1.0 / np.sqrt(fan_in)
            w = jax.random.uniform(wk, (k, k, cin, cout), jnp.float32,
                                   -scale, scale)
            b = jax.random.uniform(bk, (cout,), jnp.float32, -scale, scale)
            self.weights.append(w)
            self.biases.append(b)
            self.weights_pad.append(
                jnp.zeros((k, k, self.cp, self.cp), jnp.float32)
                .at[:, :, :cin, :cout].set(w))
            self.biases_pad.append(
                jnp.zeros((1, self.cp), jnp.float32).at[0, :cout].set(b))
            cin = cout

        if in_channels != channels[-1]:
            key, wk = jax.random.split(key)
            scale = 1.0 / np.sqrt(in_channels)
            self.w_short = jax.random.uniform(
                wk, (1, 1, in_channels, channels[-1]), jnp.float32,
                -scale, scale)
            # (out, in) orientation so the shortcut is produced directly in
            # the output (CP, H*W) layout inside the kernel.
            self.w_short_t_pad = (
                jnp.zeros((self.cp, self.cp), jnp.float32)
                .at[:channels[-1], :in_channels].set(self.w_short[0, 0].T))
        else:
            self.w_short = None
            self.w_short_t_pad = None

        # Identity-embedding matrix used in-kernel to lift Cin -> CP channels
        # (channels-first orientation: (CP, Cin)).
        self.eye_t = (jnp.zeros((self.cp, in_channels), jnp.float32)
                      .at[:in_channels, :]
                      .set(jnp.eye(in_channels, dtype=jnp.float32)))

    def __call__(self, x_nchw):
        N, Cin, H, W = x_nchw.shape
        assert Cin == self.in_channels
        Cout, CP = self.out_channels, self.cp
        padm = max(k // 2 for k in self.kernel_sizes)

        # Native NCHW in, free contiguous reshape only (no HBM transpose).
        x_flat = x_nchw.reshape(N, Cin, H * W)

        kernel = functools.partial(
            _resblock_kernel, H=H, W=W, Cin=Cin, Cout=Cout, CP=CP,
            kernel_sizes=tuple(self.kernel_sizes),
            has_proj=self.w_short_t_pad is not None)

        in_specs = [
            pl.BlockSpec((1, Cin, H * W), lambda n: (n, 0, 0)),
            pl.BlockSpec((CP, Cin), lambda n: (0, 0)),
        ]
        args = [x_flat, self.eye_t]
        for w, k in zip(self.weights_pad, self.kernel_sizes):
            in_specs.append(pl.BlockSpec((k, k, CP, CP),
                                         lambda n: (0, 0, 0, 0)))
            args.append(w)
        for b in self.biases_pad:
            in_specs.append(pl.BlockSpec((1, CP), lambda n: (0, 0)))
            args.append(b)
        if self.w_short_t_pad is not None:
            in_specs.append(pl.BlockSpec((CP, CP), lambda n: (0, 0)))
            args.append(self.w_short_t_pad)

        out = pl.pallas_call(
            kernel,
            out_shape=jax.ShapeDtypeStruct((N, Cout, H * W), x_nchw.dtype),
            grid=(N,),
            in_specs=in_specs,
            out_specs=pl.BlockSpec((1, Cout, H * W), lambda n: (n, 0, 0)),
            scratch_shapes=[
                pltpu.VMEM((H + 2 * padm, W + 2 * padm, CP), jnp.float32),
                pltpu.VMEM((H * W, CP), jnp.float32),   # conv accumulator
                pltpu.VMEM((CP, H * W), jnp.float32),   # shortcut (output layout)
            ],
            compiler_params=pltpu.CompilerParams(
                dimension_semantics=("parallel",),
                vmem_limit_bytes=32 * 1024 * 1024),
        )(*args)

        # (N, Cout, H*W) is NCHW already; reshape is free (contiguous).
        return out.reshape(N, Cout, H, W)


# ----------------------------------------------------------------------------
# Pure-JAX reference (lax.conv) for a sanity check
# ----------------------------------------------------------------------------
def _conv_ref(x, w, b):
    y = jax.lax.conv_general_dilated(
        x, w, window_strides=(1, 1), padding="SAME",
        dimension_numbers=("NHWC", "HWIO", "NHWC"))
    return y + b


def residual_ref(block, x_nchw):
    x = jnp.transpose(x_nchw, (0, 2, 3, 1))
    if block.w_short is None:
        shortcut = x
    else:
        shortcut = _conv_ref(x, block.w_short,
                             jnp.zeros((block.out_channels,), jnp.float32))
    h = x
    for w, b in zip(block.weights[:-1], block.biases[:-1]):
        h = jnp.maximum(_conv_ref(h, w, b), 0.0)
    out = _conv_ref(h, block.weights[-1], block.biases[-1]) + shortcut
    out = jnp.maximum(out, 0.0)
    return jnp.transpose(out, (0, 3, 1, 2))


if __name__ == "__main__":
    key = jax.random.PRNGKey(0)
    key, xkey, pkey = jax.random.split(key, 3)

    # Small shapes: batch=2, in_channels=4, spatial 16x16; block channels [8, 6].
    N, Cin, H, W = 2, 4, 16, 16
    channels = [8, 6]
    kernel_sizes = [3, 3]

    x = jax.random.normal(xkey, (N, Cin, H, W), jnp.float32)   # NCHW input
    block = ResidualBlockPallas(Cin, channels, kernel_sizes, pkey)

    out = jax.block_until_ready(block(x))

    assert out.shape == (N, channels[-1], H, W), out.shape
    assert bool(jnp.all(out >= 0.0)), "ReLU output must be non-negative"

    ref = jax.block_until_ready(residual_ref(block, x))
    np.testing.assert_allclose(np.asarray(out), np.asarray(ref),
                               rtol=1e-3, atol=1e-3)

    print("KERNEL_OK")
</pallas_src>

<mosaic_0001>
module attributes {stable_mosaic.version = 11 : i64} {
  func.func @_resblock_kernel(%arg0: i32, %arg1: memref<1x4x256xf32, #tpu.memory_space<vmem>>, %arg2: memref<128x4xf32, #tpu.memory_space<vmem>>, %arg3: memref<3x3x128x128xf32, #tpu.memory_space<vmem>>, %arg4: memref<3x3x128x128xf32, #tpu.memory_space<vmem>>, %arg5: memref<1x128xf32, #tpu.memory_space<vmem>>, %arg6: memref<1x128xf32, #tpu.memory_space<vmem>>, %arg7: memref<128x128xf32, #tpu.memory_space<vmem>>, %arg8: memref<1x6x256xf32, #tpu.memory_space<vmem>>, %arg9: memref<18x18x128xf32, #tpu.memory_space<vmem>>, %arg10: memref<256x128xf32, #tpu.memory_space<vmem>>, %arg11: memref<128x256xf32, #tpu.memory_space<vmem>>) attributes {dimension_semantics = [#tpu.dimension_semantics<parallel>], iteration_bounds = array<i64: 2>, scalar_prefetch = 0 : i64, scratch_operands = 3 : i64, tpu.core_type = #tpu.core_type<tc>, window_params = [{transform_indices = @transform_0, window_bounds = array<i64: 1, 4, 256>}, {pipeline_mode = #tpu.pipeline_mode<synchronous>, transform_indices = @transform_1, window_bounds = array<i64: 128, 4>}, {pipeline_mode = #tpu.pipeline_mode<synchronous>, transform_indices = @transform_2, window_bounds = array<i64: 3, 3, 128, 128>}, {pipeline_mode = #tpu.pipeline_mode<synchronous>, transform_indices = @transform_3, window_bounds = array<i64: 3, 3, 128, 128>}, {pipeline_mode = #tpu.pipeline_mode<synchronous>, transform_indices = @transform_4, window_bounds = array<i64: 1, 128>}, {pipeline_mode = #tpu.pipeline_mode<synchronous>, transform_indices = @transform_5, window_bounds = array<i64: 1, 128>}, {pipeline_mode = #tpu.pipeline_mode<synchronous>, transform_indices = @transform_6, window_bounds = array<i64: 128, 128>}, {transform_indices = @transform_7, window_bounds = array<i64: 1, 6, 256>}]} {
    %c0 = arith.constant 0 : index
    %c0_0 = arith.constant 0 : index
    %c0_1 = arith.constant 0 : index
    %0 = vector.load %arg1[%c0, %c0_0, %c0_1] : memref<1x4x256xf32, #tpu.memory_space<vmem>>, vector<1x4x256xf32>
    %1 = vector.shape_cast %0 : vector<1x4x256xf32> to vector<4x256xf32>
    %c0_2 = arith.constant 0 : index
    %c0_3 = arith.constant 0 : index
    %2 = vector.load %arg2[%c0_2, %c0_3] : memref<128x4xf32, #tpu.memory_space<vmem>>, vector<128x4xf32>
    %cst = arith.constant dense<0.000000e+00> : vector<128x256xf32>
    %3 = tpu.matmul %2, %1, %cst {dimension_numbers = #tpu.dot_dimension_numbers<[1], [0], [0], [1], [0, 0, 1, 1], [], []>} : vector<128x4xf32>, vector<4x256xf32>, vector<128x256xf32> -> vector<128x256xf32>
    %c0_4 = arith.constant 0 : index
    %c0_5 = arith.constant 0 : index
    %4 = vector.load %arg7[%c0_4, %c0_5] : memref<128x128xf32, #tpu.memory_space<vmem>>, vector<128x128xf32>
    %cst_6 = arith.constant dense<0.000000e+00> : vector<128x256xf32>
    %5 = tpu.matmul %4, %3, %cst_6 {dimension_numbers = #tpu.dot_dimension_numbers<[1], [0], [0], [1], [0, 0, 1, 1], [], []>} : vector<128x128xf32>, vector<128x256xf32>, vector<128x256xf32> -> vector<128x256xf32>
    %c0_7 = arith.constant 0 : index
    %c0_8 = arith.constant 0 : index
    %6 = vector.load %arg11[%c0_7, %c0_8] : memref<128x256xf32, #tpu.memory_space<vmem>>, vector<128x256xf32>
    tpu.vector_store %arg11[%c0_7, %c0_8], %5 {strides = array<i32>} : memref<128x256xf32, #tpu.memory_space<vmem>>, vector<128x256xf32>,
    %cst_9 = arith.constant 0.000000e+00 : f32
    %7 = vector.broadcast %cst_9 : f32 to vector<18x18x128xf32>
    %c0_10 = arith.constant 0 : index
    %c0_11 = arith.constant 0 : index
    %c0_12 = arith.constant 0 : index
    %8 = vector.load %arg9[%c0_10, %c0_11, %c0_12] : memref<18x18x128xf32, #tpu.memory_space<vmem>>, vector<18x18x128xf32>
    tpu.vector_store %arg9[%c0_10, %c0_11, %c0_12], %7 {strides = array<i32>} : memref<18x18x128xf32, #tpu.memory_space<vmem>>, vector<18x18x128xf32>,
    %9 = tpu.transpose %3, [1, 0] : vector<128x256xf32> -> vector<256x128xf32>
    %10 = vector.shape_cast %9 : vector<256x128xf32> to vector<16x16x128xf32>
    %c1 = arith.constant 1 : index
    %c1_13 = arith.constant 1 : index
    %c0_14 = arith.constant 0 : index
    %11 = vector.load %arg9[%c1, %c1_13, %c0_14] : memref<18x18x128xf32, #tpu.memory_space<vmem>>, vector<16x16x128xf32>
    tpu.vector_store %arg9[%c1, %c1_13, %c0_14], %10 {strides = array<i32>} : memref<18x18x128xf32, #tpu.memory_space<vmem>>, vector<16x16x128xf32>,
    %c0_15 = arith.constant 0 : index
    %c0_16 = arith.constant 0 : index
    %12 = vector.load %arg5[%c0_15, %c0_16] : memref<1x128xf32, #tpu.memory_space<vmem>>, vector<1x128xf32>
    %13 = vector.shape_cast %12 : vector<1x128xf32> to vector<1x128xf32>
    %14 = vector.broadcast %13 : vector<1x128xf32> to vector<256x128xf32>
    %c0_17 = arith.constant 0 : index
    %c0_18 = arith.constant 0 : index
    %15 = vector.load %arg10[%c0_17, %c0_18] : memref<256x128xf32, #tpu.memory_space<vmem>>, vector<256x128xf32>
    tpu.vector_store %arg10[%c0_17, %c0_18], %14 {strides = array<i32>} : memref<256x128xf32, #tpu.memory_space<vmem>>, vector<256x128xf32>,
    %c0_19 = arith.constant 0 : index
    %c0_20 = arith.constant 0 : index
    %c0_21 = arith.constant 0 : index
    %16 = vector.load %arg9[%c0_19, %c0_20, %c0_21] : memref<18x18x128xf32, #tpu.memory_space<vmem>>, vector<16x16x128xf32>
    %17 = vector.shape_cast %16 : vector<16x16x128xf32> to vector<256x128xf32>
    %c0_22 = arith.constant 0 : index
    %c0_23 = arith.constant 0 : index
    %18 = vector.load %arg10[%c0_22, %c0_23] : memref<256x128xf32, #tpu.memory_space<vmem>>, vector<256x128xf32>
    %c0_24 = arith.constant 0 : index
    %c0_25 = arith.constant 0 : index
    %c0_26 = arith.constant 0 : index
    %c0_27 = arith.constant 0 : index
    %19 = vector.load %arg3[%c0_24, %c0_25, %c0_26, %c0_27] : memref<3x3x128x128xf32, #tpu.memory_space<vmem>>, vector<1x1x128x128xf32>
    %20 = vector.shape_cast %19 : vector<1x1x128x128xf32> to vector<128x128xf32>
    %cst_28 = arith.constant dense<0.000000e+00> : vector<256x128xf32>
    %21 = tpu.matmul %17, %20, %cst_28 {dimension_numbers = #tpu.dot_dimension_numbers<[1], [0], [0], [1], [0, 0, 1, 1], [], []>} : vector<256x128xf32>, vector<128x128xf32>, vector<256x128xf32> -> vector<256x128xf32>
    %22 = arith.addf %18, %21 : vector<256x128xf32>
    %c0_29 = arith.constant 0 : index
    %c0_30 = arith.constant 0 : index
    %23 = vector.load %arg10[%c0_29, %c0_30] : memref<256x128xf32, #tpu.memory_space<vmem>>, vector<256x128xf32>
    tpu.vector_store %arg10[%c0_29, %c0_30], %22 {strides = array<i32>} : memref<256x128xf32, #tpu.memory_space<vmem>>, vector<256x128xf32>,
    %c0_31 = arith.constant 0 : index
    %c1_32 = arith.constant 1 : index
    %c0_33 = arith.constant 0 : index
    %24 = vector.load %arg9[%c0_31, %c1_32, %c0_33] : memref<18x18x128xf32, #tpu.memory_space<vmem>>, vector<16x16x128xf32>
    %25 = vector.shape_cast %24 : vector<16x16x128xf32> to vector<256x128xf32>
    %c0_34 = arith.constant 0 : index
    %c0_35 = arith.constant 0 : index
    %26 = vector.load %arg10[%c0_34, %c0_35] : memref<256x128xf32, #tpu.memory_space<vmem>>, vector<256x128xf32>
    %c0_36 = arith.constant 0 : index
    %c1_37 = arith.constant 1 : index
    %c0_38 = arith.constant 0 : index
    %c0_39 = arith.constant 0 : index
    %27 = vector.load %arg3[%c0_36, %c1_37, %c0_38, %c0_39] : memref<3x3x128x128xf32, #tpu.memory_space<vmem>>, vector<1x1x128x128xf32>
    %28 = vector.shape_cast %27 : vector<1x1x128x128xf32> to vector<128x128xf32>
    %cst_40 = arith.constant dense<0.000000e+00> : vector<256x128xf32>
    %29 = tpu.matmul %25, %28, %cst_40 {dimension_numbers = #tpu.dot_dimension_numbers<[1], [0], [0], [1], [0, 0, 1, 1], [], []>} : vector<256x128xf32>, vector<128x128xf32>, vector<256x128xf32> -> vector<256x128xf32>
    %30 = arith.addf %26, %29 : vector<256x128xf32>
    %c0_41 = arith.constant 0 : index
    %c0_42 = arith.constant 0 : index
    %31 = vector.load %arg10[%c0_41, %c0_42] : memref<256x128xf32, #tpu.memory_space<vmem>>, vector<256x128xf32>
    tpu.vector_store %arg10[%c0_41, %c0_42], %30 {strides = array<i32>} : memref<256x128xf32, #tpu.memory_space<vmem>>, vector<256x128xf32>,
    %c0_43 = arith.constant 0 : index
    %c2 = arith.constant 2 : index
    %c0_44 = arith.constant 0 : index
    %32 = vector.load %arg9[%c0_43, %c2, %c0_44] : memref<18x18x128xf32, #tpu.memory_space<vmem>>, vector<16x16x128xf32>
    %33 = vector.shape_cast %32 : vector<16x16x128xf32> to vector<256x128xf32>
    %c0_45 = arith.constant 0 : index
    %c0_46 = arith.constant 0 : index
    %34 = vector.load %arg10[%c0_45, %c0_46] : memref<256x128xf32, #tpu.memory_space<vmem>>, vector<256x128xf32>
    %c0_47 = arith.constant 0 : index
    %c2_48 = arith.constant 2 : index
    %c0_49 = arith.constant 0 : index
    %c0_50 = arith.constant 0 : index
    %35 = vector.load %arg3[%c0_47, %c2_48, %c0_49, %c0_50] : memref<3x3x128x128xf32, #tpu.memory_space<vmem>>, vector<1x1x128x128xf32>
    %36 = vector.shape_cast %35 : vector<1x1x128x128xf32> to vector<128x128xf32>
    %cst_51 = arith.constant dense<0.000000e+00> : vector<256x128xf32>
    %37 = tpu.matmul %33, %36, %cst_51 {dimension_numbers = #tpu.dot_dimension_numbers<[1], [0], [0], [1], [0, 0, 1, 1], [], []>} : vector<256x128xf32>, vector<128x128xf32>, vector<256x128xf32> -> vector<256x128xf32>
    %38 = arith.addf %34, %37 : vector<256x128xf32>
    %c0_52 = arith.constant 0 : index
    %c0_53 = arith.constant 0 : index
    %39 = vector.load %arg10[%c0_52, %c0_53] : memref<256x128xf32, #tpu.memory_space<vmem>>, vector<256x128xf32>
    tpu.vector_store %arg10[%c0_52, %c0_53], %38 {strides = array<i32>} : memref<256x128xf32, #tpu.memory_space<vmem>>, vector<256x128xf32>,
    %c1_54 = arith.constant 1 : index
    %c0_55 = arith.constant 0 : index
    %c0_56 = arith.constant 0 : index
    %40 = vector.load %arg9[%c1_54, %c0_55, %c0_56] : memref<18x18x128xf32, #tpu.memory_space<vmem>>, vector<16x16x128xf32>
    %41 = vector.shape_cast %40 : vector<16x16x128xf32> to vector<256x128xf32>
    %c0_57 = arith.constant 0 : index
    %c0_58 = arith.constant 0 : index
    %42 = vector.load %arg10[%c0_57, %c0_58] : memref<256x128xf32, #tpu.memory_space<vmem>>, vector<256x128xf32>
    %c1_59 = arith.constant 1 : index
    %c0_60 = arith.constant 0 : index
    %c0_61 = arith.constant 0 : index
    %c0_62 = arith.constant 0 : index
    %43 = vector.load %arg3[%c1_59, %c0_60, %c0_61, %c0_62] : memref<3x3x128x128xf32, #tpu.memory_space<vmem>>, vector<1x1x128x128xf32>
    %44 = vector.shape_cast %43 : vector<1x1x128x128xf32> to vector<128x128xf32>
    %cst_63 = arith.constant dense<0.000000e+00> : vector<256x128xf32>
    %45 = tpu.matmul %41, %44, %cst_63 {dimension_numbers = #tpu.dot_dimension_numbers<[1], [0], [0], [1], [0, 0, 1, 1], [], []>} : vector<256x128xf32>, vector<128x128xf32>, vector<256x128xf32> -> vector<256x128xf32>
    %46 = arith.addf %42, %45 : vector<256x128xf32>
    %c0_64 = arith.constant 0 : index
    %c0_65 = arith.constant 0 : index
    %47 = vector.load %arg10[%c0_64, %c0_65] : memref<256x128xf32, #tpu.memory_space<vmem>>, vector<256x128xf32>
    tpu.vector_store %arg10[%c0_64, %c0_65], %46 {strides = array<i32>} : memref<256x128xf32, #tpu.memory_space<vmem>>, vector<256x128xf32>,
    %c1_66 = arith.constant 1 : index
    %c1_67 = arith.constant 1 : index
    %c0_68 = arith.constant 0 : index
    %48 = vector.load %arg9[%c1_66, %c1_67, %c0_68] : memref<18x18x128xf32, #tpu.memory_space<vmem>>, vector<16x16x128xf32>
    %49 = vector.shape_cast %48 : vector<16x16x128xf32> to vector<256x128xf32>
    %c0_69 = arith.constant 0 : index
    %c0_70 = arith.constant 0 : index
    %50 = vector.load %arg10[%c0_69, %c0_70] : memref<256x128xf32, #tpu.memory_space<vmem>>, vector<256x128xf32>
    %c1_71 = arith.constant 1 : index
    %c1_72 = arith.constant 1 : index
    %c0_73 = arith.constant 0 : index
    %c0_74 = arith.constant 0 : index
    %51 = vector.load %arg3[%c1_71, %c1_72, %c0_73, %c0_74] : memref<3x3x128x128xf32, #tpu.memory_space<vmem>>, vector<1x1x128x128xf32>
    %52 = vector.shape_cast %51 : vector<1x1x128x128xf32> to vector<128x128xf32>
    %cst_75 = arith.constant dense<0.000000e+00> : vector<256x128xf32>
    %53 = tpu.matmul %49, %52, %cst_75 {dimension_numbers = #tpu.dot_dimension_numbers<[1], [0], [0], [1], [0, 0, 1, 1], [], []>} : vector<256x128xf32>, vector<128x128xf32>, vector<256x128xf32> -> vector<256x128xf32>
    %54 = arith.addf %50, %53 : vector<256x128xf32>
    %c0_76 = arith.constant 0 : index
    %c0_77 = arith.constant 0 : index
    %55 = vector.load %arg10[%c0_76, %c0_77] : memref<256x128xf32, #tpu.memory_space<vmem>>, vector<256x128xf32>
    tpu.vector_store %arg10[%c0_76, %c0_77], %54 {strides = array<i32>} : memref<256x128xf32, #tpu.memory_space<vmem>>, vector<256x128xf32>,
    %c1_78 = arith.constant 1 : index
    %c2_79 = arith.constant 2 : index
    %c0_80 = arith.constant 0 : index
    %56 = vector.load %arg9[%c1_78, %c2_79, %c0_80] : memref<18x18x128xf32, #tpu.memory_space<vmem>>, vector<16x16x128xf32>
    %57 = vector.shape_cast %56 : vector<16x16x128xf32> to vector<256x128xf32>
    %c0_81 = arith.constant 0 : index
    %c0_82 = arith.constant 0 : index
    %58 = vector.load %arg10[%c0_81, %c0_82] : memref<256x128xf32, #tpu.memory_space<vmem>>, vector<256x128xf32>
    %c1_83 = arith.constant 1 : index
    %c2_84 = arith.constant 2 : index
    %c0_85 = arith.constant 0 : index
    %c0_86 = arith.constant 0 : index
    %59 = vector.load %arg3[%c1_83, %c2_84, %c0_85, %c0_86] : memref<3x3x128x128xf32, #tpu.memory_space<vmem>>, vector<1x1x128x128xf32>
    %60 = vector.shape_cast %59 : vector<1x1x128x128xf32> to vector<128x128xf32>
    %cst_87 = arith.constant dense<0.000000e+00> : vector<256x128xf32>
    %61 = tpu.matmul %57, %60, %cst_87 {dimension_numbers = #tpu.dot_dimension_numbers<[1], [0], [0], [1], [0, 0, 1, 1], [], []>} : vector<256x128xf32>, vector<128x128xf32>, vector<256x128xf32> -> vector<256x128xf32>
    %62 = arith.addf %58, %61 : vector<256x128xf32>
    %c0_88 = arith.constant 0 : index
    %c0_89 = arith.constant 0 : index
    %63 = vector.load %arg10[%c0_88, %c0_89] : memref<256x128xf32, #tpu.memory_space<vmem>>, vector<256x128xf32>
    tpu.vector_store %arg10[%c0_88, %c0_89], %62 {strides = array<i32>} : memref<256x128xf32, #tpu.memory_space<vmem>>, vector<256x128xf32>,
    %c2_90 = arith.constant 2 : index
    %c0_91 = arith.constant 0 : index
    %c0_92 = arith.constant 0 : index
    %64 = vector.load %arg9[%c2_90, %c0_91, %c0_92] : memref<18x18x128xf32, #tpu.memory_space<vmem>>, vector<16x16x128xf32>
    %65 = vector.shape_cast %64 : vector<16x16x128xf32> to vector<256x128xf32>
    %c0_93 = arith.constant 0 : index
    %c0_94 = arith.constant 0 : index
    %66 = vector.load %arg10[%c0_93, %c0_94] : memref<256x128xf32, #tpu.memory_space<vmem>>, vector<256x128xf32>
    %c2_95 = arith.constant 2 : index
    %c0_96 = arith.constant 0 : index
    %c0_97 = arith.constant 0 : index
    %c0_98 = arith.constant 0 : index
    %67 = vector.load %arg3[%c2_95, %c0_96, %c0_97, %c0_98] : memref<3x3x128x128xf32, #tpu.memory_space<vmem>>, vector<1x1x128x128xf32>
    %68 = vector.shape_cast %67 : vector<1x1x128x128xf32> to vector<128x128xf32>
    %cst_99 = arith.constant dense<0.000000e+00> : vector<256x128xf32>
    %69 = tpu.matmul %65, %68, %cst_99 {dimension_numbers = #tpu.dot_dimension_numbers<[1], [0], [0], [1], [0, 0, 1, 1], [], []>} : vector<256x128xf32>, vector<128x128xf32>, vector<256x128xf32> -> vector<256x128xf32>
    %70 = arith.addf %66, %69 : vector<256x128xf32>
    %c0_100 = arith.constant 0 : index
    %c0_101 = arith.constant 0 : index
    %71 = vector.load %arg10[%c0_100, %c0_101] : memref<256x128xf32, #tpu.memory_space<vmem>>, vector<256x128xf32>
    tpu.vector_store %arg10[%c0_100, %c0_101], %70 {strides = array<i32>} : memref<256x128xf32, #tpu.memory_space<vmem>>, vector<256x128xf32>,
    %c2_102 = arith.constant 2 : index
    %c1_103 = arith.constant 1 : index
    %c0_104 = arith.constant 0 : index
    %72 = vector.load %arg9[%c2_102, %c1_103, %c0_104] : memref<18x18x128xf32, #tpu.memory_space<vmem>>, vector<16x16x128xf32>
    %73 = vector.shape_cast %72 : vector<16x16x128xf32> to vector<256x128xf32>
    %c0_105 = arith.constant 0 : index
    %c0_106 = arith.constant 0 : index
    %74 = vector.load %arg10[%c0_105, %c0_106] : memref<256x128xf32, #tpu.memory_space<vmem>>, vector<256x128xf32>
    %c2_107 = arith.constant 2 : index
    %c1_108 = arith.constant 1 : index
    %c0_109 = arith.constant 0 : index
    %c0_110 = arith.constant 0 : index
    %75 = vector.load %arg3[%c2_107, %c1_108, %c0_109, %c0_110] : memref<3x3x128x128xf32, #tpu.memory_space<vmem>>, vector<1x1x128x128xf32>
    %76 = vector.shape_cast %75 : vector<1x1x128x128xf32> to vector<128x128xf32>
    %cst_111 = arith.constant dense<0.000000e+00> : vector<256x128xf32>
    %77 = tpu.matmul %73, %76, %cst_111 {dimension_numbers = #tpu.dot_dimension_numbers<[1], [0], [0], [1], [0, 0, 1, 1], [], []>} : vector<256x128xf32>, vector<128x128xf32>, vector<256x128xf32> -> vector<256x128xf32>
    %78 = arith.addf %74, %77 : vector<256x128xf32>
    %c0_112 = arith.constant 0 : index
    %c0_113 = arith.constant 0 : index
    %79 = vector.load %arg10[%c0_112, %c0_113] : memref<256x128xf32, #tpu.memory_space<vmem>>, vector<256x128xf32>
    tpu.vector_store %arg10[%c0_112, %c0_113], %78 {strides = array<i32>} : memref<256x128xf32, #tpu.memory_space<vmem>>, vector<256x128xf32>,
    %c2_114 = arith.constant 2 : index
    %c2_115 = arith.constant 2 : index
    %c0_116 = arith.constant 0 : index
    %80 = vector.load %arg9[%c2_114, %c2_115, %c0_116] : memref<18x18x128xf32, #tpu.memory_space<vmem>>, vector<16x16x128xf32>
    %81 = vector.shape_cast %80 : vector<16x16x128xf32> to vector<256x128xf32>
    %c0_117 = arith.constant 0 : index
    %c0_118 = arith.constant 0 : index
    %82 = vector.load %arg10[%c0_117, %c0_118] : memref<256x128xf32, #tpu.memory_space<vmem>>, vector<256x128xf32>
    %c2_119 = arith.constant 2 : index
    %c2_120 = arith.constant 2 : index
    %c0_121 = arith.constant 0 : index
    %c0_122 = arith.constant 0 : index
    %83 = vector.load %arg3[%c2_119, %c2_120, %c0_121, %c0_122] : memref<3x3x128x128xf32, #tpu.memory_space<vmem>>, vector<1x1x128x128xf32>
    %84 = vector.shape_cast %83 : vector<1x1x128x128xf32> to vector<128x128xf32>
    %cst_123 = arith.constant dense<0.000000e+00> : vector<256x128xf32>
    %85 = tpu.matmul %81, %84, %cst_123 {dimension_numbers = #tpu.dot_dimension_numbers<[1], [0], [0], [1], [0, 0, 1, 1], [], []>} : vector<256x128xf32>, vector<128x128xf32>, vector<256x128xf32> -> vector<256x128xf32>
    %86 = arith.addf %82, %85 : vector<256x128xf32>
    %c0_124 = arith.constant 0 : index
    %c0_125 = arith.constant 0 : index
    %87 = vector.load %arg10[%c0_124, %c0_125] : memref<256x128xf32, #tpu.memory_space<vmem>>, vector<256x128xf32>
    tpu.vector_store %arg10[%c0_124, %c0_125], %86 {strides = array<i32>} : memref<256x128xf32, #tpu.memory_space<vmem>>, vector<256x128xf32>,
    %c0_126 = arith.constant 0 : index
    %c0_127 = arith.constant 0 : index
    %88 = vector.load %arg10[%c0_126, %c0_127] : memref<256x128xf32, #tpu.memory_space<vmem>>, vector<256x128xf32>
    %cst_128 = arith.constant 0.000000e+00 : f32
    %89 = vector.broadcast %cst_128 : f32 to vector<256x128xf32>
    %90 = arith.maximumf %88, %89 : vector<256x128xf32>
    %91 = vector.shape_cast %90 : vector<256x128xf32> to vector<16x16x128xf32>
    %c1_129 = arith.constant 1 : index
    %c1_130 = arith.constant 1 : index
    %c0_131 = arith.constant 0 : index
    %92 = vector.load %arg9[%c1_129, %c1_130, %c0_131] : memref<18x18x128xf32, #tpu.memory_space<vmem>>, vector<16x16x128xf32>
    tpu.vector_store %arg9[%c1_129, %c1_130, %c0_131], %91 {strides = array<i32>} : memref<18x18x128xf32, #tpu.memory_space<vmem>>, vector<16x16x128xf32>,
    %c0_132 = arith.constant 0 : index
    %c0_133 = arith.constant 0 : index
    %93 = vector.load %arg6[%c0_132, %c0_133] : memref<1x128xf32, #tpu.memory_space<vmem>>, vector<1x128xf32>
    %94 = vector.shape_cast %93 : vector<1x128xf32> to vector<1x128xf32>
    %95 = vector.broadcast %94 : vector<1x128xf32> to vector<256x128xf32>
    %c0_134 = arith.constant 0 : index
    %c0_135 = arith.constant 0 : index
    %96 = vector.load %arg10[%c0_134, %c0_135] : memref<256x128xf32, #tpu.memory_space<vmem>>, vector<256x128xf32>
    tpu.vector_store %arg10[%c0_134, %c0_135], %95 {strides = array<i32>} : memref<256x128xf32, #tpu.memory_space<vmem>>, vector<256x128xf32>,
    %c0_136 = arith.constant 0 : index
    %c0_137 = arith.constant 0 : index
    %c0_138 = arith.constant 0 : index
    %97 = vector.load %arg9[%c0_136, %c0_137, %c0_138] : memref<18x18x128xf32, #tpu.memory_space<vmem>>, vector<16x16x128xf32>
    %98 = vector.shape_cast %97 : vector<16x16x128xf32> to vector<256x128xf32>
    %c0_139 = arith.constant 0 : index
    %c0_140 = arith.constant 0 : index
    %99 = vector.load %arg10[%c0_139, %c0_140] : memref<256x128xf32, #tpu.memory_space<vmem>>, vector<256x128xf32>
    %c0_141 = arith.constant 0 : index
    %c0_142 = arith.constant 0 : index
    %c0_143 = arith.constant 0 : index
    %c0_144 = arith.constant 0 : index
    %100 = vector.load %arg4[%c0_141, %c0_142, %c0_143, %c0_144] : memref<3x3x128x128xf32, #tpu.memory_space<vmem>>, vector<1x1x128x128xf32>
    %101 = vector.shape_cast %100 : vector<1x1x128x128xf32> to vector<128x128xf32>
    %cst_145 = arith.constant dense<0.000000e+00> : vector<256x128xf32>
    %102 = tpu.matmul %98, %101, %cst_145 {dimension_numbers = #tpu.dot_dimension_numbers<[1], [0], [0], [1], [0, 0, 1, 1], [], []>} : vector<256x128xf32>, vector<128x128xf32>, vector<256x128xf32> -> vector<256x128xf32>
    %103 = arith.addf %99, %102 : vector<256x128xf32>
    %c0_146 = arith.constant 0 : index
    %c0_147 = arith.constant 0 : index
    %104 = vector.load %arg10[%c0_146, %c0_147] : memref<256x128xf32, #tpu.memory_space<vmem>>, vector<256x128xf32>
    tpu.vector_store %arg10[%c0_146, %c0_147], %103 {strides = array<i32>} : memref<256x128xf32, #tpu.memory_space<vmem>>, vector<256x128xf32>,
    %c0_148 = arith.constant 0 : index
    %c1_149 = arith.constant 1 : index
    %c0_150 = arith.constant 0 : index
    %105 = vector.load %arg9[%c0_148, %c1_149, %c0_150] : memref<18x18x128xf32, #tpu.memory_space<vmem>>, vector<16x16x128xf32>
    %106 = vector.shape_cast %105 : vector<16x16x128xf32> to vector<256x128xf32>
    %c0_151 = arith.constant 0 : index
    %c0_152 = arith.constant 0 : index
    %107 = vector.load %arg10[%c0_151, %c0_152] : memref<256x128xf32, #tpu.memory_space<vmem>>, vector<256x128xf32>
    %c0_153 = arith.constant 0 : index
    %c1_154 = arith.constant 1 : index
    %c0_155 = arith.constant 0 : index
    %c0_156 = arith.constant 0 : index
    %108 = vector.load %arg4[%c0_153, %c1_154, %c0_155, %c0_156] : memref<3x3x128x128xf32, #tpu.memory_space<vmem>>, vector<1x1x128x128xf32>
    %109 = vector.shape_cast %108 : vector<1x1x128x128xf32> to vector<128x128xf32>
    %cst_157 = arith.constant dense<0.000000e+00> : vector<256x128xf32>
    %110 = tpu.matmul %106, %109, %cst_157 {dimension_numbers = #tpu.dot_dimension_numbers<[1], [0], [0], [1], [0, 0, 1, 1], [], []>} : vector<256x128xf32>, vector<128x128xf32>, vector<256x128xf32> -> vector<256x128xf32>
    %111 = arith.addf %107, %110 : vector<256x128xf32>
    %c0_158 = arith.constant 0 : index
    %c0_159 = arith.constant 0 : index
    %112 = vector.load %arg10[%c0_158, %c0_159] : memref<256x128xf32, #tpu.memory_space<vmem>>, vector<256x128xf32>
    tpu.vector_store %arg10[%c0_158, %c0_159], %111 {strides = array<i32>} : memref<256x128xf32, #tpu.memory_space<vmem>>, vector<256x128xf32>,
    %c0_160 = arith.constant 0 : index
    %c2_161 = arith.constant 2 : index
    %c0_162 = arith.constant 0 : index
    %113 = vector.load %arg9[%c0_160, %c2_161, %c0_162] : memref<18x18x128xf32, #tpu.memory_space<vmem>>, vector<16x16x128xf32>
    %114 = vector.shape_cast %113 : vector<16x16x128xf32> to vector<256x128xf32>
    %c0_163 = arith.constant 0 : index
    %c0_164 = arith.constant 0 : index
    %115 = vector.load %arg10[%c0_163, %c0_164] : memref<256x128xf32, #tpu.memory_space<vmem>>, vector<256x128xf32>
    %c0_165 = arith.constant 0 : index
    %c2_166 = arith.constant 2 : index
    %c0_167 = arith.constant 0 : index
    %c0_168 = arith.constant 0 : index
    %116 = vector.load %arg4[%c0_165, %c2_166, %c0_167, %c0_168] : memref<3x3x128x128xf32, #tpu.memory_space<vmem>>, vector<1x1x128x128xf32>
    %117 = vector.shape_cast %116 : vector<1x1x128x128xf32> to vector<128x128xf32>
    %cst_169 = arith.constant dense<0.000000e+00> : vector<256x128xf32>
    %118 = tpu.matmul %114, %117, %cst_169 {dimension_numbers = #tpu.dot_dimension_numbers<[1], [0], [0], [1], [0, 0, 1, 1], [], []>} : vector<256x128xf32>, vector<128x128xf32>, vector<256x128xf32> -> vector<256x128xf32>
    %119 = arith.addf %115, %118 : vector<256x128xf32>
    %c0_170 = arith.constant 0 : index
    %c0_171 = arith.constant 0 : index
    %120 = vector.load %arg10[%c0_170, %c0_171] : memref<256x128xf32, #tpu.memory_space<vmem>>, vector<256x128xf32>
    tpu.vector_store %arg10[%c0_170, %c0_171], %119 {strides = array<i32>} : memref<256x128xf32, #tpu.memory_space<vmem>>, vector<256x128xf32>,
    %c1_172 = arith.constant 1 : index
    %c0_173 = arith.constant 0 : index
    %c0_174 = arith.constant 0 : index
    %121 = vector.load %arg9[%c1_172, %c0_173, %c0_174] : memref<18x18x128xf32, #tpu.memory_space<vmem>>, vector<16x16x128xf32>
    %122 = vector.shape_cast %121 : vector<16x16x128xf32> to vector<256x128xf32>
    %c0_175 = arith.constant 0 : index
    %c0_176 = arith.constant 0 : index
    %123 = vector.load %arg10[%c0_175, %c0_176] : memref<256x128xf32, #tpu.memory_space<vmem>>, vector<256x128xf32>
    %c1_177 = arith.constant 1 : index
    %c0_178 = arith.constant 0 : index
    %c0_179 = arith.constant 0 : index
    %c0_180 = arith.constant 0 : index
    %124 = vector.load %arg4[%c1_177, %c0_178, %c0_179, %c0_180] : memref<3x3x128x128xf32, #tpu.memory_space<vmem>>, vector<1x1x128x128xf32>
    %125 = vector.shape_cast %124 : vector<1x1x128x128xf32> to vector<128x128xf32>
    %cst_181 = arith.constant dense<0.000000e+00> : vector<256x128xf32>
    %126 = tpu.matmul %122, %125, %cst_181 {dimension_numbers = #tpu.dot_dimension_numbers<[1], [0], [0], [1], [0, 0, 1, 1], [], []>} : vector<256x128xf32>, vector<128x128xf32>, vector<256x128xf32> -> vector<256x128xf32>
    %127 = arith.addf %123, %126 : vector<256x128xf32>
    %c0_182 = arith.constant 0 : index
    %c0_183 = arith.constant 0 : index
    %128 = vector.load %arg10[%c0_182, %c0_183] : memref<256x128xf32, #tpu.memory_space<vmem>>, vector<256x128xf32>
    tpu.vector_store %arg10[%c0_182, %c0_183], %127 {strides = array<i32>} : memref<256x128xf32, #tpu.memory_space<vmem>>, vector<256x128xf32>,
    %c1_184 = arith.constant 1 : index
    %c1_185 = arith.constant 1 : index
    %c0_186 = arith.constant 0 : index
    %129 = vector.load %arg9[%c1_184, %c1_185, %c0_186] : memref<18x18x128xf32, #tpu.memory_space<vmem>>, vector<16x16x128xf32>
    %130 = vector.shape_cast %129 : vector<16x16x128xf32> to vector<256x128xf32>
    %c0_187 = arith.constant 0 : index
    %c0_188 = arith.constant 0 : index
    %131 = vector.load %arg10[%c0_187, %c0_188] : memref<256x128xf32, #tpu.memory_space<vmem>>, vector<256x128xf32>
    %c1_189 = arith.constant 1 : index
    %c1_190 = arith.constant 1 : index
    %c0_191 = arith.constant 0 : index
    %c0_192 = arith.constant 0 : index
    %132 = vector.load %arg4[%c1_189, %c1_190, %c0_191, %c0_192] : memref<3x3x128x128xf32, #tpu.memory_space<vmem>>, vector<1x1x128x128xf32>
    %133 = vector.shape_cast %132 : vector<1x1x128x128xf32> to vector<128x128xf32>
    %cst_193 = arith.constant dense<0.000000e+00> : vector<256x128xf32>
    %134 = tpu.matmul %130, %133, %cst_193 {dimension_numbers = #tpu.dot_dimension_numbers<[1], [0], [0], [1], [0, 0, 1, 1], [], []>} : vector<256x128xf32>, vector<128x128xf32>, vector<256x128xf32> -> vector<256x128xf32>
    %135 = arith.addf %131, %134 : vector<256x128xf32>
    %c0_194 = arith.constant 0 : index
    %c0_195 = arith.constant 0 : index
    %136 = vector.load %arg10[%c0_194, %c0_195] : memref<256x128xf32, #tpu.memory_space<vmem>>, vector<256x128xf32>
    tpu.vector_store %arg10[%c0_194, %c0_195], %135 {strides = array<i32>} : memref<256x128xf32, #tpu.memory_space<vmem>>, vector<256x128xf32>,
    %c1_196 = arith.constant 1 : index
    %c2_197 = arith.constant 2 : index
    %c0_198 = arith.constant 0 : index
    %137 = vector.load %arg9[%c1_196, %c2_197, %c0_198] : memref<18x18x128xf32, #tpu.memory_space<vmem>>, vector<16x16x128xf32>
    %138 = vector.shape_cast %137 : vector<16x16x128xf32> to vector<256x128xf32>
    %c0_199 = arith.constant 0 : index
    %c0_200 = arith.constant 0 : index
    %139 = vector.load %arg10[%c0_199, %c0_200] : memref<256x128xf32, #tpu.memory_space<vmem>>, vector<256x128xf32>
    %c1_201 = arith.constant 1 : index
    %c2_202 = arith.constant 2 : index
    %c0_203 = arith.constant 0 : index
    %c0_204 = arith.constant 0 : index
    %140 = vector.load %arg4[%c1_201, %c2_202, %c0_203, %c0_204] : memref<3x3x128x128xf32, #tpu.memory_space<vmem>>, vector<1x1x128x128xf32>
    %141 = vector.shape_cast %140 : vector<1x1x128x128xf32> to vector<128x128xf32>
    %cst_205 = arith.constant dense<0.000000e+00> : vector<256x128xf32>
    %142 = tpu.matmul %138, %141, %cst_205 {dimension_numbers = #tpu.dot_dimension_numbers<[1], [0], [0], [1], [0, 0, 1, 1], [], []>} : vector<256x128xf32>, vector<128x128xf32>, vector<256x128xf32> -> vector<256x128xf32>
    %143 = arith.addf %139, %142 : vector<256x128xf32>
    %c0_206 = arith.constant 0 : index
    %c0_207 = arith.constant 0 : index
    %144 = vector.load %arg10[%c0_206, %c0_207] : memref<256x128xf32, #tpu.memory_space<vmem>>, vector<256x128xf32>
    tpu.vector_store %arg10[%c0_206, %c0_207], %143 {strides = array<i32>} : memref<256x128xf32, #tpu.memory_space<vmem>>, vector<256x128xf32>,
    %c2_208 = arith.constant 2 : index
    %c0_209 = arith.constant 0 : index
    %c0_210 = arith.constant 0 : index
    %145 = vector.load %arg9[%c2_208, %c0_209, %c0_210] : memref<18x18x128xf32, #tpu.memory_space<vmem>>, vector<16x16x128xf32>
    %146 = vector.shape_cast %145 : vector<16x16x128xf32> to vector<256x128xf32>
    %c0_211 = arith.constant 0 : index
    %c0_212 = arith.constant 0 : index
    %147 = vector.load %arg10[%c0_211, %c0_212] : memref<256x128xf32, #tpu.memory_space<vmem>>, vector<256x128xf32>
    %c2_213 = arith.constant 2 : index
    %c0_214 = arith.constant 0 : index
    %c0_215 = arith.constant 0 : index
    %c0_216 = arith.constant 0 : index
    %148 = vector.load %arg4[%c2_213, %c0_214, %c0_215, %c0_216] : memref<3x3x128x128xf32, #tpu.memory_space<vmem>>, vector<1x1x128x128xf32>
    %149 = vector.shape_cast %148 : vector<1x1x128x128xf32> to vector<128x128xf32>
    %cst_217 = arith.constant dense<0.000000e+00> : vector<256x128xf32>
    %150 = tpu.matmul %146, %149, %cst_217 {dimension_numbers = #tpu.dot_dimension_numbers<[1], [0], [0], [1], [0, 0, 1, 1], [], []>} : vector<256x128xf32>, vector<128x128xf32>, vector<256x128xf32> -> vector<256x128xf32>
    %151 = arith.addf %147, %150 : vector<256x128xf32>
    %c0_218 = arith.constant 0 : index
    %c0_219 = arith.constant 0 : index
    %152 = vector.load %arg10[%c0_218, %c0_219] : memref<256x128xf32, #tpu.memory_space<vmem>>, vector<256x128xf32>
    tpu.vector_store %arg10[%c0_218, %c0_219], %151 {strides = array<i32>} : memref<256x128xf32, #tpu.memory_space<vmem>>, vector<256x128xf32>,
    %c2_220 = arith.constant 2 : index
    %c1_221 = arith.constant 1 : index
    %c0_222 = arith.constant 0 : index
    %153 = vector.load %arg9[%c2_220, %c1_221, %c0_222] : memref<18x18x128xf32, #tpu.memory_space<vmem>>, vector<16x16x128xf32>
    %154 = vector.shape_cast %153 : vector<16x16x128xf32> to vector<256x128xf32>
    %c0_223 = arith.constant 0 : index
    %c0_224 = arith.constant 0 : index
    %155 = vector.load %arg10[%c0_223, %c0_224] : memref<256x128xf32, #tpu.memory_space<vmem>>, vector<256x128xf32>
    %c2_225 = arith.constant 2 : index
    %c1_226 = arith.constant 1 : index
    %c0_227 = arith.constant 0 : index
    %c0_228 = arith.constant 0 : index
    %156 = vector.load %arg4[%c2_225, %c1_226, %c0_227, %c0_228] : memref<3x3x128x128xf32, #tpu.memory_space<vmem>>, vector<1x1x128x128xf32>
    %157 = vector.shape_cast %156 : vector<1x1x128x128xf32> to vector<128x128xf32>
    %cst_229 = arith.constant dense<0.000000e+00> : vector<256x128xf32>
    %158 = tpu.matmul %154, %157, %cst_229 {dimension_numbers = #tpu.dot_dimension_numbers<[1], [0], [0], [1], [0, 0, 1, 1], [], []>} : vector<256x128xf32>, vector<128x128xf32>, vector<256x128xf32> -> vector<256x128xf32>
    %159 = arith.addf %155, %158 : vector<256x128xf32>
    %c0_230 = arith.constant 0 : index
    %c0_231 = arith.constant 0 : index
    %160 = vector.load %arg10[%c0_230, %c0_231] : memref<256x128xf32, #tpu.memory_space<vmem>>, vector<256x128xf32>
    tpu.vector_store %arg10[%c0_230, %c0_231], %159 {strides = array<i32>} : memref<256x128xf32, #tpu.memory_space<vmem>>, vector<256x128xf32>,
    %c2_232 = arith.constant 2 : index
    %c2_233 = arith.constant 2 : index
    %c0_234 = arith.constant 0 : index
    %161 = vector.load %arg9[%c2_232, %c2_233, %c0_234] : memref<18x18x128xf32, #tpu.memory_space<vmem>>, vector<16x16x128xf32>
    %162 = vector.shape_cast %161 : vector<16x16x128xf32> to vector<256x128xf32>
    %c0_235 = arith.constant 0 : index
    %c0_236 = arith.constant 0 : index
    %163 = vector.load %arg10[%c0_235, %c0_236] : memref<256x128xf32, #tpu.memory_space<vmem>>, vector<256x128xf32>
    %c2_237 = arith.constant 2 : index
    %c2_238 = arith.constant 2 : index
    %c0_239 = arith.constant 0 : index
    %c0_240 = arith.constant 0 : index
    %164 = vector.load %arg4[%c2_237, %c2_238, %c0_239, %c0_240] : memref<3x3x128x128xf32, #tpu.memory_space<vmem>>, vector<1x1x128x128xf32>
    %165 = vector.shape_cast %164 : vector<1x1x128x128xf32> to vector<128x128xf32>
    %cst_241 = arith.constant dense<0.000000e+00> : vector<256x128xf32>
    %166 = tpu.matmul %162, %165, %cst_241 {dimension_numbers = #tpu.dot_dimension_numbers<[1], [0], [0], [1], [0, 0, 1, 1], [], []>} : vector<256x128xf32>, vector<128x128xf32>, vector<256x128xf32> -> vector<256x128xf32>
    %167 = arith.addf %163, %166 : vector<256x128xf32>
    %c0_242 = arith.constant 0 : index
    %c0_243 = arith.constant 0 : index
    %168 = vector.load %arg10[%c0_242, %c0_243] : memref<256x128xf32, #tpu.memory_space<vmem>>, vector<256x128xf32>
    tpu.vector_store %arg10[%c0_242, %c0_243], %167 {strides = array<i32>} : memref<256x128xf32, #tpu.memory_space<vmem>>, vector<256x128xf32>,
    %c0_244 = arith.constant 0 : index
    %c0_245 = arith.constant 0 : index
    %169 = vector.load %arg10[%c0_244, %c0_245] : memref<256x128xf32, #tpu.memory_space<vmem>>, vector<256x128xf32>
    %170 = tpu.transpose %169, [1, 0] : vector<256x128xf32> -> vector<128x256xf32>
    %c0_246 = arith.constant 0 : index
    %c0_247 = arith.constant 0 : index
    %171 = vector.load %arg11[%c0_246, %c0_247] : memref<128x256xf32, #tpu.memory_space<vmem>>, vector<128x256xf32>
    %172 = arith.addf %170, %171 : vector<128x256xf32>
    %cst_248 = arith.constant 0.000000e+00 : f32
    %173 = vector.broadcast %cst_248 : f32 to vector<128x256xf32>
    %174 = arith.maximumf %172, %173 : vector<128x256xf32>
    %175 = vector.extract_strided_slice %174 {offsets = [0, 0], sizes = [6, 256], strides = [1, 1]} : vector<128x256xf32> to vector<6x256xf32>
    %c0_249 = arith.constant 0 : index
    %c0_250 = arith.constant 0 : index
    %c0_251 = arith.constant 0 : index
    %176 = vector.load %arg8[%c0_249, %c0_250, %c0_251] : memref<1x6x256xf32, #tpu.memory_space<vmem>>, vector<1x6x256xf32>
    %177 = vector.shape_cast %176 : vector<1x6x256xf32> to vector<6x256xf32>
    %178 = vector.shape_cast %175 : vector<6x256xf32> to vector<1x6x256xf32>
    tpu.vector_store %arg8[%c0_249, %c0_250, %c0_251], %178 {strides = array<i32>} : memref<1x6x256xf32, #tpu.memory_space<vmem>>, vector<1x6x256xf32>,
    return
  }
  func.func @transform_0(%arg0: i32) -> (i32, i32, i32) {
    %c0_i32 = arith.constant 0 : i32
    %c0_i32_0 = arith.constant 0 : i32
    %c0_i32_1 = arith.constant 0 : i32
    return %arg0, %c0_i32, %c0_i32_0 : i32, i32, i32
  }
  func.func @transform_1(%arg0: i32) -> (i32, i32) {
    %c0_i32 = arith.constant 0 : i32
    %c0_i32_0 = arith.constant 0 : i32
    %c0_i32_1 = arith.constant 0 : i32
    return %c0_i32, %c0_i32_0 : i32, i32
  }
  func.func @transform_2(%arg0: i32) -> (i32, i32, i32, i32) {
    %c0_i32 = arith.constant 0 : i32
    %c0_i32_0 = arith.constant 0 : i32
    %c0_i32_1 = arith.constant 0 : i32
    %c0_i32_2 = arith.constant 0 : i32
    %c0_i32_3 = arith.constant 0 : i32
    return %c0_i32, %c0_i32_0, %c0_i32_1, %c0_i32_2 : i32, i32, i32, i32
  }
  func.func @transform_3(%arg0: i32) -> (i32, i32, i32, i32) {
    %c0_i32 = arith.constant 0 : i32
    %c0_i32_0 = arith.constant 0 : i32
    %c0_i32_1 = arith.constant 0 : i32
    %c0_i32_2 = arith.constant 0 : i32
    %c0_i32_3 = arith.constant 0 : i32
    return %c0_i32, %c0_i32_0, %c0_i32_1, %c0_i32_2 : i32, i32, i32, i32
  }
  func.func @transform_4(%arg0: i32) -> (i32, i32) {
    %c0_i32 = arith.constant 0 : i32
    %c0_i32_0 = arith.constant 0 : i32
    %c0_i32_1 = arith.constant 0 : i32
    return %c0_i32, %c0_i32_0 : i32, i32
  }
  func.func @transform_5(%arg0: i32) -> (i32, i32) {
    %c0_i32 = arith.constant 0 : i32
    %c0_i32_0 = arith.constant 0 : i32
    %c0_i32_1 = arith.constant 0 : i32
    return %c0_i32, %c0_i32_0 : i32, i32
  }
  func.func @transform_6(%arg0: i32) -> (i32, i32) {
    %c0_i32 = arith.constant 0 : i32
    %c0_i32_0 = arith.constant 0 : i32
    %c0_i32_1 = arith.constant 0 : i32
    return %c0_i32, %c0_i32_0 : i32, i32
  }
  func.func @transform_7(%arg0: i32) -> (i32, i32, i32) {
    %c0_i32 = arith.constant 0 : i32
    %c0_i32_0 = arith.constant 0 : i32
    %c0_i32_1 = arith.constant 0 : i32
    return %arg0, %c0_i32, %c0_i32_0 : i32, i32, i32
  }
}

</mosaic_0001>

<bundles_post_ra>
// kernel: tpu_custom_call.1
= control target key start
LH: loop header
LB: loop body
LE: loop exit
PB: predicated region body
PF: predicated region fallthrough
CT: control target
= control target key end

     0   :  { %12 = vsyncpa [#allocation6], 0  ;;  %s13033_s0 = inlined_call_operand.vmem [shape: f32[2,4,256], index: 0, kind: input, shape index: {}]   ;;  %s13034_s1 = inlined_call_operand.vmem [shape: f32[128,4], index: 1, kind: input, shape index: {}]   ;;  %s13035_s2 = inlined_call_operand.hbm [shape: f32[3,3,128,128], index: 2, kind: input, shape index: {}]   ;;  %s13036_s3 = inlined_call_operand.hbm [shape: f32[3,3,128,128], index: 3, kind: input, shape index: {}]   ;;  %s13037_s4 = inlined_call_operand.vmem [shape: f32[1,128], index: 4, kind: input, shape index: {}]   ;;  %s13038_s5 = inlined_call_operand.vmem [shape: f32[1,128], index: 5, kind: input, shape index: {}]   ;;  %s13039_s6 = inlined_call_operand.vmem [shape: f32[128,128], index: 6, kind: input, shape index: {}]   ;;  %s13040_s7 = inlined_call_operand.vmem [shape: f32[2,6,256], index: 7, kind: output, shape index: {}]  }
   0x1   :  { %13 = vsyncpa [#allocation8], 0  ;;  %s11612_s24 = smov 0  }
   0x2 LB: > { %s11618_s25 = sadd.s32 4294967295, %s11565_s24   ;;  %p7919_p0 = scmp.ge.s32.totalorder %s11565_s24, 1  ;;  %s11565_s24 = sphi %s11612_s24, %s19_s24  }
   0x3   : > { %p202_p1 = scmp.lt.s32.totalorder %s11565_s24, 3  ;;  %s11567_s26 = smov [#allocation5]  }
   0x4   : > { %s217_s27 = sshll.u32 %s11567_s26, 4  ;;  %p13041_p3 = scmp.eq.s32.totalorder %s11618_s25, 0  ;;  %s218_s27 = int_to_ptr.vmem [resolvable:$true] %s217_s27 }
   0x5   : > { %p11622_p2 = pnand %p7919_p0, %p202_p1  ;;  %s11568_s29 = smov [#allocation7]  }
   0x6   : > { %s230_s30 = sshll.u32 %s11568_s29, 4  ;;  %s11495_s11 = scalar_lea.hbm %s13035_s2, 18432  ;;  %s11635_s30 = int_to_ptr.vmem [resolvable:$true] %s230_s30 }
   0x7   : > { %s13123_s28 = scalar_select %p11622_p2, 1, 0 }
   0x8   : > { %p11466_p4 = pneg %p11622_p2  ;;  %p11496_p6 = scmp.ne.s32.totalorder %s13035_s2, %s11495_s11 }
   0x9   : > { %p11502_p10 = scmp.lt.u32.totalorder %s11495_s11, %s13035_s2 }
   0xa   : > { %p11631_p5 = pnand %p13041_p3, %p11466_p4 }
   0xc   : > { %p11497_p7 = pneg %p11631_p5 }
   0xe   : > { %p11498_p8 = pnand %p11497_p7, %p11496_p6 }
  0x10   : > { %p11499_p9 = pneg %p11498_p8 }
  0x12   : > { %p11504_p11 = pnand %p11502_p10, %p11499_p9 }
  0x14   : > { %11507 = shalt.err (!%p11504_p11)
}
  0x15   : > { %s11508_s16 = scalar_lea.vmem %s218_s27, 18432  ;;  %p11516_p1 = scmp.lt.s32.totalorder %s218_s27, %s218_s27 }
  0x16   : > { %p11509_p12 = scmp.ne.s32.totalorder %s218_s27, %s11508_s16  ;;  %p11517_p4 = scmp.lt.s32.totalorder %s11508_s16, %s11508_s16 }
  0x18   : > { %p11511_p13 = pnand %p11509_p12, %p11497_p7  ;;  %p11518_p3 = por %p11517_p4, %p11516_p1 }
  0x1a   : > { %p11512_p0 = pneg %p11511_p13 }
  0x1c   : > { %p11519_p2 = pnand %p11518_p3, %p11512_p0 }
  0x1e   : > { %11522 = shalt.err (!%p11519_p2)
}
  0x1f   : > { %s11569_s17 = smov 128   ;;  %s11570_s18 = smov 8  }
  0x20   : > { %11469 = dma.hbm_to_vmem [thread:$0]  (!%p11631_p5), %s13035_s2, 18432, %s218_s27, [#allocation6], %s11569_s17, %s11569_s17, %s11570_s18  }
  0x21   : > { %s11523_s23 = scalar_lea.hbm %s13036_s3, 18432 }
  0x22   : > { %p11524_p6 = scmp.ne.s32.totalorder %s13036_s3, %s11523_s23  ;;  %p11530_p8 = scmp.lt.u32.totalorder %s11523_s23, %s13036_s3 }
  0x24   : > { %p11526_p2 = pnand %p11524_p6, %p11497_p7 }
  0x26   : > { %p11527_p3 = pneg %p11526_p2 }
  0x28   : > { %p11532_p9 = pnand %p11530_p8, %p11527_p3 }
  0x2a   : > { %11535 = shalt.err (!%p11532_p9)
}
  0x2b   : > { %s11536_s27 = scalar_lea.vmem %s11635_s30, 18432  ;;  %p11544_p13 = scmp.lt.s32.totalorder %s11635_s30, %s11635_s30 }
  0x2c   : > { %p11537_p10 = scmp.ne.s32.totalorder %s11635_s30, %s11536_s27  ;;  %p11545_p0 = scmp.lt.s32.totalorder %s11536_s27, %s11536_s27 }
  0x2e   : > { %p11539_p11 = pnand %p11537_p10, %p11497_p7  ;;  %p11546_p1 = por %p11545_p0, %p11544_p13 }
  0x30   : > { %p11540_p12 = pneg %p11539_p11 }
  0x32   : > { %p11547_p4 = pnand %p11546_p1, %p11540_p12 }
  0x34   : > { %11550 = shalt.err (!%p11547_p4)
}
  0x35   : > { %11472 = dma.hbm_to_vmem [thread:$0]  (!%p11631_p5), %s13036_s3, 18432, %s11635_s30, [#allocation8], %s11569_s17, %s11569_s17, %s11570_s18  }
  0x36   : > { %p13125_p6 = scmp.ne.s32.totalorder %s13123_s28, 0 }
  0x38   : > { %263 = sbr.rel (%p13125_p6) target bundleno = 2084 (0x824), region = 48 }
  0x3f   : > { %p13126_p2 = scmp.eq.s32.totalorder %s11618_s25, 0 }
  0x41   : > { %11556 = dma.done.wait (%p13126_p2), [#allocation6], 18432   ;;  %p13127_p7 = pmov %p13126_p2 }
  0x42   : > { %p13128_p3 = pmov %p13126_p2 }
  0x43   : > { %11558 = vsyncadd (%p13127_p7), [#allocation6], 4294948864 }
  0x44   : > { %11560 = dma.done.wait (%p13128_p3), [#allocation8], 18432   ;;  %p13129_p8 = pmov %p13126_p2 }
  0x45   : > { %p299_p9 = scmp.lt.s32.totalorder %s11618_s25, 1  ;;  %v11571_v0 = vmov 0.0   ;;  %vm377_vm0 = vcmask 1043456   ;;  %v310_v3 = vld [vmem:[%s13034_s1] sm:$0xff]  ;;  %vm328_vm1 = vcmask 31744   ;;  %v311_v4 = vld [vmem:[%s13034_s1 + $0x8] sm:$0xff] }
  0x46   : > { %11562 = vsyncadd (%p13129_p8), [#allocation8], 4294948864  ;;  %446 = vmatprep.mubr.f32.mxu0 %v11571_v0  ;;  %752 = vst [vmem:[#allocation2] sm:$0xff] %v11571_v0  ;;  %623 = vmatprep.mubr.f32.mxu1 %v11571_v0  ;;  %v312_v5 = vld [vmem:[%s13034_s1 + $0x10] sm:$0xff]  ;;  %v313_v6 = vld [vmem:[%s13034_s1 + $0x18] sm:$0xff] }
  0x47   : > { %753 = vst [vmem:[#allocation2 + $0x8] sm:$0xff] %v11571_v0  ;;  %754 = vst [vmem:[#allocation2 + $0x10] sm:$0x3] %v11571_v0  ;;  %s13281_s25 = smov (!%p299_p9, %s11618_s25), 1  ;;  %v314_v7 = vld [vmem:[%s13034_s1 + $0x20] sm:$0xff]  ;;  %v315_v8 = vld [vmem:[%s13034_s1 + $0x28] sm:$0xff] }
  0x48   : > { %755 = vst [vmem:[#allocation2 + $0x18] sm:$0xff] %v11571_v0  ;;  %756 = vst [vmem:[#allocation2 + $0x20] sm:$0xff] %v11571_v0  ;;  %s7952_s28 = sshll.u32 %s13281_s25, 3  ;;  %v316_v9 = vld [vmem:[%s13034_s1 + $0x30] sm:$0xff]  ;;  %v317_v10 = vld [vmem:[%s13034_s1 + $0x38] sm:$0xff]  ;;  %s7953_s19 = sshll.u32 %s13281_s25, 4 }
  0x49   : > { %757 = vst [vmem:[#allocation2 + $0x28] sm:$0x3] %v11571_v0  ;;  %758 = vst [vmem:[#allocation2 + $0x30] sm:$0xff] %v11571_v0  ;;  %s303_s13 = scalar_lea.vmem %s13033_s0, %s7952_s28  ;;  %v318_v11 = vld [vmem:[%s13034_s1 + $0x40] sm:$0xff]  ;;  %v319_v12 = vld [vmem:[%s13034_s1 + $0x48] sm:$0xff]  ;;  %s308_s22 = scalar_lea.vmem %s13040_s7, %s7953_s19 }
  0x4a   : > { %759 = vst [vmem:[#allocation2 + $0x38] sm:$0xff] %v11571_v0  ;;  %760 = vst [vmem:[#allocation2 + $0x40] sm:$0x3] %v11571_v0  ;;  %v309_v1 = vld [vmem:[%s303_s13] sm:$0xff]  ;;  %v320_v13 = vld [vmem:[%s13034_s1 + $0x50] sm:$0xff] }
  0x4b   : > { %761 = vst [vmem:[#allocation2 + $0x48] sm:$0xff] %v11571_v0  ;;  %762 = vst [vmem:[#allocation2 + $0x50] sm:$0xff] %v11571_v0  ;;  %v327_v2 = vcombine.high %v309_v1, %v309_v1  ;;  %v321_v14 = vld [vmem:[%s13034_s1 + $0x58] sm:$0xff]  ;;  %v322_v15 = vld [vmem:[%s13034_s1 + $0x60] sm:$0xff] }
  0x4c   : > { %763 = vst [vmem:[#allocation2 + $0x58] sm:$0x3] %v11571_v0  ;;  %764 = vst [vmem:[#allocation2 + $0x60] sm:$0xff] %v11571_v0  ;;  %v323_v16 = vld [vmem:[%s13034_s1 + $0x68] sm:$0xff]  ;;  %v324_v17 = vld [vmem:[%s13034_s1 + $0x70] sm:$0xff] }
  0x4d   : > { %765 = vst [vmem:[#allocation2 + $0x68] sm:$0xff] %v11571_v0  ;;  %766 = vst [vmem:[#allocation2 + $0x70] sm:$0x3] %v11571_v0  ;;  %7930 = vmatprep.subr.msk.mxu0 %vm377_vm0, %v327_v2  ;;  %v325_v18 = vld [vmem:[%s13034_s1 + $0x78] sm:$0xff]  ;;  %v1006_v19 = vld [vmem:[#allocation5] sm:$0xff] }
  0x4e   : > { %767 = vst [vmem:[#allocation2 + $0x78] sm:$0xff] %v11571_v0  ;;  %768 = vst [vmem:[#allocation2 + $0x80] sm:$0xff] %v11571_v0  ;;  %7931 = vmatpush1.msk.msra.mxu0 %vm377_vm0, %v309_v1  ;;  %v1007_v20 = vld [vmem:[#allocation5 + $0x8] sm:$0xff]  ;;  %v1008_v21 = vld [vmem:[#allocation5 + $0x10] sm:$0xff] }
  0x4f   : > { %769 = vst [vmem:[#allocation2 + $0x88] sm:$0x3] %v11571_v0  ;;  %770 = vst [vmem:[#allocation2 + $0x90] sm:$0xff] %v11571_v0  ;;  %7932 = vmatmul.mubr.msk.f32.vlgmr.msra.gmra.mrb[0].mxu0 %vm328_vm1, %v310_v3  ;;  %v10290_v22 = vpack.c.bf16 %v1007_v20, %v1006_v19  ;;  %v1009_v23 = vld [vmem:[#allocation5 + $0x18] sm:$0xff]  ;;  %v1010_v25 = vld [vmem:[#allocation5 + $0x20] sm:$0xff] }
  0x50   : > { %771 = vst [vmem:[#allocation2 + $0x98] sm:$0xff] %v11571_v0  ;;  %772 = vst [vmem:[#allocation2 + $0xa0] sm:$0x3] %v11571_v0  ;;  %452 = vmatprep.mubr.f32.mxu0 %v11571_v0  ;;  %v10294_v24 = vpack.c.bf16 %v1009_v23, %v1008_v21  ;;  %v1011_v26 = vld [vmem:[#allocation5 + $0x28] sm:$0xff]  ;;  %v1012_v28 = vld [vmem:[#allocation5 + $0x30] sm:$0xff] }
  0x51   : > { %773 = vst [vmem:[#allocation2 + $0xa8] sm:$0xff] %v11571_v0  ;;  %774 = vst [vmem:[#allocation2 + $0xb0] sm:$0xff] %v11571_v0  ;;  %10291 = vmatprep.subr.bf16.mxu0 %v10290_v22  ;;  %v10298_v27 = vpack.c.bf16 %v1011_v26, %v1010_v25  ;;  %v1013_v29 = vld [vmem:[#allocation5 + $0x38] sm:$0xff]  ;;  %v1014_v31 = vld [vmem:[#allocation5 + $0x40] sm:$0xff] }
  0x52   : > { %775 = vst [vmem:[#allocation2 + $0xb8] sm:$0x3] %v11571_v0  ;;  %776 = vst [vmem:[#allocation2 + $0xc0] sm:$0xff] %v11571_v0  ;;  %10293 = vmatpush3.bf16.msra.mxu0 %v10290_v22  ;;  %v10302_v30 = vpack.c.bf16 %v1013_v29, %v1012_v28  ;;  %v1015_v32 = vld [vmem:[#allocation5 + $0x48] sm:$0xff]  ;;  %v1016_v34 = vld [vmem:[#allocation5 + $0x50] sm:$0xff] }
  0x53   : > { %777 = vst [vmem:[#allocation2 + $0xc8] sm:$0xff] %v11571_v0  ;;  %778 = vst [vmem:[#allocation2 + $0xd0] sm:$0x3] %v11571_v0  ;;  %7933 = vmatmul.mubr.msk.f32.gmra.mrb[2].mxu0 %vm328_vm1, %v311_v4  ;;  %10295 = vmatprep.subr.bf16.mxu0 %v10294_v24  ;;  %v10306_v33 = vpack.c.bf16 %v1015_v32, %v1014_v31  ;;  %v1017_v35 = vld [vmem:[#allocation5 + $0x58] sm:$0xff]  ;;  %v1018_v37 = vld [vmem:[#allocation5 + $0x60] sm:$0xff] }
  0x54   : > { %779 = vst [vmem:[#allocation2 + $0xd8] sm:$0xff] %v11571_v0  ;;  %780 = vst [vmem:[#allocation2 + $0xe0] sm:$0xff] %v11571_v0  ;;  %458 = vmatprep.mubr.f32.mxu0 %v11571_v0  ;;  %v10310_v36 = vpack.c.bf16 %v1017_v35, %v1016_v34  ;;  %v1019_v38 = vld [vmem:[#allocation5 + $0x68] sm:$0xff]  ;;  %v1020_v42 = vld [vmem:[#allocation5 + $0x70] sm:$0xff] }
  0x55   : > { %781 = vst [vmem:[#allocation2 + $0xe8] sm:$0x3] %v11571_v0  ;;  %782 = vst [vmem:[#allocation2 + $0xf0] sm:$0xff] %v11571_v0  ;;  %v10314_v39 = vpack.c.bf16 %v1019_v38, %v1018_v37  ;;  %v1021_v43 = vld [vmem:[#allocation5 + $0x78] sm:$0xff]  ;;  %v1380_v23 = vld [vmem:[#allocation5 + $0xa0] sm:$0xff] }
  0x56   : > { %783 = vst [vmem:[#allocation2 + $0xf8] sm:$0xff] %v11571_v0  ;;  %784 = vst [vmem:[#allocation2 + $0x100] sm:$0x3] %v11571_v0  ;;  %10297 = vmatpush3.bf16.msra.mxu0 %v10294_v24  ;;  %v10318_v44 = vpack.c.bf16 %v1021_v43, %v1020_v42  ;;  %v1381_v24 = vld [vmem:[#allocation5 + $0xa8] sm:$0xff]  ;;  %v1382_v32 = vld [vmem:[#allocation5 + $0xb0] sm:$0xff] }
  0x57   : > { %785 = vst [vmem:[#allocation2 + $0x108] sm:$0xff] %v11571_v0  ;;  %786 = vst [vmem:[#allocation2 + $0x110] sm:$0xff] %v11571_v0  ;;  %7934 = vmatmul.mubr.msk.f32.gmra.mrb[4].mxu0 %vm328_vm1, %v312_v5  ;;  %10299 = vmatprep.subr.bf16.mxu0 %v10298_v27  ;;  %v1376_v5 = vld [vmem:[#allocation5 + $0x80] sm:$0xff]  ;;  %v10330_v25 = vpack.c.bf16 %v1381_v24, %v1380_v23  ;;  %v1386_v42 = vld [vmem:[#allocation5 + $0xd0] sm:$0xff] }
  0x58   : > { %787 = vst [vmem:[#allocation2 + $0x118] sm:$0x3] %v11571_v0  ;;  %788 = vst [vmem:[#allocation2 + $0x120] sm:$0xff] %v11571_v0  ;;  %464 = vmatprep.mubr.f32.mxu0 %v11571_v0  ;;  %v1387_v43 = vld [vmem:[#allocation5 + $0xd8] sm:$0xff] }
  0x59   : > { %789 = vst [vmem:[#allocation2 + $0x128] sm:$0xff] %v11571_v0  ;;  %790 = vst [vmem:[#allocation2 + $0x130] sm:$0x3] %v11571_v0 }
  0x5a   : > { %791 = vst [vmem:[#allocation2 + $0x138] sm:$0xff] %v11571_v0  ;;  %792 = vst [vmem:[#allocation2 + $0x140] sm:$0xff] %v11571_v0  ;;  %10301 = vmatpush3.bf16.msra.mxu0 %v10298_v27 }
  0x5b   : > { %793 = vst [vmem:[#allocation2 + $0x148] sm:$0x3] %v11571_v0  ;;  %794 = vst [vmem:[#allocation2 + $0x150] sm:$0xff] %v11571_v0  ;;  %7935 = vmatmul.mubr.msk.f32.gmra.mrb[6].mxu0 %vm328_vm1, %v313_v6  ;;  %10303 = vmatprep.subr.bf16.mxu0 %v10302_v30  ;;  %v1377_v6 = vld [vmem:[#allocation5 + $0x88] sm:$0xff] }
  0x5c   : > { %795 = vst [vmem:[#allocation2 + $0x158] sm:$0xff] %v11571_v0  ;;  %796 = vst [vmem:[#allocation2 + $0x160] sm:$0x3] %v11571_v0  ;;  %470 = vmatprep.mubr.f32.mxu0 %v11571_v0 }
  0x5d   : > { %797 = vst [vmem:[#allocation2 + $0x168] sm:$0xff] %v11571_v0  ;;  %798 = vst [vmem:[#allocation2 + $0x170] sm:$0xff] %v11571_v0 }
  0x5e   : > { %799 = vst [vmem:[#allocation2 + $0x178] sm:$0x3] %v11571_v0  ;;  %800 = vst [vmem:[#allocation2 + $0x180] sm:$0xff] %v11571_v0  ;;  %10305 = vmatpush3.bf16.msra.mxu0 %v10302_v30 }
  0x5f   : > { %801 = vst [vmem:[#allocation2 + $0x188] sm:$0xff] %v11571_v0  ;;  %802 = vst [vmem:[#allocation2 + $0x190] sm:$0x3] %v11571_v0  ;;  %7936 = vmatmul.mubr.msk.f32.gmra.mrb[8].mxu0 %vm328_vm1, %v314_v7  ;;  %10307 = vmatprep.subr.bf16.mxu0 %v10306_v33  ;;  %v10322_v7 = vpack.c.bf16 %v1377_v6, %v1376_v5 }
  0x60   : > { %803 = vst [vmem:[#allocation2 + $0x198] sm:$0xff] %v11571_v0  ;;  %804 = vst [vmem:[#allocation2 + $0x1a0] sm:$0xff] %v11571_v0  ;;  %476 = vmatprep.mubr.f32.mxu0 %v11571_v0 }
  0x61   : > { %805 = vst [vmem:[#allocation2 + $0x1a8] sm:$0x3] %v11571_v0 }
  0x62   : > { %10309 = vmatpush3.bf16.msra.mxu0 %v10306_v33  ;;  %v1383_v33 = vld [vmem:[#allocation5 + $0xb8] sm:$0xff] }
  0x63   : > { %7937 = vmatmul.mubr.msk.f32.gmra.mrb[10].mxu0 %vm328_vm1, %v315_v8  ;;  %10311 = vmatprep.subr.bf16.mxu0 %v10310_v36  ;;  %v10334_v34 = vpack.c.bf16 %v1383_v33, %v1382_v32 }
  0x64   : > { %482 = vmatprep.mubr.f32.mxu0 %v11571_v0 }
  0x66   : > { %10313 = vmatpush3.bf16.msra.mxu0 %v10310_v36 }
  0x67   : > { %7938 = vmatmul.mubr.msk.f32.gmra.mrb[12].mxu0 %vm328_vm1, %v316_v9  ;;  %10315 = vmatprep.subr.bf16.mxu0 %v10314_v39 }
  0x68   : > { %488 = vmatprep.mubr.f32.mxu0 %v11571_v0 }
  0x6a   : > { %10317 = vmatpush3.bf16.msra.mxu0 %v10314_v39  ;;  %v1384_v39 = vld [vmem:[#allocation5 + $0xc0] sm:$0xff] }
  0x6b   : > { %7939 = vmatmul.mubr.msk.f32.gmra.mrb[14].mxu0 %vm328_vm1, %v317_v10  ;;  %10319 = vmatprep.subr.bf16.mxu0 %v10318_v44 }
  0x6c   : > { %494 = vmatprep.mubr.f32.mxu0 %v11571_v0 }
  0x6e   : > { %10321 = vmatpush3.bf16.msra.mxu0 %v10318_v44  ;;  %v10342_v44 = vpack.c.bf16 %v1387_v43, %v1386_v42 }
  0x6f   : > { %7940 = vmatmul.mubr.msk.f32.gmra.mrb[16].mxu0 %vm328_vm1, %v318_v11  ;;  %10323 = vmatprep.subr.bf16.mxu0 %v10322_v7 }
  0x70   : > { %500 = vmatprep.mubr.f32.mxu0 %v11571_v0 }
  0x73   : > { %7941 = vmatmul.mubr.msk.f32.gmra.mrb[18].mxu0 %vm328_vm1, %v319_v12 }
  0x74   : > { %506 = vmatprep.mubr.f32.mxu0 %v11571_v0 }
  0x77   : > { %7942 = vmatmul.mubr.msk.f32.gmra.mrb[20].mxu0 %vm328_vm1, %v320_v13 }
  0x78   : > { %512 = vmatprep.mubr.f32.mxu0 %v11571_v0 }
  0x7b   : > { %7943 = vmatmul.mubr.msk.f32.gmra.mrb[22].mxu0 %vm328_vm1, %v321_v14  ;;  %v1378_v14 = vld [vmem:[#allocation5 + $0x90] sm:$0xff] }
  0x7c   : > { %518 = vmatprep.mubr.f32.mxu0 %v11571_v0 }
  0x7f   : > { %7944 = vmatmul.mubr.msk.f32.gmra.mrb[24].mxu0 %vm328_vm1, %v322_v15  ;;  %v1379_v15 = vld [vmem:[#allocation5 + $0x98] sm:$0xff] }
  0x80   : > { %524 = vmatprep.mubr.f32.mxu0 %v11571_v0 }
  0x83   : > { %7945 = vmatmul.mubr.msk.f32.gmra.mrb[26].mxu0 %vm328_vm1, %v323_v16  ;;  %v10326_v16 = vpack.c.bf16 %v1379_v15, %v1378_v14 }
  0x84   : > { %530 = vmatprep.mubr.f32.mxu0 %v11571_v0 }
  0x87   : > { %7946 = vmatmul.mubr.msk.f32.gmra.mrb[28].mxu0 %vm328_vm1, %v324_v17 }
  0x88   : > { %536 = vmatprep.mubr.f32.mxu0 %v11571_v0 }
  0x8b   : > { %7947 = vmatmul.mubr.msk.f32.gmra.mrb[30].mxu0 %vm328_vm1, %v325_v18 }
  0x8c   : > { %8850 = vmatprep.mubr.f32.mxu0 %v11571_v0 }
  0x8f   : > { %8851 = vmatmul.mubr.f32.vlgmr.msra.gmra.mrb[32].mxu0 %v11571_v0 }
  0x90   : > { %10325 = vmatpush3.bf16.msra.mxu0 %v10322_v7 }
  0x91   : > { %10327 = vmatprep.subr.bf16.mxu0 %v10326_v16 }
  0x94   : > { %10329 = vmatpush3.bf16.msra.mxu0 %v10326_v16 }
  0x95   : > { %10331 = vmatprep.subr.bf16.mxu0 %v10330_v25 }
  0x98   : > { %10333 = vmatpush3.bf16.msra.mxu0 %v10330_v25 }
  0x99   : > { %10335 = vmatprep.subr.bf16.mxu0 %v10334_v34 }
  0x9c   : > { %10337 = vmatpush3.bf16.msra.mxu0 %v10334_v34 }
 0x122   : > { %v448_v40 = vpop.f32.mrb[0].mxu0 }
 0x123   : > { %806 = vxpose.xlu0.b32.start [1/16] %v448_v40, 128  ;;  %v450_v41 = vpop.f32.mrb[1].mxu0 }
 0x124   : > { %838 = vxpose.xlu1.b32.start [1/16] %v450_v41, 128 }
 0x126   : > { %v454_v45 = vpop.f32.mrb[2].mxu0 }
 0x127   : > { %807 = vxpose.xlu0.b32.cont [2/16] %v454_v45, 128  ;;  %v456_v46 = vpop.f32.mrb[3].mxu0  ;;  %v10260_v47 = vpack.c.bf16 %v454_v45, %v448_v40  ;;  %v1385_v40 = vld [vmem:[#allocation5 + $0xc8] sm:$0xff]  ;;  %v1388_v45 = vld [vmem:[#allocation5 + $0xe0] sm:$0xff] }
 0x128   : > { %839 = vxpose.xlu1.b32.cont [2/16] %v456_v46, 128  ;;  %v10258_v48 = vpack.c.bf16 %v456_v46, %v450_v41  ;;  %v10338_v41 = vpack.c.bf16 %v1385_v40, %v1384_v39  ;;  %v1389_v46 = vld [vmem:[#allocation5 + $0xe8] sm:$0xff] }
 0x12a   : > { %v460_v49 = vpop.f32.mrb[4].mxu0  ;;  %10259 = vmatprep.subr.bf16.mxu1 %v10258_v48  ;;  %10339 = vmatprep.subr.bf16.mxu0 %v10338_v41  ;;  %v1390_v48 = vld [vmem:[#allocation5 + $0xf0] sm:$0xff] }
 0x12b   : > { %10261 = vmatpush1.bf16.msra.mxu1 %v10260_v47  ;;  %808 = vxpose.xlu0.b32.cont [3/16] %v460_v49, 128  ;;  %v462_v50 = vpop.f32.mrb[5].mxu0  ;;  %v10346_v47 = vpack.c.bf16 %v1389_v46, %v1388_v45 }
 0x12c   : > { %840 = vxpose.xlu1.b32.cont [3/16] %v462_v50, 128  ;;  %10341 = vmatpush3.bf16.msra.mxu0 %v10338_v41 }
 0x12d   : > { %10343 = vmatprep.subr.bf16.mxu0 %v10342_v44 }
 0x12e   : > { %v466_v51 = vpop.f32.mrb[6].mxu0 }
 0x12f   : > { %v10264_v52 = vpack.c.bf16 %v466_v51, %v460_v49  ;;  %809 = vxpose.xlu0.b32.cont [4/16] %v466_v51, 128  ;;  %v468_v53 = vpop.f32.mrb[7].mxu0  ;;  %v1391_v49 = vld [vmem:[#allocation5 + $0xf8] sm:$0xff]  ;;  %v1746_v51 = vld [vmem:[#allocation5 + $0x100] sm:$0xff] }
 0x130   : > { %v10262_v54 = vpack.c.bf16 %v468_v53, %v462_v50  ;;  %841 = vxpose.xlu1.b32.cont [4/16] %v468_v53, 128  ;;  %10345 = vmatpush3.bf16.msra.mxu0 %v10342_v44  ;;  %v10350_v50 = vpack.c.bf16 %v1391_v49, %v1390_v48  ;;  %v1311_v49 = vld [vmem:[#allocation2 + $0x1] sm:$0xff] }
 0x131   : > { %10347 = vmatprep.subr.bf16.mxu0 %v10346_v47 }
 0x132   : > { %v472_v55 = vpop.f32.mrb[8].mxu0  ;;  %10263 = vmatprep.subr.bf16.mxu1 %v10262_v54 }
 0x133   : > { %10265 = vmatpush1.bf16.msra.mxu1 %v10264_v52  ;;  %810 = vxpose.xlu0.b32.cont [5/16] %v472_v55, 128  ;;  %v474_v56 = vpop.f32.mrb[9].mxu0  ;;  %v1747_v52 = vld [vmem:[#allocation5 + $0x108] sm:$0xff] }
 0x134   : > { %842 = vxpose.xlu1.b32.cont [5/16] %v474_v56, 128  ;;  %10349 = vmatpush3.bf16.msra.mxu0 %v10346_v47  ;;  %v11841_v53 = vpack.c.bf16 %v1747_v52, %v1746_v51  ;;  %v1748_v51 = vld [vmem:[#allocation5 + $0x110] sm:$0xff]  ;;  %v1749_v52 = vld [vmem:[#allocation5 + $0x118] sm:$0xff] }
 0x135   : > { %10351 = vmatprep.subr.bf16.mxu0 %v10350_v50 }
 0x136   : > { %v478_v57 = vpop.f32.mrb[10].mxu0 }
 0x137   : > { %v10268_v58 = vpack.c.bf16 %v478_v57, %v472_v55  ;;  %811 = vxpose.xlu0.b32.cont [6/16] %v478_v57, 128  ;;  %v480_v59 = vpop.f32.mrb[11].mxu0 }
 0x138   : > { %v10266_v60 = vpack.c.bf16 %v480_v59, %v474_v56  ;;  %843 = vxpose.xlu1.b32.cont [6/16] %v480_v59, 128  ;;  %10353 = vmatpush3.bf16.msra.mxu0 %v10350_v50 }
 0x139   : > { %10355 = vmatprep.subr.bf16.mxu0 %v11841_v53 }
 0x13a   : > { %v484_v61 = vpop.f32.mrb[12].mxu0  ;;  %10267 = vmatprep.subr.bf16.mxu1 %v10266_v60 }
 0x13b   : > { %10269 = vmatpush1.bf16.msra.mxu1 %v10268_v58  ;;  %812 = vxpose.xlu0.b32.cont [7/16] %v484_v61, 128  ;;  %v486_v62 = vpop.f32.mrb[13].mxu0 }
 0x13c   : > { %844 = vxpose.xlu1.b32.cont [7/16] %v486_v62, 128 }
 0x13e   : > { %v490_v63 = vpop.f32.mrb[14].mxu0 }
 0x13f   : > { %v10272_v0 = vpack.c.bf16 %v490_v63, %v484_v61  ;;  %813 = vxpose.xlu0.b32.cont [8/16] %v490_v63, 128  ;;  %v492_v1 = vpop.f32.mrb[15].mxu0 }
 0x140   : > { %v10270_v2 = vpack.c.bf16 %v492_v1, %v486_v62  ;;  %845 = vxpose.xlu1.b32.cont [8/16] %v492_v1, 128 }
 0x142   : > { %v496_v3 = vpop.f32.mrb[16].mxu0  ;;  %10271 = vmatprep.subr.bf16.mxu1 %v10270_v2 }
 0x143   : > { %10273 = vmatpush1.bf16.msra.mxu1 %v10272_v0  ;;  %814 = vxpose.xlu0.b32.cont [9/16] %v496_v3, 128  ;;  %v498_v4 = vpop.f32.mrb[17].mxu0 }
 0x144   : > { %846 = vxpose.xlu1.b32.cont [9/16] %v498_v4, 128 }
 0x146   : > { %v502_v8 = vpop.f32.mrb[18].mxu0 }
 0x147   : > { %v10276_v9 = vpack.c.bf16 %v502_v8, %v496_v3  ;;  %815 = vxpose.xlu0.b32.cont [10/16] %v502_v8, 128  ;;  %v504_v10 = vpop.f32.mrb[19].mxu0 }
 0x148   : > { %v10274_v11 = vpack.c.bf16 %v504_v10, %v498_v4  ;;  %847 = vxpose.xlu1.b32.cont [10/16] %v504_v10, 128 }
 0x14a   : > { %v508_v12 = vpop.f32.mrb[20].mxu0  ;;  %10275 = vmatprep.subr.bf16.mxu1 %v10274_v11 }
 0x14b   : > { %10277 = vmatpush1.bf16.msra.mxu1 %v10276_v9  ;;  %816 = vxpose.xlu0.b32.cont [11/16] %v508_v12, 128  ;;  %v510_v13 = vpop.f32.mrb[21].mxu0 }
 0x14c   : > { %848 = vxpose.xlu1.b32.cont [11/16] %v510_v13, 128 }
 0x14e   : > { %v514_v17 = vpop.f32.mrb[22].mxu0 }
 0x14f   : > { %v10280_v18 = vpack.c.bf16 %v514_v17, %v508_v12  ;;  %817 = vxpose.xlu0.b32.cont [12/16] %v514_v17, 128  ;;  %v516_v19 = vpop.f32.mrb[23].mxu0 }
 0x150   : > { %v10278_v20 = vpack.c.bf16 %v516_v19, %v510_v13  ;;  %849 = vxpose.xlu1.b32.cont [12/16] %v516_v19, 128 }
 0x152   : > { %v520_v21 = vpop.f32.mrb[24].mxu0  ;;  %10279 = vmatprep.subr.bf16.mxu1 %v10278_v20 }
 0x153   : > { %10281 = vmatpush1.bf16.msra.mxu1 %v10280_v18  ;;  %818 = vxpose.xlu0.b32.cont [13/16] %v520_v21, 128  ;;  %v522_v22 = vpop.f32.mrb[25].mxu0 }
 0x154   : > { %850 = vxpose.xlu1.b32.cont [13/16] %v522_v22, 128 }
 0x156   : > { %v526_v26 = vpop.f32.mrb[26].mxu0 }
 0x157   : > { %v10284_v27 = vpack.c.bf16 %v526_v26, %v520_v21  ;;  %819 = vxpose.xlu0.b32.cont [14/16] %v526_v26, 128  ;;  %v528_v28 = vpop.f32.mrb[27].mxu0 }
 0x158   : > { %v10282_v29 = vpack.c.bf16 %v528_v28, %v522_v22  ;;  %851 = vxpose.xlu1.b32.cont [14/16] %v528_v28, 128 }
 0x15a   : > { %v532_v30 = vpop.f32.mrb[28].mxu0  ;;  %10283 = vmatprep.subr.bf16.mxu1 %v10282_v29 }
 0x15b   : > { %10285 = vmatpush1.bf16.msra.mxu1 %v10284_v27  ;;  %820 = vxpose.xlu0.b32.cont [15/16] %v532_v30, 128  ;;  %v534_v31 = vpop.f32.mrb[29].mxu0 }
 0x15c   : > { %852 = vxpose.xlu1.b32.cont [15/16] %v534_v31, 128 }
 0x15e   : > { %v538_v35 = vpop.f32.mrb[30].mxu0 }
 0x15f   : > { %v10288_v36 = vpack.c.bf16 %v538_v35, %v532_v30  ;;  %821 = vxpose.xlu0.b32.end [16/16] %v538_v35, 128  ;;  %v540_v37 = vpop.f32.mrb[31].mxu0 }
 0x160   : > { %v10286_v38 = vpack.c.bf16 %v540_v37, %v534_v31  ;;  %853 = vxpose.xlu1.b32.end [16/16] %v540_v37, 128 }
 0x162   : > { %10287 = vmatprep.subr.bf16.mxu1 %v10286_v38 }
 0x163   : > { %10289 = vmatpush1.bf16.msra.mxu1 %v10288_v36 }
 0x1a3   : > { %v11844_v54 = vpop.trf.xlu0 }
 0x1a4   : > { %871 = vst [vmem:[#allocation2 + $0x19] sm:$0xff] %v11844_v54  ;;  %v11847_v55 = vpop.trf.xlu1 }
 0x1a5   : > { %887 = vst [vmem:[#allocation2 + $0xd9] sm:$0xff] %v11847_v55 }
 0x1a7   : > { %v11850_v56 = vpop.trf.xlu0 }
 0x1a8   : > { %872 = vst [vmem:[#allocation2 + $0x21] sm:$0xff] %v11850_v56  ;;  %v11853_v57 = vpop.trf.xlu1 }
 0x1a9   : > { %888 = vst [vmem:[#allocation2 + $0xe1] sm:$0xff] %v11853_v57 }
 0x1ab   : > { %v11856_v58 = vpop.trf.xlu0  ;;  %v11858_v59 = vld [vmem:[#allocation2 + $0x18] sm:$0xff] }
 0x1ac   : > { %873 = vst [vmem:[#allocation2 + $0x31] sm:$0xff] %v11856_v58  ;;  %8853 = vmatprep.mubr.f32.mxu0 %v11858_v59  ;;  %v11862_v60 = vpop.trf.xlu1  ;;  %v11982_v36 = vld [vmem:[#allocation2 + $0xd8] sm:$0xff] }
 0x1ad   : > { %889 = vst [vmem:[#allocation2 + $0xf1] sm:$0xff] %v11862_v60 }
 0x1af   : > { %v11865_v61 = vpop.trf.xlu0  ;;  %v11867_v62 = vld [vmem:[#allocation2 + $0x20] sm:$0xff] }
 0x1b0   : > { %874 = vst [vmem:[#allocation2 + $0x39] sm:$0xff] %v11865_v61  ;;  %8854 = vmatmul.mubr.f32.gmra.mrb[34].mxu0 %v11867_v62  ;;  %v11871_v63 = vpop.trf.xlu1  ;;  %v11985_v37 = vld [vmem:[#allocation2 + $0xe0] sm:$0xff] }
 0x1b1   : > { %890 = vst [vmem:[#allocation2 + $0xf9] sm:$0xff] %v11871_v63 }
 0x1b3   : > { %v11874_v0 = vpop.trf.xlu0  ;;  %v11876_v1 = vld [vmem:[#allocation2 + $0x30] sm:$0xff] }
 0x1b4   : > { %875 = vst [vmem:[#allocation2 + $0x49] sm:$0xff] %v11874_v0  ;;  %8856 = vmatprep.mubr.f32.mxu0 %v11876_v1  ;;  %v11880_v2 = vpop.trf.xlu1  ;;  %v11988_v38 = vld [vmem:[#allocation2 + $0xf0] sm:$0xff] }
 0x1b5   : > { %891 = vst [vmem:[#allocation2 + $0x109] sm:$0xff] %v11880_v2 }
 0x1b7   : > { %v11883_v3 = vpop.trf.xlu0  ;;  %v11885_v4 = vld [vmem:[#allocation2 + $0x38] sm:$0xff] }
 0x1b8   : > { %876 = vst [vmem:[#allocation2 + $0x51] sm:$0xff] %v11883_v3  ;;  %8857 = vmatmul.mubr.f32.gmra.mrb[36].mxu0 %v11885_v4  ;;  %v11889_v5 = vpop.trf.xlu1  ;;  %v11991_v39 = vld [vmem:[#allocation2 + $0xf8] sm:$0xff] }
 0x1b9   : > { %892 = vst [vmem:[#allocation2 + $0x111] sm:$0xff] %v11889_v5 }
 0x1bb   : > { %v11892_v6 = vpop.trf.xlu0  ;;  %v11894_v7 = vld [vmem:[#allocation2 + $0x48] sm:$0xff] }
 0x1bc   : > { %877 = vst [vmem:[#allocation2 + $0x61] sm:$0xff] %v11892_v6  ;;  %8859 = vmatprep.mubr.f32.mxu0 %v11894_v7  ;;  %v11898_v8 = vpop.trf.xlu1  ;;  %v11994_v40 = vld [vmem:[#allocation2 + $0x108] sm:$0xff] }
 0x1bd   : > { %893 = vst [vmem:[#allocation2 + $0x121] sm:$0xff] %v11898_v8 }
 0x1bf   : > { %v11901_v9 = vpop.trf.xlu0  ;;  %v11903_v10 = vld [vmem:[#allocation2 + $0x50] sm:$0xff] }
 0x1c0   : > { %878 = vst [vmem:[#allocation2 + $0x69] sm:$0xff] %v11901_v9  ;;  %8860 = vmatmul.mubr.f32.gmra.mrb[38].mxu0 %v11903_v10  ;;  %v11907_v11 = vpop.trf.xlu1  ;;  %v11997_v41 = vld [vmem:[#allocation2 + $0x110] sm:$0xff] }
 0x1c1   : > { %894 = vst [vmem:[#allocation2 + $0x129] sm:$0xff] %v11907_v11 }
 0x1c3   : > { %v11910_v12 = vpop.trf.xlu0  ;;  %v11912_v13 = vld [vmem:[#allocation2 + $0x60] sm:$0xff] }
 0x1c4   : > { %879 = vst [vmem:[#allocation2 + $0x79] sm:$0xff] %v11910_v12  ;;  %8862 = vmatprep.mubr.f32.mxu0 %v11912_v13  ;;  %v11916_v14 = vpop.trf.xlu1  ;;  %v12000_v42 = vld [vmem:[#allocation2 + $0x120] sm:$0xff] }
 0x1c5   : > { %895 = vst [vmem:[#allocation2 + $0x139] sm:$0xff] %v11916_v14  ;;  %13132 = vst [vmem:[#allocation13_spill] sm:$0xff] %v12000_v42 }
 0x1c7   : > { %v11919_v15 = vpop.trf.xlu0  ;;  %v11921_v16 = vld [vmem:[#allocation2 + $0x68] sm:$0xff] }
 0x1c8   : > { %880 = vst [vmem:[#allocation2 + $0x81] sm:$0xff] %v11919_v15  ;;  %8863 = vmatmul.mubr.f32.gmra.mrb[40].mxu0 %v11921_v16  ;;  %v11925_v17 = vpop.trf.xlu1  ;;  %v12003_v43 = vld [vmem:[#allocation2 + $0x128] sm:$0xff] }
 0x1c9   : > { %896 = vst [vmem:[#allocation2 + $0x141] sm:$0xff] %v11925_v17  ;;  %13133 = vst [vmem:[#allocation14_spill] sm:$0xff] %v12003_v43 }
 0x1cb   : > { %v11928_v18 = vpop.trf.xlu0  ;;  %v11930_v19 = vld [vmem:[#allocation2 + $0x78] sm:$0xff] }
 0x1cc   : > { %881 = vst [vmem:[#allocation2 + $0x91] sm:$0xff] %v11928_v18  ;;  %8865 = vmatprep.mubr.f32.mxu0 %v11930_v19  ;;  %v11934_v20 = vpop.trf.xlu1  ;;  %v12006_v44 = vld [vmem:[#allocation2 + $0x138] sm:$0xff] }
 0x1cd   : > { %897 = vst [vmem:[#allocation2 + $0x151] sm:$0xff] %v11934_v20  ;;  %13134 = vst [vmem:[#allocation15_spill] sm:$0xff] %v12006_v44 }
 0x1cf   : > { %v11937_v21 = vpop.trf.xlu0  ;;  %v11939_v22 = vld [vmem:[#allocation2 + $0x80] sm:$0xff] }
 0x1d0   : > { %882 = vst [vmem:[#allocation2 + $0x99] sm:$0xff] %v11937_v21  ;;  %8866 = vmatmul.mubr.f32.gmra.mrb[42].mxu0 %v11939_v22  ;;  %v11943_v23 = vpop.trf.xlu1  ;;  %v12009_v45 = vld [vmem:[#allocation2 + $0x140] sm:$0xff] }
 0x1d1   : > { %898 = vst [vmem:[#allocation2 + $0x159] sm:$0xff] %v11943_v23  ;;  %13135 = vst [vmem:[#allocation16_spill] sm:$0xff] %v12009_v45 }
 0x1d3   : > { %v11946_v24 = vpop.trf.xlu0  ;;  %v11948_v25 = vld [vmem:[#allocation2 + $0x90] sm:$0xff] }
 0x1d4   : > { %883 = vst [vmem:[#allocation2 + $0xa9] sm:$0xff] %v11946_v24  ;;  %8868 = vmatprep.mubr.f32.mxu0 %v11948_v25  ;;  %v11952_v26 = vpop.trf.xlu1  ;;  %v12012_v46 = vld [vmem:[#allocation2 + $0x150] sm:$0xff] }
 0x1d5   : > { %13130 = vst [vmem:[#allocation11_spill] sm:$0xff] %v11952_v26  ;;  %899 = vst [vmem:[#allocation2 + $0x169] sm:$0xff] %v11952_v26 }
 0x1d6   : > { %13136 = vst [vmem:[#allocation17_spill] sm:$0xff] %v12012_v46 }
 0x1d7   : > { %v11955_v27 = vpop.trf.xlu0  ;;  %v11957_v28 = vld [vmem:[#allocation2 + $0x98] sm:$0xff] }
 0x1d8   : > { %884 = vst [vmem:[#allocation2 + $0xb1] sm:$0xff] %v11955_v27  ;;  %8869 = vmatmul.mubr.f32.gmra.mrb[44].mxu0 %v11957_v28  ;;  %v11961_v29 = vpop.trf.xlu1  ;;  %v12017_v48 = vld [vmem:[#allocation2 + $0x158] sm:$0xff] }
 0x1d9   : > { %13131 = vst [vmem:[#allocation12_spill] sm:$0xff] %v11961_v29  ;;  %900 = vst [vmem:[#allocation2 + $0x171] sm:$0xff] %v11961_v29 }
 0x1da   : > { %13138 = vst [vmem:[#allocation19_spill] sm:$0xff] %v12017_v48 }
 0x1db   : > { %v11964_v30 = vpop.trf.xlu0  ;;  %v11966_v31 = vld [vmem:[#allocation2 + $0xa8] sm:$0xff] }
 0x1dc   : > { %885 = vst [vmem:[#allocation2 + $0xc1] sm:$0xff] %v11964_v30  ;;  %8871 = vmatprep.mubr.f32.mxu0 %v11966_v31  ;;  %v12015_v47 = vld [vmem:[#allocation2 + $0x168] sm:$0xff] }
 0x1dd   : > { %13137 = vst [vmem:[#allocation18_spill] sm:$0xff] %v12015_v47 }
 0x1df   : > { %v11970_v32 = vpop.trf.xlu0  ;;  %v11972_v33 = vld [vmem:[#allocation2 + $0xb0] sm:$0xff] }
 0x1e0   : > { %886 = vst [vmem:[#allocation2 + $0xc9] sm:$0xff] %v11970_v32  ;;  %8872 = vmatmul.mubr.f32.gmra.mrb[46].mxu0 %v11972_v33  ;;  %v12021_v50 = vld [vmem:[#allocation2 + $0x170] sm:$0xff] }
 0x1e1   : > { %13139 = vst [vmem:[#allocation20_spill] sm:$0xff] %v12021_v50 }
 0x1e3   : > { %v11976_v34 = vld [vmem:[#allocation2 + $0xc0] sm:$0xff] }
 0x1e4   : > { %8874 = vmatprep.mubr.f32.mxu0 %v11976_v34 }
 0x1e7   : > { %v11979_v35 = vld [vmem:[#allocation2 + $0xc8] sm:$0xff] }
 0x1e8   : > { %8875 = vmatmul.mubr.f32.gmra.mrb[48].mxu0 %v11979_v35 }
 0x1e9   : > { %8877 = vmatprep.mubr.f32.mxu0 %v11982_v36 }
 0x1ec   : > { %8878 = vmatmul.mubr.f32.gmra.mrb[50].mxu0 %v11985_v37 }
 0x1ed   : > { %8880 = vmatprep.mubr.f32.mxu0 %v11988_v38 }
 0x1f0   : > { %8881 = vmatmul.mubr.f32.gmra.mrb[52].mxu0 %v11991_v39 }
 0x1f1   : > { %8883 = vmatprep.mubr.f32.mxu0 %v11994_v40 }
 0x1f4   : > { %8884 = vmatmul.mubr.f32.gmra.mrb[54].mxu0 %v11997_v41 }
 0x1f5   : > { %8886 = vmatprep.mubr.f32.mxu0 %v12000_v42  ;;  %v1753_v42 = vld [vmem:[#allocation5 + $0x138] sm:$0xff] }
 0x1f8   : > { %8887 = vmatmul.mubr.f32.gmra.mrb[56].mxu0 %v12003_v43  ;;  %v1750_v43 = vld [vmem:[#allocation5 + $0x120] sm:$0xff] }
 0x1f9   : > { %8889 = vmatprep.mubr.f32.mxu0 %v12006_v44  ;;  %v10358_v44 = vpack.c.bf16 %v1749_v52, %v1748_v51  ;;  %v1755_v51 = vld [vmem:[#allocation5 + $0x148] sm:$0xff] }
 0x1fc   : > { %8890 = vmatmul.mubr.f32.gmra.mrb[58].mxu0 %v12009_v45  ;;  %v1312_v45 = vld [vmem:[#allocation2 + $0x9] sm:$0xff] }
 0x1fd   : > { %8892 = vmatprep.mubr.f32.mxu0 %v12012_v46  ;;  %v1751_v46 = vld [vmem:[#allocation5 + $0x128] sm:$0xff] }
 0x200   : > { %8893 = vmatmul.mubr.f32.gmra.mrb[60].mxu0 %v12017_v48  ;;  %v10362_v48 = vpack.c.bf16 %v1751_v46, %v1750_v43  ;;  %v1757_v43 = vld [vmem:[#allocation5 + $0x158] sm:$0xff]  ;;  %v1758_v46 = vld [vmem:[#allocation5 + $0x160] sm:$0xff] }
 0x201   : > { %8895 = vmatprep.mubr.f32.mxu0 %v12015_v47  ;;  %v1752_v47 = vld [vmem:[#allocation5 + $0x130] sm:$0xff] }
 0x204   : > { %8896 = vmatmul.mubr.f32.gmra.mrb[62].mxu0 %v12021_v50  ;;  %v1754_v50 = vld [vmem:[#allocation5 + $0x140] sm:$0xff] }
 0x205   : > { %8930 = vmatprep.mubr.f32.mxu0 %v1311_v49  ;;  %v10366_v49 = vpack.c.bf16 %v1753_v42, %v1752_v47  ;;  %v1759_v42 = vld [vmem:[#allocation5 + $0x168] sm:$0xff] }
 0x206   : > { %v10378_v47 = vpack.c.bf16 %v1759_v42, %v1758_v46  ;;  %v2118_v46 = vld [vmem:[#allocation5 + $0x190] sm:$0xff]  ;;  %v2119_v42 = vld [vmem:[#allocation5 + $0x198] sm:$0xff] }
 0x208   : > { %8931 = vmatmul.mubr.f32.vlgmr.msra.gmra.mrb[32].mxu0 %v1312_v45  ;;  %v1756_v45 = vld [vmem:[#allocation5 + $0x150] sm:$0xff] }
 0x209   : > { %10357 = vmatpush3.bf16.msra.mxu0 %v11841_v53  ;;  %8933 = vmatprep.mubr.f32.mxu0 %v11844_v54  ;;  %v10370_v53 = vpack.c.bf16 %v1755_v51, %v1754_v50  ;;  %v1761_v50 = vld [vmem:[#allocation5 + $0x178] sm:$0xff]  ;;  %v2117_v51 = vld [vmem:[#allocation5 + $0x188] sm:$0xff] }
 0x20a   : > { %10359 = vmatprep.subr.bf16.mxu0 %v10358_v44 }
 0x20c   : > { %8934 = vmatmul.mubr.f32.gmra.mrb[34].mxu0 %v11850_v56 }
 0x20d   : > { %8936 = vmatprep.mubr.f32.mxu0 %v11856_v58  ;;  %10361 = vmatpush3.bf16.msra.mxu0 %v10358_v44  ;;  %v10374_v44 = vpack.c.bf16 %v1757_v43, %v1756_v45  ;;  %v12046_v45 = vpop.trf.xlu1 }
 0x20e   : > { %10363 = vmatprep.subr.bf16.mxu0 %v10362_v48  ;;  %13140 = vst [vmem:[#allocation21_spill] sm:$0xff] %v12046_v45  ;;  %901 = vst [vmem:[#allocation2 + $0x181] sm:$0xff] %v12046_v45  ;;  %v2122_v45 = vld [vmem:[#allocation5 + $0x1b0] sm:$0xff] }
 0x210   : > { %8937 = vmatmul.mubr.f32.gmra.mrb[36].mxu0 %v11865_v61 }
 0x211   : > { %8939 = vmatprep.mubr.f32.mxu0 %v11874_v0  ;;  %10365 = vmatpush3.bf16.msra.mxu0 %v10362_v48  ;;  %v1760_v48 = vld [vmem:[#allocation5 + $0x170] sm:$0xff]  ;;  %v12051_v43 = vpop.trf.xlu1 }
 0x212   : > { %10367 = vmatprep.subr.bf16.mxu0 %v10366_v49  ;;  %v10382_v52 = vpack.c.bf16 %v1761_v50, %v1760_v48  ;;  %13141 = vst [vmem:[#allocation22_spill] sm:$0xff] %v12051_v43  ;;  %902 = vst [vmem:[#allocation2 + $0x189] sm:$0xff] %v12051_v43  ;;  %v10390_v48 = vpack.c.bf16 %v2119_v42, %v2118_v46  ;;  %v2120_v50 = vld [vmem:[#allocation5 + $0x1a0] sm:$0xff]  ;;  %v12064_v43 = vld [vmem:[#allocation2 + $0x22] sm:$0xff] }
 0x213   : > { %13142 = vst [vmem:[#allocation23_spill] sm:$0xff] %v12064_v43  ;;  %v12070_v46 = vld [vmem:[#allocation2 + $0x3a] sm:$0xff] }
 0x214   : > { %8940 = vmatmul.mubr.f32.gmra.mrb[38].mxu0 %v11883_v3  ;;  %13144 = vst [vmem:[#allocation25_spill] sm:$0xff] %v12070_v46  ;;  %v2125_v42 = vld [vmem:[#allocation5 + $0x1c8] sm:$0xff] }
 0x215   : > { %8942 = vmatprep.mubr.f32.mxu0 %v11892_v6  ;;  %10369 = vmatpush3.bf16.msra.mxu0 %v10366_v49  ;;  %v2116_v49 = vld [vmem:[#allocation5 + $0x180] sm:$0xff] }
 0x216   : > { %10371 = vmatprep.subr.bf16.mxu0 %v10370_v53 }
 0x218   : > { %8943 = vmatmul.mubr.f32.gmra.mrb[40].mxu0 %v11901_v9 }
 0x219   : > { %8945 = vmatprep.mubr.f32.mxu0 %v11910_v12  ;;  %10373 = vmatpush3.bf16.msra.mxu0 %v10370_v53  ;;  %v10386_v53 = vpack.c.bf16 %v2117_v51, %v2116_v49  ;;  %v12061_v49 = vld [vmem:[#allocation2 + $0x1a] sm:$0xff] }
 0x21a   : > { %10375 = vmatprep.subr.bf16.mxu0 %v10374_v44 }
 0x21c   : > { %8946 = vmatmul.mubr.f32.gmra.mrb[42].mxu0 %v11919_v15 }
 0x21d   : > { %8948 = vmatprep.mubr.f32.mxu0 %v11928_v18  ;;  %10377 = vmatpush3.bf16.msra.mxu0 %v10374_v44  ;;  %v1681_v44 = vld [vmem:[#allocation2 + $0x2] sm:$0xff] }
 0x21e   : > { %10379 = vmatprep.subr.bf16.mxu0 %v10378_v47 }
 0x220   : > { %8949 = vmatmul.mubr.f32.gmra.mrb[44].mxu0 %v11937_v21 }
 0x221   : > { %8951 = vmatprep.mubr.f32.mxu0 %v11946_v24  ;;  %10381 = vmatpush3.bf16.msra.mxu0 %v10378_v47  ;;  %v1682_v47 = vld [vmem:[#allocation2 + $0xa] sm:$0xff] }
 0x222   : > { %10383 = vmatprep.subr.bf16.mxu0 %v10382_v52 }
 0x224   : > { %8952 = vmatmul.mubr.f32.gmra.mrb[46].mxu0 %v11955_v27 }
 0x225   : > { %8954 = vmatprep.mubr.f32.mxu0 %v11964_v30  ;;  %10385 = vmatpush3.bf16.msra.mxu0 %v10382_v52  ;;  %v2121_v52 = vld [vmem:[#allocation5 + $0x1a8] sm:$0xff] }
 0x226   : > { %10387 = vmatprep.subr.bf16.mxu0 %v10386_v53  ;;  %v10394_v51 = vpack.c.bf16 %v2121_v52, %v2120_v50  ;;  %v12076_v52 = vld [vmem:[#allocation2 + $0x52] sm:$0xff] }
 0x227   : > { %13146 = vst [vmem:[#allocation27_spill] sm:$0xff] %v12076_v52 }
 0x228   : > { %8955 = vmatmul.mubr.f32.gmra.mrb[48].mxu0 %v11970_v32 }
 0x229   : > { %8957 = vmatprep.mubr.f32.mxu0 %v11847_v55 }
 0x22c   : > { %8958 = vmatmul.mubr.f32.gmra.mrb[50].mxu0 %v11853_v57 }
 0x22d   : > { %8960 = vmatprep.mubr.f32.mxu0 %v11862_v60 }
 0x230   : > { %8961 = vmatmul.mubr.f32.gmra.mrb[52].mxu0 %v11871_v63 }
 0x231   : > { %8963 = vmatprep.mubr.f32.mxu0 %v11880_v2 }
 0x234   : > { %8964 = vmatmul.mubr.f32.gmra.mrb[54].mxu0 %v11889_v5 }
 0x235   : > { %8966 = vmatprep.mubr.f32.mxu0 %v11898_v8 }
 0x238   : > { %8967 = vmatmul.mubr.f32.gmra.mrb[56].mxu0 %v11907_v11 }
 0x239   : > { %8969 = vmatprep.mubr.f32.mxu0 %v11916_v14 }
 0x23c   : > { %8970 = vmatmul.mubr.f32.gmra.mrb[58].mxu0 %v11925_v17 }
 0x23d   : > { %8972 = vmatprep.mubr.f32.mxu0 %v11934_v20 }
 0x240   : > { %8973 = vmatmul.mubr.f32.gmra.mrb[60].mxu0 %v11943_v23 }
 0x241   : > { %8975 = vmatprep.mubr.f32.mxu0 %v11952_v26  ;;  %v2123_v26 = vld [vmem:[#allocation5 + $0x1b8] sm:$0xff] }
 0x244   : > { %8976 = vmatmul.mubr.f32.gmra.mrb[62].mxu0 %v11961_v29  ;;  %v12067_v29 = vld [vmem:[#allocation2 + $0x32] sm:$0xff] }
 0x245   : > { %9010 = vmatprep.mubr.f32.mxu0 %v1681_v44  ;;  %13143 = vst [vmem:[#allocation24_spill] sm:$0xff] %v12067_v29  ;;  %v10398_v44 = vpack.c.bf16 %v2123_v26, %v2122_v45  ;;  %v12079_v26 = vld [vmem:[#allocation2 + $0x62] sm:$0xff] }
 0x246   : > { %13147 = vst [vmem:[#allocation28_spill] sm:$0xff] %v12079_v26 }
 0x248   : > { %9011 = vmatmul.mubr.f32.vlgmr.msra.gmra.mrb[32].mxu0 %v1682_v47  ;;  %v12073_v47 = vld [vmem:[#allocation2 + $0x4a] sm:$0xff] }
 0x249   : > { %10389 = vmatpush3.bf16.msra.mxu0 %v10386_v53  ;;  %9013 = vmatprep.mubr.f32.mxu0 %v12061_v49  ;;  %v2124_v53 = vld [vmem:[#allocation5 + $0x1c0] sm:$0xff]  ;;  %13145 = vst [vmem:[#allocation26_spill] sm:$0xff] %v12073_v47 }
 0x24a   : > { %10391 = vmatprep.subr.bf16.mxu0 %v10390_v48  ;;  %v10402_v50 = vpack.c.bf16 %v2125_v42, %v2124_v53  ;;  %v12088_v42 = vld [vmem:[#allocation2 + $0x82] sm:$0xff] }
 0x24c   : > { %9014 = vmatmul.mubr.f32.gmra.mrb[34].mxu0 %v12064_v43  ;;  %v2126_v43 = vld [vmem:[#allocation5 + $0x1d0] sm:$0xff] }
 0x24d   : > { %9016 = vmatprep.mubr.f32.mxu0 %v12067_v29  ;;  %10393 = vmatpush3.bf16.msra.mxu0 %v10390_v48  ;;  %v2127_v29 = vld [vmem:[#allocation5 + $0x1d8] sm:$0xff] }
 0x24e   : > { %10395 = vmatprep.subr.bf16.mxu0 %v10394_v51  ;;  %v10406_v45 = vpack.c.bf16 %v2127_v29, %v2126_v43  ;;  %v12082_v48 = vld [vmem:[#allocation2 + $0x6a] sm:$0xff]  ;;  %v12091_v29 = vld [vmem:[#allocation2 + $0x92] sm:$0xff] }
 0x24f   : > { %13148 = vst [vmem:[#allocation29_spill] sm:$0xff] %v12082_v48 }
 0x250   : > { %9017 = vmatmul.mubr.f32.gmra.mrb[36].mxu0 %v12070_v46  ;;  %v2128_v46 = vld [vmem:[#allocation5 + $0x1e0] sm:$0xff] }
 0x251   : > { %9019 = vmatprep.mubr.f32.mxu0 %v12073_v47  ;;  %10397 = vmatpush3.bf16.msra.mxu0 %v10394_v51  ;;  %v2129_v47 = vld [vmem:[#allocation5 + $0x1e8] sm:$0xff] }
 0x252   : > { %10399 = vmatprep.subr.bf16.mxu0 %v10398_v44  ;;  %v12085_v51 = vld [vmem:[#allocation2 + $0x7a] sm:$0xff]  ;;  %v10410_v53 = vpack.c.bf16 %v2129_v47, %v2128_v46  ;;  %v12097_v46 = vld [vmem:[#allocation2 + $0xaa] sm:$0xff] }
 0x253   : > { %13149 = vst [vmem:[#allocation30_spill] sm:$0xff] %v12085_v51  ;;  %13150 = vst [vmem:[#allocation31_spill] sm:$0xff] %v12097_v46 }
 0x254   : > { %9020 = vmatmul.mubr.f32.gmra.mrb[38].mxu0 %v12076_v52  ;;  %v2130_v52 = vld [vmem:[#allocation5 + $0x1f0] sm:$0xff] }
 0x255   : > { %9022 = vmatprep.mubr.f32.mxu0 %v12079_v26  ;;  %10401 = vmatpush3.bf16.msra.mxu0 %v10398_v44  ;;  %v2131_v26 = vld [vmem:[#allocation5 + $0x1f8] sm:$0xff]  ;;  %v12094_v44 = vld [vmem:[#allocation2 + $0x9a] sm:$0xff] }
 0x256   : > { %10403 = vmatprep.subr.bf16.mxu0 %v10402_v50  ;;  %v10414_v43 = vpack.c.bf16 %v2131_v26, %v2130_v52  ;;  %v12106_v52 = vld [vmem:[#allocation2 + $0xca] sm:$0xff]  ;;  %v12109_v26 = vld [vmem:[#allocation2 + $0xda] sm:$0xff] }
 0x257   : > { %13153 = vst [vmem:[#allocation34_spill] sm:$0xff] %v12106_v52  ;;  %13154 = vst [vmem:[#allocation35_spill] sm:$0xff] %v12109_v26 }
 0x258   : > { %9023 = vmatmul.mubr.f32.gmra.mrb[40].mxu0 %v12082_v48  ;;  %v2486_v48 = vld [vmem:[#allocation5 + $0x200] sm:$0xff] }
 0x259   : > { %9025 = vmatprep.mubr.f32.mxu0 %v12085_v51  ;;  %10405 = vmatpush3.bf16.msra.mxu0 %v10402_v50  ;;  %v2487_v51 = vld [vmem:[#allocation5 + $0x208] sm:$0xff] }
 0x25a   : > { %10407 = vmatprep.subr.bf16.mxu0 %v10406_v45  ;;  %v10418_v47 = vpack.c.bf16 %v2487_v51, %v2486_v48  ;;  %v12100_v50 = vld [vmem:[#allocation2 + $0xb2] sm:$0xff]  ;;  %v12118_v51 = vld [vmem:[#allocation2 + $0xfa] sm:$0xff] }
 0x25b   : > { %13151 = vst [vmem:[#allocation32_spill] sm:$0xff] %v12100_v50  ;;  %v12115_v48 = vld [vmem:[#allocation2 + $0xf2] sm:$0xff]  ;;  %13157 = vst [vmem:[#allocation38_spill] sm:$0xff] %v12118_v51 }
 0x25c   : > { %9026 = vmatmul.mubr.f32.gmra.mrb[42].mxu0 %v12088_v42  ;;  %13156 = vst [vmem:[#allocation37_spill] sm:$0xff] %v12115_v48 }
 0x25d   : > { %9028 = vmatprep.mubr.f32.mxu0 %v12091_v29  ;;  %10409 = vmatpush3.bf16.msra.mxu0 %v10406_v45  ;;  %v12103_v45 = vld [vmem:[#allocation2 + $0xc2] sm:$0xff] }
 0x25e   : > { %10411 = vmatprep.subr.bf16.mxu0 %v10410_v53  ;;  %13152 = vst [vmem:[#allocation33_spill] sm:$0xff] %v12103_v45 }
 0x260   : > { %9029 = vmatmul.mubr.f32.gmra.mrb[44].mxu0 %v12094_v44 }
 0x261   : > { %9031 = vmatprep.mubr.f32.mxu0 %v12097_v46  ;;  %10413 = vmatpush3.bf16.msra.mxu0 %v10410_v53  ;;  %v12112_v53 = vld [vmem:[#allocation2 + $0xe2] sm:$0xff]  ;;  %v2491_v46 = vld [vmem:[#allocation5 + $0x228] sm:$0xff] }
 0x262   : > { %10415 = vmatprep.subr.bf16.mxu0 %v10414_v43  ;;  %13155 = vst [vmem:[#allocation36_spill] sm:$0xff] %v12112_v53 }
 0x264   : > { %9032 = vmatmul.mubr.f32.gmra.mrb[46].mxu0 %v12100_v50  ;;  %v2490_v50 = vld [vmem:[#allocation5 + $0x220] sm:$0xff] }
 0x265   : > { %9034 = vmatprep.mubr.f32.mxu0 %v12103_v45  ;;  %10417 = vmatpush3.bf16.msra.mxu0 %v10414_v43  ;;  %v12121_v43 = vld [vmem:[#allocation2 + $0x10a] sm:$0xff]  ;;  %v2488_v45 = vld [vmem:[#allocation5 + $0x210] sm:$0xff] }
 0x266   : > { %10419 = vmatprep.subr.bf16.mxu0 %v10418_v47  ;;  %13158 = vst [vmem:[#allocation39_spill] sm:$0xff] %v12121_v43 }
 0x268   : > { %9035 = vmatmul.mubr.f32.gmra.mrb[48].mxu0 %v12106_v52  ;;  %v12124_v52 = vld [vmem:[#allocation2 + $0x112] sm:$0xff] }
 0x269   : > { %9037 = vmatprep.mubr.f32.mxu0 %v12109_v26  ;;  %13159 = vst [vmem:[#allocation40_spill] sm:$0xff] %v12124_v52  ;;  %v12127_v26 = vld [vmem:[#allocation2 + $0x122] sm:$0xff] }
 0x26a   : > { %13160 = vst [vmem:[#allocation41_spill] sm:$0xff] %v12127_v26 }
 0x26c   : > { %9038 = vmatmul.mubr.f32.gmra.mrb[50].mxu0 %v12112_v53  ;;  %v12130_v53 = vld [vmem:[#allocation2 + $0x12a] sm:$0xff] }
 0x26d   : > { %9040 = vmatprep.mubr.f32.mxu0 %v12115_v48  ;;  %13161 = vst [vmem:[#allocation42_spill] sm:$0xff] %v12130_v53  ;;  %v12133_v48 = vld [vmem:[#allocation2 + $0x13a] sm:$0xff] }
 0x26e   : > { %13162 = vst [vmem:[#allocation43_spill] sm:$0xff] %v12133_v48 }
 0x270   : > { %9041 = vmatmul.mubr.f32.gmra.mrb[52].mxu0 %v12118_v51  ;;  %v12136_v51 = vld [vmem:[#allocation2 + $0x142] sm:$0xff] }
 0x271   : > { %9043 = vmatprep.mubr.f32.mxu0 %v12121_v43  ;;  %13163 = vst [vmem:[#allocation44_spill] sm:$0xff] %v12136_v51  ;;  %v12139_v43 = vld [vmem:[#allocation2 + $0x152] sm:$0xff] }
 0x272   : > { %13164 = vst [vmem:[#allocation45_spill] sm:$0xff] %v12139_v43 }
 0x274   : > { %9044 = vmatmul.mubr.f32.gmra.mrb[54].mxu0 %v12124_v52  ;;  %v12142_v52 = vld [vmem:[#allocation2 + $0x15a] sm:$0xff] }
 0x275   : > { %9046 = vmatprep.mubr.f32.mxu0 %v12127_v26  ;;  %13165 = vst [vmem:[#allocation46_spill] sm:$0xff] %v12142_v52  ;;  %v12145_v26 = vld [vmem:[#allocation2 + $0x16a] sm:$0xff] }
 0x276   : > { %13166 = vst [vmem:[#allocation47_spill] sm:$0xff] %v12145_v26 }
 0x278   : > { %9047 = vmatmul.mubr.f32.gmra.mrb[56].mxu0 %v12130_v53  ;;  %v12148_v53 = vld [vmem:[#allocation2 + $0x172] sm:$0xff] }
 0x279   : > { %9049 = vmatprep.mubr.f32.mxu0 %v12133_v48  ;;  %13167 = vst [vmem:[#allocation48_spill] sm:$0xff] %v12148_v53  ;;  %v2489_v48 = vld [vmem:[#allocation5 + $0x218] sm:$0xff] }
 0x27c   : > { %9050 = vmatmul.mubr.f32.gmra.mrb[58].mxu0 %v12136_v51  ;;  %v10422_v51 = vpack.c.bf16 %v2489_v48, %v2488_v45  ;;  %v2495_v45 = vld [vmem:[#allocation5 + $0x248] sm:$0xff] }
 0x27d   : > { %9052 = vmatprep.mubr.f32.mxu0 %v12139_v43  ;;  %v2492_v43 = vld [vmem:[#allocation5 + $0x230] sm:$0xff]  ;;  %v2861_v48 = vld [vmem:[#allocation5 + $0x2a8] sm:$0xff] }
 0x280   : > { %9053 = vmatmul.mubr.f32.gmra.mrb[60].mxu0 %v12142_v52  ;;  %v10426_v52 = vpack.c.bf16 %v2491_v46, %v2490_v50  ;;  %v2497_v46 = vld [vmem:[#allocation5 + $0x258] sm:$0xff] }
 0x281   : > { %9055 = vmatprep.mubr.f32.mxu0 %v12145_v26  ;;  %v2493_v26 = vld [vmem:[#allocation5 + $0x238] sm:$0xff] }
 0x282   : > { %v2501_v50 = vld [vmem:[#allocation5 + $0x278] sm:$0xff] }
 0x284   : > { %9056 = vmatmul.mubr.f32.gmra.mrb[62].mxu0 %v12148_v53  ;;  %v10430_v53 = vpack.c.bf16 %v2493_v26, %v2492_v43  ;;  %v2862_v43 = vld [vmem:[#allocation5 + $0x2b0] sm:$0xff] }
 0x285   : > { %9090 = vmatprep.mubr.f32.mxu0 %v11858_v59  ;;  %v2494_v59 = vld [vmem:[#allocation5 + $0x240] sm:$0xff] }
 0x288   : > { %9091 = vmatmul.mubr.f32.vlgmr.msra.gmra.mrb[32].mxu0 %v11867_v62  ;;  %v10434_v62 = vpack.c.bf16 %v2495_v45, %v2494_v59  ;;  %v2863_v59 = vld [vmem:[#allocation5 + $0x2b8] sm:$0xff] }
 0x289   : > { %10421 = vmatpush3.bf16.msra.mxu0 %v10418_v47  ;;  %9093 = vmatprep.mubr.f32.mxu0 %v11876_v1  ;;  %v2496_v1 = vld [vmem:[#allocation5 + $0x250] sm:$0xff]  ;;  %v2499_v47 = vld [vmem:[#allocation5 + $0x268] sm:$0xff]  ;;  %v10462_v45 = vpack.c.bf16 %v2863_v59, %v2862_v43  ;;  %v13196_v43 = vld [vmem:[#allocation39_spill] sm:$0xff] }
 0x28a   : > { %10423 = vmatprep.subr.bf16.mxu0 %v10422_v51  ;;  %v13197_v59 = vld [vmem:[#allocation40_spill] sm:$0xff] }
 0x28c   : > { %9094 = vmatmul.mubr.f32.gmra.mrb[34].mxu0 %v11885_v4  ;;  %v10438_v4 = vpack.c.bf16 %v2497_v46, %v2496_v1  ;;  %v2867_v1 = vld [vmem:[#allocation5 + $0x2d8] sm:$0xff]  ;;  %v2869_v46 = vld [vmem:[#allocation5 + $0x2e8] sm:$0xff] }
 0x28d   : > { %9096 = vmatprep.mubr.f32.mxu0 %v11894_v7  ;;  %10425 = vmatpush3.bf16.msra.mxu0 %v10422_v51  ;;  %v2498_v7 = vld [vmem:[#allocation5 + $0x260] sm:$0xff] }
 0x28e   : > { %10427 = vmatprep.subr.bf16.mxu0 %v10426_v52 }
 0x290   : > { %9097 = vmatmul.mubr.f32.gmra.mrb[36].mxu0 %v11903_v10  ;;  %v10442_v10 = vpack.c.bf16 %v2499_v47, %v2498_v7  ;;  %v3228_v7 = vld [vmem:[#allocation5 + $0x308] sm:$0xff]  ;;  %v13184_v47 = vld [vmem:[#allocation27_spill] sm:$0xff] }
 0x291   : > { %9099 = vmatprep.mubr.f32.mxu0 %v11912_v13  ;;  %10429 = vmatpush3.bf16.msra.mxu0 %v10426_v52  ;;  %v2500_v13 = vld [vmem:[#allocation5 + $0x270] sm:$0xff]  ;;  %v2857_v52 = vld [vmem:[#allocation5 + $0x288] sm:$0xff] }
 0x292   : > { %10431 = vmatprep.subr.bf16.mxu0 %v10430_v53 }
 0x294   : > { %9100 = vmatmul.mubr.f32.gmra.mrb[38].mxu0 %v11921_v16  ;;  %v10446_v16 = vpack.c.bf16 %v2501_v50, %v2500_v13  ;;  %v3237_v50 = vld [vmem:[#allocation5 + $0x350] sm:$0xff] }
 0x295   : > { %9102 = vmatprep.mubr.f32.mxu0 %v11930_v19  ;;  %10433 = vmatpush3.bf16.msra.mxu0 %v10430_v53  ;;  %v2856_v19 = vld [vmem:[#allocation5 + $0x280] sm:$0xff] }
 0x296   : > { %10435 = vmatprep.subr.bf16.mxu0 %v10434_v62  ;;  %v2860_v53 = vld [vmem:[#allocation5 + $0x2a0] sm:$0xff] }
 0x297   : > { %v10458_v51 = vpack.c.bf16 %v2861_v48, %v2860_v53  ;;  %v13192_v53 = vld [vmem:[#allocation35_spill] sm:$0xff]  ;;  %v13194_v48 = vld [vmem:[#allocation37_spill] sm:$0xff] }
 0x298   : > { %9103 = vmatmul.mubr.f32.gmra.mrb[40].mxu0 %v11939_v22  ;;  %v10450_v22 = vpack.c.bf16 %v2857_v52, %v2856_v19  ;;  %v13186_v19 = vld [vmem:[#allocation29_spill] sm:$0xff]  ;;  %v13187_v52 = vld [vmem:[#allocation30_spill] sm:$0xff] }
 0x299   : > { %9105 = vmatprep.mubr.f32.mxu0 %v11948_v25  ;;  %10437 = vmatpush3.bf16.msra.mxu0 %v10434_v62  ;;  %v13168_v25 = vld [vmem:[#allocation13_spill] sm:$0xff]  ;;  %v2865_v62 = vld [vmem:[#allocation5 + $0x2c8] sm:$0xff] }
 0x29a   : > { %10439 = vmatprep.subr.bf16.mxu0 %v10438_v4 }
 0x29c   : > { %9106 = vmatmul.mubr.f32.gmra.mrb[42].mxu0 %v11957_v28  ;;  %v13169_v28 = vld [vmem:[#allocation14_spill] sm:$0xff] }
 0x29d   : > { %9108 = vmatprep.mubr.f32.mxu0 %v11966_v31  ;;  %10441 = vmatpush3.bf16.msra.mxu0 %v10438_v4  ;;  %v13170_v31 = vld [vmem:[#allocation15_spill] sm:$0xff]  ;;  %v2871_v4 = vld [vmem:[#allocation5 + $0x2f8] sm:$0xff] }
 0x29e   : > { %10443 = vmatprep.subr.bf16.mxu0 %v10442_v10 }
 0x2a0   : > { %9109 = vmatmul.mubr.f32.gmra.mrb[44].mxu0 %v11972_v33  ;;  %v13171_v33 = vld [vmem:[#allocation16_spill] sm:$0xff] }
 0x2a1   : > { %9111 = vmatprep.mubr.f32.mxu0 %v11976_v34  ;;  %10445 = vmatpush3.bf16.msra.mxu0 %v10442_v10  ;;  %v13172_v34 = vld [vmem:[#allocation17_spill] sm:$0xff]  ;;  %v13185_v10 = vld [vmem:[#allocation28_spill] sm:$0xff] }
 0x2a2   : > { %10447 = vmatprep.subr.bf16.mxu0 %v10446_v16 }
 0x2a4   : > { %9112 = vmatmul.mubr.f32.gmra.mrb[46].mxu0 %v11979_v35  ;;  %v13173_v35 = vld [vmem:[#allocation19_spill] sm:$0xff] }
 0x2a5   : > { %9114 = vmatprep.mubr.f32.mxu0 %v11982_v36  ;;  %10449 = vmatpush3.bf16.msra.mxu0 %v10446_v16  ;;  %v13174_v36 = vld [vmem:[#allocation18_spill] sm:$0xff] }
 0x2a6   : > { %10451 = vmatprep.subr.bf16.mxu0 %v10450_v22  ;;  %v3238_v16 = vld [vmem:[#allocation5 + $0x358] sm:$0xff] }
 0x2a8   : > { %9115 = vmatmul.mubr.f32.gmra.mrb[48].mxu0 %v11985_v37  ;;  %v12180_v37 = vld [vmem:[#allocation2 + $0x180] sm:$0xff] }
 0x2a9   : > { %9117 = vmatprep.mubr.f32.mxu0 %v11988_v38  ;;  %v13175_v38 = vld [vmem:[#allocation20_spill] sm:$0xff] }
 0x2ac   : > { %9118 = vmatmul.mubr.f32.gmra.mrb[50].mxu0 %v11991_v39  ;;  %v12184_v39 = vld [vmem:[#allocation2 + $0x188] sm:$0xff] }
 0x2ad   : > { %9120 = vmatprep.mubr.f32.mxu0 %v11994_v40  ;;  %v2858_v40 = vld [vmem:[#allocation5 + $0x290] sm:$0xff] }
 0x2b0   : > { %9121 = vmatmul.mubr.f32.gmra.mrb[52].mxu0 %v11997_v41  ;;  %v2859_v41 = vld [vmem:[#allocation5 + $0x298] sm:$0xff] }
 0x2b1   : > { %9123 = vmatprep.mubr.f32.mxu0 %v13168_v25  ;;  %v10454_v26 = vpack.c.bf16 %v2859_v41, %v2858_v40  ;;  %v3239_v25 = vld [vmem:[#allocation5 + $0x360] sm:$0xff]  ;;  %v3598_v40 = vld [vmem:[#allocation5 + $0x388] sm:$0xff] }
 0x2b2   : > { %v13189_v41 = vld [vmem:[#allocation32_spill] sm:$0xff] }
 0x2b4   : > { %9124 = vmatmul.mubr.f32.gmra.mrb[54].mxu0 %v13169_v28  ;;  %v3240_v28 = vld [vmem:[#allocation5 + $0x368] sm:$0xff] }
 0x2b5   : > { %9126 = vmatprep.mubr.f32.mxu0 %v13170_v31  ;;  %v10506_v31 = vpack.c.bf16 %v3240_v28, %v3239_v25  ;;  %v3175_v28 = vld [vmem:[#allocation2 + $0xc8] sm:$0xff] }
 0x2b8   : > { %9127 = vmatmul.mubr.f32.gmra.mrb[56].mxu0 %v13171_v33  ;;  %v3241_v33 = vld [vmem:[#allocation5 + $0x370] sm:$0xff] }
 0x2b9   : > { %9129 = vmatprep.mubr.f32.mxu0 %v13172_v34  ;;  %v3242_v34 = vld [vmem:[#allocation5 + $0x378] sm:$0xff] }
 0x2bc   : > { %9130 = vmatmul.mubr.f32.gmra.mrb[58].mxu0 %v13173_v35  ;;  %v13188_v35 = vld [vmem:[#allocation31_spill] sm:$0xff] }
 0x2bd   : > { %9132 = vmatprep.mubr.f32.mxu0 %v13174_v36  ;;  %v10510_v36 = vpack.c.bf16 %v3242_v34, %v3241_v33  ;;  %v3968_v33 = vld [vmem:[#allocation5 + $0x408] sm:$0xff] }
 0x2be   : > { %v3176_v34 = vld [vmem:[#allocation2 + $0xd8] sm:$0xff] }
 0x2c0   : > { %9133 = vmatmul.mubr.f32.gmra.mrb[60].mxu0 %v13175_v38  ;;  %v3597_v38 = vld [vmem:[#allocation5 + $0x380] sm:$0xff] }
 0x2c1   : > { %9135 = vmatprep.mubr.f32.mxu0 %v12180_v37 }
 0x2c4   : > { %9136 = vmatmul.mubr.f32.gmra.mrb[62].mxu0 %v12184_v39 }
 0x2c5   : > { %9170 = vmatprep.mubr.f32.mxu0 %v11844_v54  ;;  %v2864_v54 = vld [vmem:[#allocation5 + $0x2c0] sm:$0xff] }
 0x2c8   : > { %9171 = vmatmul.mubr.f32.vlgmr.msra.gmra.mrb[32].mxu0 %v11850_v56  ;;  %v10466_v56 = vpack.c.bf16 %v2865_v62, %v2864_v54  ;;  %v13199_v54 = vld [vmem:[#allocation42_spill] sm:$0xff]  ;;  %v13200_v62 = vld [vmem:[#allocation43_spill] sm:$0xff] }
 0x2c9   : > { %10453 = vmatpush3.bf16.msra.mxu0 %v10450_v22  ;;  %9173 = vmatprep.mubr.f32.mxu0 %v11856_v58  ;;  %v2866_v58 = vld [vmem:[#allocation5 + $0x2d0] sm:$0xff]  ;;  %v10502_v22 = vpack.c.bf16 %v3238_v16, %v3237_v50  ;;  %v3173_v16 = vld [vmem:[#allocation2 + $0xb0] sm:$0xff] }
 0x2ca   : > { %10455 = vmatprep.subr.bf16.mxu0 %v10454_v26 }
 0x2cc   : > { %9174 = vmatmul.mubr.f32.gmra.mrb[34].mxu0 %v11865_v61  ;;  %v10470_v61 = vpack.c.bf16 %v2867_v1, %v2866_v58  ;;  %v13202_v58 = vld [vmem:[#allocation45_spill] sm:$0xff]  ;;  %v13203_v1 = vld [vmem:[#allocation46_spill] sm:$0xff] }
 0x2cd   : > { %9176 = vmatprep.mubr.f32.mxu0 %v11874_v0  ;;  %10457 = vmatpush3.bf16.msra.mxu0 %v10454_v26  ;;  %v2868_v0 = vld [vmem:[#allocation5 + $0x2e0] sm:$0xff]  ;;  %v13190_v26 = vld [vmem:[#allocation33_spill] sm:$0xff] }
 0x2ce   : > { %10459 = vmatprep.subr.bf16.mxu0 %v10458_v51 }
 0x2d0   : > { %9177 = vmatmul.mubr.f32.gmra.mrb[36].mxu0 %v11883_v3  ;;  %v10474_v3 = vpack.c.bf16 %v2869_v46, %v2868_v0  ;;  %v13205_v0 = vld [vmem:[#allocation48_spill] sm:$0xff]  ;;  %v12249_v46 = vld [vmem:[#allocation2 + $0x182] sm:$0xff] }
 0x2d1   : > { %9179 = vmatprep.mubr.f32.mxu0 %v11892_v6  ;;  %10461 = vmatpush3.bf16.msra.mxu0 %v10458_v51  ;;  %v2870_v6 = vld [vmem:[#allocation5 + $0x2f0] sm:$0xff]  ;;  %v13195_v51 = vld [vmem:[#allocation38_spill] sm:$0xff] }
 0x2d2   : > { %10463 = vmatprep.subr.bf16.mxu0 %v10462_v45 }
 0x2d4   : > { %9180 = vmatmul.mubr.f32.gmra.mrb[38].mxu0 %v11901_v9  ;;  %v10478_v9 = vpack.c.bf16 %v2871_v4, %v2870_v6  ;;  %v3599_v6 = vld [vmem:[#allocation5 + $0x390] sm:$0xff]  ;;  %v3600_v4 = vld [vmem:[#allocation5 + $0x398] sm:$0xff] }
 0x2d5   : > { %9182 = vmatprep.mubr.f32.mxu0 %v11910_v12  ;;  %10465 = vmatpush3.bf16.msra.mxu0 %v10462_v45  ;;  %v3227_v12 = vld [vmem:[#allocation5 + $0x300] sm:$0xff]  ;;  %v13198_v45 = vld [vmem:[#allocation41_spill] sm:$0xff] }
 0x2d6   : > { %10467 = vmatprep.subr.bf16.mxu0 %v10466_v56 }
 0x2d8   : > { %9183 = vmatmul.mubr.f32.gmra.mrb[40].mxu0 %v11919_v15  ;;  %v10482_v15 = vpack.c.bf16 %v3228_v7, %v3227_v12  ;;  %v10518_v12 = vpack.c.bf16 %v3600_v4, %v3599_v6  ;;  %v3163_v7 = vld [vmem:[#allocation2 + $0x38] sm:$0xff]  ;;  %v4473_v6 = vld [vmem:[#allocation7 + $0x10] sm:$0xff]  ;;  %v4474_v4 = vld [vmem:[#allocation7 + $0x18] sm:$0xff] }
 0x2d9   : > { %9185 = vmatprep.mubr.f32.mxu0 %v11928_v18  ;;  %10469 = vmatpush3.bf16.msra.mxu0 %v10466_v56  ;;  %v13181_v18 = vld [vmem:[#allocation24_spill] sm:$0xff] }
 0x2da   : > { %10471 = vmatprep.subr.bf16.mxu0 %v10470_v61  ;;  %v13201_v56 = vld [vmem:[#allocation44_spill] sm:$0xff] }
 0x2dc   : > { %9186 = vmatmul.mubr.f32.gmra.mrb[42].mxu0 %v11937_v21  ;;  %v3233_v21 = vld [vmem:[#allocation5 + $0x330] sm:$0xff] }
 0x2dd   : > { %9188 = vmatprep.mubr.f32.mxu0 %v11946_v24  ;;  %10473 = vmatpush3.bf16.msra.mxu0 %v10470_v61  ;;  %v13182_v24 = vld [vmem:[#allocation25_spill] sm:$0xff]  ;;  %v13204_v61 = vld [vmem:[#allocation47_spill] sm:$0xff] }
 0x2de   : > { %10475 = vmatprep.subr.bf16.mxu0 %v10474_v3 }
 0x2e0   : > { %9189 = vmatmul.mubr.f32.gmra.mrb[44].mxu0 %v11955_v27  ;;  %v13183_v27 = vld [vmem:[#allocation26_spill] sm:$0xff] }
 0x2e1   : > { %9191 = vmatprep.mubr.f32.mxu0 %v11964_v30  ;;  %10477 = vmatpush3.bf16.msra.mxu0 %v10474_v3  ;;  %v12252_v3 = vld [vmem:[#allocation2 + $0x18a] sm:$0xff] }
 0x2e2   : > { %10479 = vmatprep.subr.bf16.mxu0 %v10478_v9 }
 0x2e4   : > { %9192 = vmatmul.mubr.f32.gmra.mrb[46].mxu0 %v11970_v32  ;;  %v3235_v32 = vld [vmem:[#allocation5 + $0x340] sm:$0xff] }
 0x2e5   : > { %9194 = vmatprep.mubr.f32.mxu0 %v11847_v55  ;;  %10481 = vmatpush3.bf16.msra.mxu0 %v10478_v9  ;;  %v13176_v55 = vld [vmem:[#allocation11_spill] sm:$0xff] }
 0x2e6   : > { %10483 = vmatprep.subr.bf16.mxu0 %v10482_v15  ;;  %v3162_v9 = vld [vmem:[#allocation2 + $0x30] sm:$0xff] }
 0x2e8   : > { %9195 = vmatmul.mubr.f32.gmra.mrb[48].mxu0 %v11853_v57  ;;  %v13177_v57 = vld [vmem:[#allocation12_spill] sm:$0xff] }
 0x2e9   : > { %9197 = vmatprep.mubr.f32.mxu0 %v11862_v60  ;;  %v13178_v60 = vld [vmem:[#allocation21_spill] sm:$0xff] }
 0x2ec   : > { %9198 = vmatmul.mubr.f32.gmra.mrb[50].mxu0 %v11871_v63  ;;  %v3229_v63 = vld [vmem:[#allocation5 + $0x310] sm:$0xff] }
 0x2ed   : > { %9200 = vmatprep.mubr.f32.mxu0 %v11880_v2  ;;  %v3230_v2 = vld [vmem:[#allocation5 + $0x318] sm:$0xff] }
 0x2f0   : > { %9201 = vmatmul.mubr.f32.gmra.mrb[52].mxu0 %v11889_v5  ;;  %v13179_v5 = vld [vmem:[#allocation22_spill] sm:$0xff] }
 0x2f1   : > { %9203 = vmatprep.mubr.f32.mxu0 %v11898_v8  ;;  %v10486_v8 = vpack.c.bf16 %v3230_v2, %v3229_v63  ;;  %v3165_v63 = vld [vmem:[#allocation2 + $0x50] sm:$0xff]  ;;  %v3603_v2 = vld [vmem:[#allocation5 + $0x3b0] sm:$0xff] }
 0x2f4   : > { %9204 = vmatmul.mubr.f32.gmra.mrb[54].mxu0 %v11907_v11  ;;  %v3231_v11 = vld [vmem:[#allocation5 + $0x320] sm:$0xff] }
 0x2f5   : > { %9206 = vmatprep.mubr.f32.mxu0 %v11916_v14  ;;  %v3232_v14 = vld [vmem:[#allocation5 + $0x328] sm:$0xff] }
 0x2f8   : > { %9207 = vmatmul.mubr.f32.gmra.mrb[56].mxu0 %v11925_v17  ;;  %v13180_v17 = vld [vmem:[#allocation23_spill] sm:$0xff] }
 0x2f9   : > { %9209 = vmatprep.mubr.f32.mxu0 %v11934_v20  ;;  %v10490_v20 = vpack.c.bf16 %v3232_v14, %v3231_v11  ;;  %v3167_v14 = vld [vmem:[#allocation2 + $0x68] sm:$0xff] }
 0x2fc   : > { %9210 = vmatmul.mubr.f32.gmra.mrb[58].mxu0 %v11943_v23  ;;  %v3234_v23 = vld [vmem:[#allocation5 + $0x338] sm:$0xff] }
 0x2fd   : > { %9212 = vmatprep.mubr.f32.mxu0 %v13176_v55  ;;  %v10494_v30 = vpack.c.bf16 %v3234_v23, %v3233_v21  ;;  %v3602_v55 = vld [vmem:[#allocation5 + $0x3a8] sm:$0xff]  ;;  %v3169_v23 = vld [vmem:[#allocation2 + $0x80] sm:$0xff] }
 0x300   : > { %9213 = vmatmul.mubr.f32.gmra.mrb[60].mxu0 %v13177_v57  ;;  %v3164_v57 = vld [vmem:[#allocation2 + $0x48] sm:$0xff] }
 0x301   : > { %9215 = vmatprep.mubr.f32.mxu0 %v13178_v60 }
 0x304   : > { %9216 = vmatmul.mubr.f32.gmra.mrb[62].mxu0 %v13179_v5  ;;  %v3604_v5 = vld [vmem:[#allocation5 + $0x3b8] sm:$0xff] }
 0x305   : > { %9250 = vmatprep.mubr.f32.mxu0 %v12061_v49  ;;  %v3236_v49 = vld [vmem:[#allocation5 + $0x348] sm:$0xff]  ;;  %v10526_v11 = vpack.c.bf16 %v3604_v5, %v3603_v2  ;;  %v3973_v5 = vld [vmem:[#allocation5 + $0x430] sm:$0xff] }
 0x306   : > { %v10498_v13 = vpack.c.bf16 %v3236_v49, %v3235_v32  ;;  %v3171_v49 = vld [vmem:[#allocation2 + $0x98] sm:$0xff] }
 0x307   : > { %v4476_v2 = vld [vmem:[#allocation7 + $0x28] sm:$0xff] }
 0x308   : > { %9251 = vmatmul.mubr.f32.vlgmr.msra.gmra.mrb[32].mxu0 %v13180_v17  ;;  %v3605_v17 = vld [vmem:[#allocation5 + $0x3c0] sm:$0xff] }
 0x309   : > { %10485 = vmatpush3.bf16.msra.mxu0 %v10482_v15  ;;  %9253 = vmatprep.mubr.f32.mxu0 %v13181_v18  ;;  %v3601_v15 = vld [vmem:[#allocation5 + $0x3a0] sm:$0xff]  ;;  %v3606_v18 = vld [vmem:[#allocation5 + $0x3c8] sm:$0xff] }
 0x30a   : > { %10487 = vmatprep.subr.bf16.mxu0 %v10486_v8  ;;  %v10522_v60 = vpack.c.bf16 %v3602_v55, %v3601_v15  ;;  %v10530_v21 = vpack.c.bf16 %v3606_v18, %v3605_v17  ;;  %v3534_v15 = vld [vmem:[#allocation2 + $0x49] sm:$0xff]  ;;  %v12272_v55 = vpack.c.bf16 %v4474_v4, %v4473_v6  ;;  %v3552_v4 = vld [vmem:[#allocation2 + $0x121] sm:$0xff] }
 0x30b   : > { %v3537_v18 = vld [vmem:[#allocation2 + $0x69] sm:$0xff] }
 0x30c   : > { %9254 = vmatmul.mubr.f32.gmra.mrb[34].mxu0 %v13182_v24  ;;  %v3607_v24 = vld [vmem:[#allocation5 + $0x3d0] sm:$0xff]  ;;  %v553_v6 = vld [vmem:[%s13039_s6 + $0x50] sm:$0xff] }
 0x30d   : > { %9256 = vmatprep.mubr.f32.mxu0 %v13183_v27  ;;  %10489 = vmatpush3.bf16.msra.mxu0 %v10486_v8  ;;  %v3166_v8 = vld [vmem:[#allocation2 + $0x60] sm:$0xff]  ;;  %v3608_v27 = vld [vmem:[#allocation5 + $0x3d8] sm:$0xff] }
 0x30e   : > { %10491 = vmatprep.subr.bf16.mxu0 %v10490_v20  ;;  %v10534_v32 = vpack.c.bf16 %v3608_v27, %v3607_v24  ;;  %v3975_v24 = vld [vmem:[#allocation5 + $0x440] sm:$0xff]  ;;  %v3976_v27 = vld [vmem:[#allocation5 + $0x448] sm:$0xff] }
 0x310   : > { %9257 = vmatmul.mubr.f32.gmra.mrb[36].mxu0 %v13184_v47  ;;  %v3609_v47 = vld [vmem:[#allocation5 + $0x3e0] sm:$0xff] }
 0x311   : > { %9259 = vmatprep.mubr.f32.mxu0 %v13185_v10  ;;  %10493 = vmatpush3.bf16.msra.mxu0 %v10490_v20  ;;  %v3168_v20 = vld [vmem:[#allocation2 + $0x78] sm:$0xff] }
 0x312   : > { %10495 = vmatprep.subr.bf16.mxu0 %v10494_v30  ;;  %v3610_v10 = vld [vmem:[#allocation5 + $0x3e8] sm:$0xff] }
 0x313   : > { %v10538_v50 = vpack.c.bf16 %v3610_v10, %v3609_v47  ;;  %v3539_v47 = vld [vmem:[#allocation2 + $0x81] sm:$0xff]  ;;  %v10562_v10 = vpack.c.bf16 %v3976_v27, %v3975_v24  ;;  %v3907_v24 = vld [vmem:[#allocation2 + $0x6a] sm:$0xff] }
 0x314   : > { %9260 = vmatmul.mubr.f32.gmra.mrb[38].mxu0 %v13186_v19  ;;  %v3611_v19 = vld [vmem:[#allocation5 + $0x3f0] sm:$0xff] }
 0x315   : > { %9262 = vmatprep.mubr.f32.mxu0 %v13187_v52  ;;  %10497 = vmatpush3.bf16.msra.mxu0 %v10494_v30  ;;  %v3170_v30 = vld [vmem:[#allocation2 + $0x90] sm:$0xff]  ;;  %v3612_v52 = vld [vmem:[#allocation5 + $0x3f8] sm:$0xff]  ;;  %v3908_v27 = vld [vmem:[#allocation2 + $0x7a] sm:$0xff] }
 0x316   : > { %10499 = vmatprep.subr.bf16.mxu0 %v10498_v13  ;;  %v10542_v25 = vpack.c.bf16 %v3612_v52, %v3611_v19  ;;  %v3978_v19 = vld [vmem:[#allocation5 + $0x458] sm:$0xff]  ;;  %v547_v52 = vld [vmem:[%s13039_s6 + $0x20] sm:$0xff] }
 0x318   : > { %9263 = vmatmul.mubr.f32.gmra.mrb[40].mxu0 %v12088_v42  ;;  %v10514_v42 = vpack.c.bf16 %v3598_v40, %v3597_v38  ;;  %v3178_v38 = vld [vmem:[#allocation2 + $0xf0] sm:$0xff]  ;;  %v3179_v40 = vld [vmem:[#allocation2 + $0xf8] sm:$0xff] }
 0x319   : > { %9265 = vmatprep.mubr.f32.mxu0 %v12091_v29  ;;  %10501 = vmatpush3.bf16.msra.mxu0 %v10498_v13  ;;  %v13191_v29 = vld [vmem:[#allocation34_spill] sm:$0xff] }
 0x31a   : > { %10503 = vmatprep.subr.bf16.mxu0 %v10502_v22  ;;  %v3172_v13 = vld [vmem:[#allocation2 + $0xa8] sm:$0xff] }
 0x31c   : > { %9266 = vmatmul.mubr.f32.gmra.mrb[42].mxu0 %v12094_v44  ;;  %v13193_v44 = vld [vmem:[#allocation36_spill] sm:$0xff] }
 0x31d   : > { %9268 = vmatprep.mubr.f32.mxu0 %v13188_v35  ;;  %10505 = vmatpush3.bf16.msra.mxu0 %v10502_v22  ;;  %v3174_v22 = vld [vmem:[#allocation2 + $0xc0] sm:$0xff] }
 0x31e   : > { %10507 = vmatprep.subr.bf16.mxu0 %v10506_v31 }
 0x320   : > { %9269 = vmatmul.mubr.f32.gmra.mrb[44].mxu0 %v13189_v41  ;;  %v3180_v41 = vld [vmem:[#allocation2 + $0x108] sm:$0xff] }
 0x321   : > { %9271 = vmatprep.mubr.f32.mxu0 %v13190_v26  ;;  %10509 = vmatpush3.bf16.msra.mxu0 %v10506_v31  ;;  %v3967_v31 = vld [vmem:[#allocation5 + $0x400] sm:$0xff] }
 0x322   : > { %10511 = vmatprep.subr.bf16.mxu0 %v10510_v36  ;;  %v10546_v35 = vpack.c.bf16 %v3968_v33, %v3967_v31  ;;  %v3181_v26 = vld [vmem:[#allocation2 + $0x110] sm:$0xff]  ;;  %v4481_v33 = vld [vmem:[#allocation7 + $0x50] sm:$0xff] }
 0x324   : > { %9272 = vmatmul.mubr.f32.gmra.mrb[46].mxu0 %v13191_v29  ;;  %v3183_v29 = vld [vmem:[#allocation2 + $0x128] sm:$0xff] }
 0x325   : > { %9274 = vmatprep.mubr.f32.mxu0 %v13192_v53  ;;  %10513 = vmatpush3.bf16.msra.mxu0 %v10510_v36  ;;  %v3177_v36 = vld [vmem:[#allocation2 + $0xe0] sm:$0xff]  ;;  %v3184_v53 = vld [vmem:[#allocation2 + $0x138] sm:$0xff] }
 0x326   : > { %10515 = vmatprep.subr.bf16.mxu0 %v10514_v42 }
 0x328   : > { %9275 = vmatmul.mubr.f32.gmra.mrb[48].mxu0 %v13193_v44  ;;  %v3185_v44 = vld [vmem:[#allocation2 + $0x140] sm:$0xff] }
 0x329   : > { %9277 = vmatprep.mubr.f32.mxu0 %v13194_v48  ;;  %v3186_v48 = vld [vmem:[#allocation2 + $0x150] sm:$0xff] }
 0x32c   : > { %9278 = vmatmul.mubr.f32.gmra.mrb[50].mxu0 %v13195_v51  ;;  %v3187_v51 = vld [vmem:[#allocation2 + $0x158] sm:$0xff] }
 0x32d   : > { %9280 = vmatprep.mubr.f32.mxu0 %v13196_v43  ;;  %v3188_v43 = vld [vmem:[#allocation2 + $0x168] sm:$0xff] }
 0x330   : > { %9281 = vmatmul.mubr.f32.gmra.mrb[52].mxu0 %v13197_v59  ;;  %v3189_v59 = vld [vmem:[#allocation2 + $0x170] sm:$0xff] }
 0x331   : > { %9283 = vmatprep.mubr.f32.mxu0 %v13198_v45  ;;  %v12257_v45 = vld [vmem:[#allocation2] sm:$0xff] }
 0x334   : > { %9284 = vmatmul.mubr.f32.gmra.mrb[54].mxu0 %v13199_v54  ;;  %v3532_v54 = vld [vmem:[#allocation2 + $0x31] sm:$0xff] }
 0x335   : > { %9286 = vmatprep.mubr.f32.mxu0 %v13200_v62  ;;  %v3969_v62 = vld [vmem:[#allocation5 + $0x410] sm:$0xff] }
 0x338   : > { %9287 = vmatmul.mubr.f32.gmra.mrb[56].mxu0 %v13201_v56  ;;  %v3970_v56 = vld [vmem:[#allocation5 + $0x418] sm:$0xff] }
 0x339   : > { %9289 = vmatprep.mubr.f32.mxu0 %v13202_v58  ;;  %v543_v58 = vld [vmem:[%s13039_s6] sm:$0xff] }
 0x33a   : > { %624 = vmatmul.mubr.f32.vlgmr.msra.gmra.mrb[0].mxu1 %v543_v58  ;;  %v3548_v58 = vld [vmem:[#allocation2 + $0xf1] sm:$0xff] }
 0x33b   : > { %629 = vmatprep.mubr.f32.mxu1 %v12257_v45 }
 0x33c   : > { %9290 = vmatmul.mubr.f32.gmra.mrb[58].mxu0 %v13203_v1  ;;  %v4471_v1 = vld [vmem:[#allocation7] sm:$0xff] }
 0x33d   : > { %9292 = vmatprep.mubr.f32.mxu0 %v13204_v61  ;;  %v4472_v61 = vld [vmem:[#allocation7 + $0x8] sm:$0xff] }
 0x340   : > { %9293 = vmatmul.mubr.f32.gmra.mrb[60].mxu0 %v13205_v0  ;;  %v10550_v0 = vpack.c.bf16 %v3970_v56, %v3969_v62  ;;  %v3547_v62 = vld [vmem:[#allocation2 + $0xe1] sm:$0xff] }
 0x341   : > { %9295 = vmatprep.mubr.f32.mxu0 %v12249_v46  ;;  %v551_v56 = vld [vmem:[%s13039_s6 + $0x40] sm:$0xff] }
 0x344   : > { %9296 = vmatmul.mubr.f32.gmra.mrb[62].mxu0 %v12252_v3 }
 0x345   : > { %9330 = vmatprep.mubr.f32.mxu0 %v3162_v9  ;;  %v3971_v9 = vld [vmem:[#allocation5 + $0x420] sm:$0xff] }
 0x348   : > { %9331 = vmatmul.mubr.f32.vlgmr.msra.gmra.mrb[32].mxu0 %v3163_v7  ;;  %v544_v7 = vld [vmem:[%s13039_s6 + $0x8] sm:$0xff] }
 0x349   : > { %10517 = vmatpush3.bf16.msra.mxu0 %v10514_v42  ;;  %9333 = vmatprep.mubr.f32.mxu0 %v3164_v57  ;;  %v3182_v42 = vld [vmem:[#allocation2 + $0x120] sm:$0xff]  ;;  %v3535_v57 = vld [vmem:[#allocation2 + $0x51] sm:$0xff] }
 0x34a   : > { %10519 = vmatprep.subr.bf16.mxu0 %v10518_v12  ;;  %630 = vmatmul.mubr.f32.gmra.mrb[2].mxu1 %v544_v7  ;;  %v3555_v7 = vld [vmem:[#allocation2 + $0x141] sm:$0xff] }
 0x34b   : > { %635 = vmatprep.mubr.f32.mxu1 %v12257_v45 }
 0x34c   : > { %9334 = vmatmul.mubr.f32.gmra.mrb[34].mxu0 %v3165_v63  ;;  %v4475_v63 = vld [vmem:[#allocation7 + $0x20] sm:$0xff] }
 0x34d   : > { %9336 = vmatprep.mubr.f32.mxu0 %v3166_v8  ;;  %10521 = vmatpush3.bf16.msra.mxu0 %v10518_v12  ;;  %v3972_v12 = vld [vmem:[#allocation5 + $0x428] sm:$0xff]  ;;  %v3974_v8 = vld [vmem:[#allocation5 + $0x438] sm:$0xff]  ;;  %v12280_v17 = vpack.c.bf16 %v4476_v2, %v4475_v63 }
 0x34e   : > { %10523 = vmatprep.subr.bf16.mxu0 %v10522_v60  ;;  %v3559_v63 = vld [vmem:[#allocation2 + $0x171] sm:$0xff]  ;;  %v11492_v2 = vld [vmem:[#allocation2 + $0x181] sm:$0xff] }
 0x350   : > { %9337 = vmatmul.mubr.f32.gmra.mrb[36].mxu0 %v3167_v14  ;;  %v3536_v14 = vld [vmem:[#allocation2 + $0x61] sm:$0xff] }
 0x351   : > { %9339 = vmatprep.mubr.f32.mxu0 %v3168_v20  ;;  %10525 = vmatpush3.bf16.msra.mxu0 %v10522_v60  ;;  %v10554_v60 = vpack.c.bf16 %v3972_v12, %v3971_v9  ;;  %v10558_v20 = vpack.c.bf16 %v3974_v8, %v3973_v5  ;;  %v3553_v9 = vld [vmem:[#allocation2 + $0x129] sm:$0xff]  ;;  %v3554_v12 = vld [vmem:[#allocation2 + $0x139] sm:$0xff] }
 0x352   : > { %10527 = vmatprep.subr.bf16.mxu0 %v10526_v11  ;;  %v3562_v5 = vld [vmem:[#allocation2 + $0x199] sm:$0xff]  ;;  %v11493_v8 = vld [vmem:[#allocation2 + $0x189] sm:$0xff] }
 0x354   : > { %9340 = vmatmul.mubr.f32.gmra.mrb[38].mxu0 %v3169_v23  ;;  %v4478_v23 = vld [vmem:[#allocation7 + $0x38] sm:$0xff] }
 0x355   : > { %9342 = vmatprep.mubr.f32.mxu0 %v3170_v30  ;;  %10529 = vmatpush3.bf16.msra.mxu0 %v10526_v11  ;;  %v545_v11 = vld [vmem:[%s13039_s6 + $0x10] sm:$0xff]  ;;  %v546_v30 = vld [vmem:[%s13039_s6 + $0x18] sm:$0xff] }
 0x356   : > { %10531 = vmatprep.subr.bf16.mxu0 %v10530_v21  ;;  %636 = vmatmul.mubr.f32.gmra.mrb[4].mxu1 %v545_v11  ;;  %v3563_v11 = vld [vmem:[#allocation2 + $0x1a1] sm:$0xff] }
 0x357   : > { %641 = vmatprep.mubr.f32.mxu1 %v12257_v45 }
 0x358   : > { %9343 = vmatmul.mubr.f32.gmra.mrb[40].mxu0 %v3171_v49 }
 0x359   : > { %9345 = vmatprep.mubr.f32.mxu0 %v3172_v13  ;;  %10533 = vmatpush3.bf16.msra.mxu0 %v10530_v21  ;;  %v4477_v21 = vld [vmem:[#allocation7 + $0x30] sm:$0xff]  ;;  %v4479_v13 = vld [vmem:[#allocation7 + $0x40] sm:$0xff] }
 0x35a   : > { %10535 = vmatprep.subr.bf16.mxu0 %v10534_v32  ;;  %v12288_v49 = vpack.c.bf16 %v4478_v23, %v4477_v21  ;;  %642 = vmatmul.mubr.f32.gmra.mrb[6].mxu1 %v546_v30  ;;  %v3905_v21 = vld [vmem:[#allocation2 + $0x52] sm:$0xff]  ;;  %v3906_v23 = vld [vmem:[#allocation2 + $0x62] sm:$0xff] }
 0x35b   : > { %647 = vmatprep.mubr.f32.mxu1 %v12257_v45  ;;  %v3909_v30 = vld [vmem:[#allocation2 + $0x82] sm:$0xff] }
 0x35c   : > { %9346 = vmatmul.mubr.f32.gmra.mrb[42].mxu0 %v3173_v16  ;;  %v3977_v16 = vld [vmem:[#allocation5 + $0x450] sm:$0xff] }
 0x35d   : > { %9348 = vmatprep.mubr.f32.mxu0 %v3174_v22  ;;  %10537 = vmatpush3.bf16.msra.mxu0 %v10534_v32  ;;  %v3538_v32 = vld [vmem:[#allocation2 + $0x79] sm:$0xff]  ;;  %v3540_v22 = vld [vmem:[#allocation2 + $0x91] sm:$0xff]  ;;  %v10566_v31 = vpack.c.bf16 %v3978_v19, %v3977_v16 }
 0x35e   : > { %10539 = vmatprep.subr.bf16.mxu0 %v10538_v50  ;;  %648 = vmatmul.mubr.f32.gmra.mrb[8].mxu1 %v547_v52  ;;  %v3919_v16 = vld [vmem:[#allocation2 + $0xfa] sm:$0xff]  ;;  %v3920_v19 = vld [vmem:[#allocation2 + $0x10a] sm:$0xff]  ;;  %v3921_v52 = vld [vmem:[#allocation2 + $0x112] sm:$0xff] }
 0x35f   : > { %653 = vmatprep.mubr.f32.mxu1 %v12257_v45 }
 0x360   : > { %9349 = vmatmul.mubr.f32.gmra.mrb[44].mxu0 %v3175_v28  ;;  %v3541_v28 = vld [vmem:[#allocation2 + $0x99] sm:$0xff] }
 0x361   : > { %9351 = vmatprep.mubr.f32.mxu0 %v3176_v34  ;;  %10541 = vmatpush3.bf16.msra.mxu0 %v10538_v50  ;;  %v4480_v50 = vld [vmem:[#allocation7 + $0x48] sm:$0xff]  ;;  %v4482_v34 = vld [vmem:[#allocation7 + $0x58] sm:$0xff] }
 0x362   : > { %10543 = vmatprep.subr.bf16.mxu0 %v10542_v25 }
 0x364   : > { %9352 = vmatmul.mubr.f32.gmra.mrb[46].mxu0 %v3177_v36  ;;  %v3980_v36 = vld [vmem:[#allocation5 + $0x468] sm:$0xff] }
 0x365   : > { %9354 = vmatprep.mubr.f32.mxu0 %v3178_v38  ;;  %10545 = vmatpush3.bf16.msra.mxu0 %v10542_v25  ;;  %v12296_v25 = vpack.c.bf16 %v4480_v50, %v4479_v13  ;;  %v548_v38 = vld [vmem:[%s13039_s6 + $0x28] sm:$0xff]  ;;  %v3916_v13 = vld [vmem:[#allocation2 + $0xda] sm:$0xff]  ;;  %v3918_v50 = vld [vmem:[#allocation2 + $0xf2] sm:$0xff] }
 0x366   : > { %10547 = vmatprep.subr.bf16.mxu0 %v10546_v35  ;;  %654 = vmatmul.mubr.f32.gmra.mrb[10].mxu1 %v548_v38  ;;  %v3932_v38 = vld [vmem:[#allocation2 + $0x19a] sm:$0xff] }
 0x367   : > { %659 = vmatprep.mubr.f32.mxu1 %v12257_v45 }
 0x368   : > { %9355 = vmatmul.mubr.f32.gmra.mrb[48].mxu0 %v3179_v40  ;;  %v3542_v40 = vld [vmem:[#allocation2 + $0xa9] sm:$0xff] }
 0x369   : > { %9357 = vmatprep.mubr.f32.mxu0 %v3180_v41  ;;  %v12304_v41 = vpack.c.bf16 %v4482_v34, %v4481_v33  ;;  %v3926_v33 = vld [vmem:[#allocation2 + $0x152] sm:$0xff]  ;;  %v3927_v34 = vld [vmem:[#allocation2 + $0x15a] sm:$0xff] }
 0x36c   : > { %9358 = vmatmul.mubr.f32.gmra.mrb[50].mxu0 %v3181_v26  ;;  %v3543_v26 = vld [vmem:[#allocation2 + $0xb1] sm:$0xff] }
 0x36d   : > { %9360 = vmatprep.mubr.f32.mxu0 %v3182_v42 }
 0x370   : > { %9361 = vmatmul.mubr.f32.gmra.mrb[52].mxu0 %v3183_v29  ;;  %v3981_v29 = vld [vmem:[#allocation5 + $0x470] sm:$0xff] }
 0x371   : > { %9363 = vmatprep.mubr.f32.mxu0 %v3184_v53  ;;  %v3982_v53 = vld [vmem:[#allocation5 + $0x478] sm:$0xff] }
 0x374   : > { %9364 = vmatmul.mubr.f32.gmra.mrb[54].mxu0 %v3185_v44  ;;  %v549_v44 = vld [vmem:[%s13039_s6 + $0x30] sm:$0xff] }
 0x375   : > { %9366 = vmatprep.mubr.f32.mxu0 %v3186_v48  ;;  %v3544_v48 = vld [vmem:[#allocation2 + $0xc1] sm:$0xff]  ;;  %660 = vmatmul.mubr.f32.gmra.mrb[12].mxu1 %v549_v44 }
 0x376   : > { %665 = vmatprep.mubr.f32.mxu1 %v12257_v45 }
 0x378   : > { %9367 = vmatmul.mubr.f32.gmra.mrb[56].mxu0 %v3187_v51  ;;  %v10574_v51 = vpack.c.bf16 %v3982_v53, %v3981_v29  ;;  %v555_v53 = vld [vmem:[%s13039_s6 + $0x60] sm:$0xff] }
 0x379   : > { %9369 = vmatprep.mubr.f32.mxu0 %v3188_v43  ;;  %v3545_v43 = vld [vmem:[#allocation2 + $0xc9] sm:$0xff] }
 0x37c   : > { %9370 = vmatmul.mubr.f32.gmra.mrb[58].mxu0 %v3189_v59  ;;  %v550_v59 = vld [vmem:[%s13039_s6 + $0x38] sm:$0xff] }
 0x37d   : > { %9372 = vmatprep.mubr.f32.mxu0 %v12180_v37  ;;  %v12264_v37 = vpack.c.bf16 %v4472_v61, %v4471_v1  ;;  %666 = vmatmul.mubr.f32.gmra.mrb[14].mxu1 %v550_v59  ;;  %v3549_v1 = vld [vmem:[#allocation2 + $0xf9] sm:$0xff]  ;;  %v552_v61 = vld [vmem:[%s13039_s6 + $0x48] sm:$0xff]  ;;  %v4841_v59 = vld [vmem:[#allocation7 + $0x80] sm:$0xff] }
 0x37e   : > { %671 = vmatprep.mubr.f32.mxu1 %v12257_v45 }
 0x37f   : > { %10866 = vmatprep.subr.bf16.mxu1 %v12264_v37 }
 0x380   : > { %9373 = vmatmul.mubr.f32.gmra.mrb[60].mxu0 %v12184_v39  ;;  %v3533_v39 = vld [vmem:[#allocation2 + $0x39] sm:$0xff]  ;;  %10874 = vmatpush3.bf16.msra.mxu1 %v12264_v37 }
 0x381   : > { %9375 = vmatprep.mubr.f32.mxu0 %v12257_v45  ;;  %10867 = vmatprep.subr.bf16.mxu1 %v12272_v55 }
 0x382   : > { %672 = vmatmul.mubr.f32.gmra.mrb[16].mxu1 %v551_v56  ;;  %v12370_v56 = vld [vmem:[%s13037_s4] ss:$0 sm:$0xff] }
 0x383   : > { %677 = vmatprep.mubr.f32.mxu1 %v12257_v45 }
 0x384   : > { %9376 = vmatmul.mubr.f32.gmra.mrb[62].mxu0 %v12257_v45  ;;  %10875 = vmatpush3.bf16.msra.mxu1 %v12272_v55 }
 0x385   : > { %9410 = vmatprep.mubr.f32.mxu0 %v3532_v54  ;;  %10868 = vmatprep.subr.bf16.mxu1 %v12280_v17  ;;  %v3546_v54 = vld [vmem:[#allocation2 + $0xd9] sm:$0xff] }
 0x386   : > { %678 = vmatmul.mubr.f32.gmra.mrb[18].mxu1 %v552_v61 }
 0x387   : > { %683 = vmatprep.mubr.f32.mxu1 %v12257_v45 }
 0x388   : > { %9411 = vmatmul.mubr.f32.vlgmr.msra.gmra.mrb[32].mxu0 %v3533_v39  ;;  %10876 = vmatpush3.bf16.msra.mxu1 %v12280_v17  ;;  %v3550_v39 = vld [vmem:[#allocation2 + $0x109] sm:$0xff] }
 0x389   : > { %10549 = vmatpush3.bf16.msra.mxu0 %v10546_v35  ;;  %9413 = vmatprep.mubr.f32.mxu0 %v3534_v15  ;;  %v3979_v35 = vld [vmem:[#allocation5 + $0x460] sm:$0xff] }
 0x38a   : > { %10551 = vmatprep.subr.bf16.mxu0 %v10550_v0  ;;  %10869 = vmatprep.subr.bf16.mxu1 %v12288_v49  ;;  %v10570_v42 = vpack.c.bf16 %v3980_v36, %v3979_v35  ;;  %v3556_v15 = vld [vmem:[#allocation2 + $0x151] sm:$0xff] }
 0x38b   : > { %684 = vmatmul.mubr.f32.gmra.mrb[20].mxu1 %v553_v6  ;;  %v3928_v35 = vld [vmem:[#allocation2 + $0x16a] sm:$0xff]  ;;  %v3929_v36 = vld [vmem:[#allocation2 + $0x172] sm:$0xff] }
 0x38c   : > { %9414 = vmatmul.mubr.f32.gmra.mrb[34].mxu0 %v3535_v57  ;;  %10877 = vmatpush3.bf16.msra.mxu1 %v12288_v49  ;;  %v3557_v57 = vld [vmem:[#allocation2 + $0x159] sm:$0xff] }
 0x38d   : > { %9416 = vmatprep.mubr.f32.mxu0 %v3536_v14  ;;  %10553 = vmatpush3.bf16.msra.mxu0 %v10550_v0  ;;  %v3551_v0 = vld [vmem:[#allocation2 + $0x111] sm:$0xff] }
 0x38e   : > { %10555 = vmatprep.subr.bf16.mxu0 %v10554_v60  ;;  %10870 = vmatprep.subr.bf16.mxu1 %v12296_v25  ;;  %v3902_v14 = vld [vmem:[#allocation2 + $0x32] sm:$0xff] }
 0x38f   : > { %689 = vmatprep.mubr.f32.mxu1 %v12257_v45 }
 0x390   : > { %9417 = vmatmul.mubr.f32.gmra.mrb[36].mxu0 %v3537_v18  ;;  %10878 = vmatpush3.bf16.msra.mxu1 %v12296_v25  ;;  %v3903_v18 = vld [vmem:[#allocation2 + $0x3a] sm:$0xff] }
 0x391   : > { %9419 = vmatprep.mubr.f32.mxu0 %v3538_v32  ;;  %10557 = vmatpush3.bf16.msra.mxu0 %v10554_v60  ;;  %v3558_v60 = vld [vmem:[#allocation2 + $0x169] sm:$0xff]  ;;  %v3911_v32 = vld [vmem:[#allocation2 + $0x9a] sm:$0xff] }
 0x392   : > { %10559 = vmatprep.subr.bf16.mxu0 %v10558_v20  ;;  %10871 = vmatprep.subr.bf16.mxu1 %v12304_v41 }
 0x394   : > { %9420 = vmatmul.mubr.f32.gmra.mrb[38].mxu0 %v3539_v47  ;;  %10879 = vmatpush3.bf16.msra.mxu1 %v12304_v41  ;;  %v3913_v47 = vld [vmem:[#allocation2 + $0xb2] sm:$0xff] }
 0x395   : > { %9422 = vmatprep.mubr.f32.mxu0 %v3540_v22  ;;  %10561 = vmatpush3.bf16.msra.mxu0 %v10558_v20  ;;  %v3904_v20 = vld [vmem:[#allocation2 + $0x4a] sm:$0xff]  ;;  %v3922_v22 = vld [vmem:[#allocation2 + $0x122] sm:$0xff] }
 0x396   : > { %10563 = vmatprep.subr.bf16.mxu0 %v10562_v10 }
 0x398   : > { %9423 = vmatmul.mubr.f32.gmra.mrb[40].mxu0 %v3541_v28  ;;  %v3924_v28 = vld [vmem:[#allocation2 + $0x13a] sm:$0xff] }
 0x399   : > { %9425 = vmatprep.mubr.f32.mxu0 %v3542_v40  ;;  %10565 = vmatpush3.bf16.msra.mxu0 %v10562_v10  ;;  %v3915_v10 = vld [vmem:[#allocation2 + $0xca] sm:$0xff]  ;;  %v3933_v40 = vld [vmem:[#allocation2 + $0x1a2] sm:$0xff] }
 0x39a   : > { %10567 = vmatprep.subr.bf16.mxu0 %v10566_v31 }
 0x39c   : > { %9426 = vmatmul.mubr.f32.gmra.mrb[42].mxu0 %v3543_v26  ;;  %v4484_v26 = vld [vmem:[#allocation7 + $0x68] sm:$0xff] }
 0x39d   : > { %9428 = vmatprep.mubr.f32.mxu0 %v3544_v48  ;;  %10569 = vmatpush3.bf16.msra.mxu0 %v10566_v31  ;;  %v3925_v31 = vld [vmem:[#allocation2 + $0x142] sm:$0xff] }
 0x39e   : > { %10571 = vmatprep.subr.bf16.mxu0 %v10570_v42  ;;  %v556_v48 = vld [vmem:[%s13039_s6 + $0x68] sm:$0xff] }
 0x3a0   : > { %9429 = vmatmul.mubr.f32.gmra.mrb[44].mxu0 %v3545_v43  ;;  %v558_v43 = vld [vmem:[%s13039_s6 + $0x78] sm:$0xff] }
 0x3a1   : > { %9431 = vmatprep.mubr.f32.mxu0 %v3546_v54  ;;  %10573 = vmatpush3.bf16.msra.mxu0 %v10570_v42  ;;  %v554_v42 = vld [vmem:[%s13039_s6 + $0x58] sm:$0xff] }
 0x3a2   : > { %10575 = vmatprep.subr.bf16.mxu0 %v10574_v51  ;;  %690 = vmatmul.mubr.f32.gmra.mrb[22].mxu1 %v554_v42  ;;  %v4842_v54 = vld [vmem:[#allocation7 + $0x88] sm:$0xff] }
 0x3a3   : > { %695 = vmatprep.mubr.f32.mxu1 %v12257_v45 }
 0x3a4   : > { %9432 = vmatmul.mubr.f32.gmra.mrb[46].mxu0 %v3547_v62  ;;  %v12364_v62 = vpack.c.bf16 %v4842_v54, %v4841_v59 }
 0x3a5   : > { %9434 = vmatprep.mubr.f32.mxu0 %v3548_v58  ;;  %10577 = vmatpush3.bf16.msra.mxu0 %v10574_v51  ;;  %v557_v51 = vld [vmem:[%s13039_s6 + $0x70] sm:$0xff] }
 0x3a6   : > { %10579 = vmatprep.subr.bf16.mxu0 %v12264_v37  ;;  %696 = vmatmul.mubr.f32.gmra.mrb[24].mxu1 %v555_v53  ;;  %v4848_v53 = vld [vmem:[#allocation7 + $0xb8] sm:$0xff] }
 0x3a7   : > { %701 = vmatprep.mubr.f32.mxu1 %v12257_v45 }
 0x3a8   : > { %9435 = vmatmul.mubr.f32.gmra.mrb[48].mxu0 %v3549_v1 }
 0x3a9   : > { %9437 = vmatprep.mubr.f32.mxu0 %v3550_v39 }
 0x3aa   : > { %702 = vmatmul.mubr.f32.gmra.mrb[26].mxu1 %v556_v48 }
 0x3ab   : > { %707 = vmatprep.mubr.f32.mxu1 %v12257_v45 }
 0x3ac   : > { %9438 = vmatmul.mubr.f32.gmra.mrb[50].mxu0 %v3551_v0 }
 0x3ad   : > { %9440 = vmatprep.mubr.f32.mxu0 %v3552_v4 }
 0x3ae   : > { %708 = vmatmul.mubr.f32.gmra.mrb[28].mxu1 %v557_v51 }
 0x3af   : > { %713 = vmatprep.mubr.f32.mxu1 %v12257_v45 }
 0x3b0   : > { %9441 = vmatmul.mubr.f32.gmra.mrb[52].mxu0 %v3553_v9 }
 0x3b1   : > { %9443 = vmatprep.mubr.f32.mxu0 %v3554_v12 }
 0x3b2   : > { %714 = vmatmul.mubr.f32.gmra.mrb[30].mxu1 %v558_v43 }
 0x3b4   : > { %9444 = vmatmul.mubr.f32.gmra.mrb[54].mxu0 %v3555_v7 }
 0x3b5   : > { %9446 = vmatprep.mubr.f32.mxu0 %v3556_v15 }
 0x3b8   : > { %9447 = vmatmul.mubr.f32.gmra.mrb[56].mxu0 %v3557_v57 }
 0x3b9   : > { %9449 = vmatprep.mubr.f32.mxu0 %v3558_v60 }
 0x3bc   : > { %9450 = vmatmul.mubr.f32.gmra.mrb[58].mxu0 %v3559_v63 }
 0x3bd   : > { %9452 = vmatprep.mubr.f32.mxu0 %v11492_v2 }
 0x3c0   : > { %9453 = vmatmul.mubr.f32.gmra.mrb[60].mxu0 %v11493_v8 }
 0x3c1   : > { %9455 = vmatprep.mubr.f32.mxu0 %v3562_v5 }
 0x3c4   : > { %9456 = vmatmul.mubr.f32.gmra.mrb[62].mxu0 %v3563_v11 }
 0x3c5   : > { %9490 = vmatprep.mubr.f32.mxu0 %v3902_v14 }
 0x3c8   : > { %9491 = vmatmul.mubr.f32.vlgmr.msra.gmra.mrb[32].mxu0 %v3903_v18 }
 0x3c9   : > { %9493 = vmatprep.mubr.f32.mxu0 %v3904_v20  ;;  %10581 = vmatpush3.bf16.msra.mxu0 %v12264_v37  ;;  %v3910_v37 = vld [vmem:[#allocation2 + $0x92] sm:$0xff] }
 0x3ca   : > { %10583 = vmatprep.subr.bf16.mxu0 %v12272_v55 }
 0x3cc   : > { %9494 = vmatmul.mubr.f32.gmra.mrb[34].mxu0 %v3905_v21 }
 0x3cd   : > { %9496 = vmatprep.mubr.f32.mxu0 %v3906_v23  ;;  %10585 = vmatpush3.bf16.msra.mxu0 %v12272_v55  ;;  %v3912_v55 = vld [vmem:[#allocation2 + $0xaa] sm:$0xff] }
 0x3ce   : > { %10587 = vmatprep.subr.bf16.mxu0 %v12280_v17 }
 0x3d0   : > { %9497 = vmatmul.mubr.f32.gmra.mrb[36].mxu0 %v3907_v24 }
 0x3d1   : > { %9499 = vmatprep.mubr.f32.mxu0 %v3908_v27  ;;  %10589 = vmatpush3.bf16.msra.mxu0 %v12280_v17  ;;  %v3914_v17 = vld [vmem:[#allocation2 + $0xc2] sm:$0xff] }
 0x3d2   : > { %10591 = vmatprep.subr.bf16.mxu0 %v12288_v49 }
 0x3d4   : > { %9500 = vmatmul.mubr.f32.gmra.mrb[38].mxu0 %v3909_v30 }
 0x3d5   : > { %9502 = vmatprep.mubr.f32.mxu0 %v3910_v37  ;;  %10593 = vmatpush3.bf16.msra.mxu0 %v12288_v49  ;;  %v3917_v49 = vld [vmem:[#allocation2 + $0xe2] sm:$0xff] }
 0x3d6   : > { %10595 = vmatprep.subr.bf16.mxu0 %v12296_v25 }
 0x3d8   : > { %9503 = vmatmul.mubr.f32.gmra.mrb[40].mxu0 %v3911_v32 }
 0x3d9   : > { %9505 = vmatprep.mubr.f32.mxu0 %v3912_v55  ;;  %10597 = vmatpush3.bf16.msra.mxu0 %v12296_v25  ;;  %v3923_v25 = vld [vmem:[#allocation2 + $0x12a] sm:$0xff] }
 0x3da   : > { %10599 = vmatprep.subr.bf16.mxu0 %v12304_v41 }
 0x3dc   : > { %9506 = vmatmul.mubr.f32.gmra.mrb[42].mxu0 %v3913_v47 }
 0x3dd   : > { %9508 = vmatprep.mubr.f32.mxu0 %v3914_v17  ;;  %10601 = vmatpush3.bf16.msra.mxu0 %v12304_v41  ;;  %v4483_v41 = vld [vmem:[#allocation7 + $0x60] sm:$0xff] }
 0x3de   : > { %v10602_v29 = vpack.c.bf16 %v4484_v26, %v4483_v41 }
 0x3e0   : > { %9509 = vmatmul.mubr.f32.gmra.mrb[44].mxu0 %v3915_v10  ;;  %10603 = vmatprep.subr.bf16.mxu0 %v10602_v29  ;;  %v4843_v10 = vld [vmem:[#allocation7 + $0x90] sm:$0xff] }
 0x3e1   : > { %9511 = vmatprep.mubr.f32.mxu0 %v3916_v13  ;;  %10605 = vmatpush3.bf16.msra.mxu0 %v10602_v29  ;;  %v4844_v13 = vld [vmem:[#allocation7 + $0x98] sm:$0xff] }
 0x3e2   : > { %10872 = vmatprep.subr.bf16.mxu1 %v10602_v29 }
 0x3e3   : > { %10880 = vmatpush3.bf16.msra.mxu1 %v10602_v29 }
 0x3e4   : > { %9512 = vmatmul.mubr.f32.gmra.mrb[46].mxu0 %v3917_v49 }
 0x3e5   : > { %9514 = vmatprep.mubr.f32.mxu0 %v3918_v50 }
 0x3e8   : > { %9515 = vmatmul.mubr.f32.gmra.mrb[48].mxu0 %v3919_v16 }
 0x3e9   : > { %9517 = vmatprep.mubr.f32.mxu0 %v3920_v19 }
 0x3ec   : > { %9518 = vmatmul.mubr.f32.gmra.mrb[50].mxu0 %v3921_v52 }
 0x3ed   : > { %9520 = vmatprep.mubr.f32.mxu0 %v3922_v22 }
 0x3f0   : > { %9521 = vmatmul.mubr.f32.gmra.mrb[52].mxu0 %v3923_v25 }
 0x3f1   : > { %9523 = vmatprep.mubr.f32.mxu0 %v3924_v28  ;;  %v10614_v28 = vpack.c.bf16 %v4844_v13, %v4843_v10 }
 0x3f4   : > { %9524 = vmatmul.mubr.f32.gmra.mrb[54].mxu0 %v3925_v31 }
 0x3f5   : > { %9526 = vmatprep.mubr.f32.mxu0 %v3926_v33  ;;  %v4845_v33 = vld [vmem:[#allocation7 + $0xa0] sm:$0xff] }
 0x3f8   : > { %9527 = vmatmul.mubr.f32.gmra.mrb[56].mxu0 %v3927_v34  ;;  %v4846_v34 = vld [vmem:[#allocation7 + $0xa8] sm:$0xff] }
 0x3f9   : > { %9529 = vmatprep.mubr.f32.mxu0 %v3928_v35  ;;  %v10618_v29 = vpack.c.bf16 %v4846_v34, %v4845_v33 }
 0x3fc   : > { %9530 = vmatmul.mubr.f32.gmra.mrb[58].mxu0 %v3929_v36 }
 0x3fd   : > { %9532 = vmatprep.mubr.f32.mxu0 %v12249_v46  ;;  %v4485_v46 = vld [vmem:[#allocation7 + $0x70] sm:$0xff] }
 0x400   : > { %9533 = vmatmul.mubr.f32.gmra.mrb[60].mxu0 %v12252_v3  ;;  %v4486_v3 = vld [vmem:[#allocation7 + $0x78] sm:$0xff] }
 0x401   : > { %9535 = vmatprep.mubr.f32.mxu0 %v3932_v38  ;;  %v10606_v44 = vpack.c.bf16 %v4486_v3, %v4485_v46  ;;  %v4847_v3 = vld [vmem:[#allocation7 + $0xb0] sm:$0xff] }
 0x403   : > { %10607 = vmatprep.subr.bf16.mxu0 %v10606_v44  ;;  %10873 = vmatprep.subr.bf16.mxu1 %v10606_v44 }
 0x404   : > { %9536 = vmatmul.mubr.f32.gmra.mrb[62].mxu0 %v3933_v40  ;;  %10881 = vmatpush3.bf16.msra.mxu1 %v10606_v44 }
 0x405   : > { %9570 = vmatprep.mubr.f32.mxu0 %v12257_v45  ;;  %10609 = vmatpush3.bf16.msra.mxu0 %v10606_v44 }
 0x406   : > { %10611 = vmatprep.subr.bf16.mxu1 %v12364_v62 }
 0x408   : > { %9571 = vmatmul.mubr.f32.vlgmr.msra.gmra.mrb[64].mxu0 %v12257_v45 }
 0x49b   : > { %v9492_v58 = vpop.f32.mrb[32].mxu0 }
 0x49c   : > { %v12373_v1 = vadd.f32 %v9492_v58, %v12370_v56  ;;  %v4049_v45 = vpop.f32.mrb[33].mxu0  ;;  %v10622_v58 = vpack.c.bf16 %v4848_v53, %v4847_v3 }
 0x49d   : > { %v12376_v61 = vadd.f32 %v12370_v56, %v4049_v45 }
 0x49e   : > { %v13103_v39 = vmax.f32 %v12373_v1, 0.0 }
 0x49f   : > { %v13104_v0 = vmax.f32 %v12376_v61, 0.0  ;;  %v9495_v6 = vpop.f32.mrb[34].mxu0 }
 0x4a0   : > { %4337 = vst [vmem:[#allocation2 + $0x21] sm:$0xff] %v13103_v39  ;;  %v12383_v4 = vadd.f32 %v9495_v6, %v12370_v56  ;;  %v4059_v9 = vpop.f32.mrb[35].mxu0  ;;  %v4849_v6 = vld [vmem:[#allocation7 + $0xc0] sm:$0xff] }
 0x4a1   : > { %4336 = vst [vmem:[#allocation2 + $0x19] sm:$0xff] %v13104_v0  ;;  %v12388_v12 = vadd.f32 %v12370_v56, %v4059_v9  ;;  %v4850_v9 = vld [vmem:[#allocation7 + $0xc8] sm:$0xff] }
 0x4a2   : > { %v13100_v7 = vmax.f32 %v12383_v4, 0.0  ;;  %v10626_v13 = vpack.c.bf16 %v4850_v9, %v4849_v6  ;;  %v4854_v6 = vld [vmem:[#allocation7 + $0xe8] sm:$0xff] }
 0x4a3   : > { %v13102_v15 = vmax.f32 %v12388_v12, 0.0  ;;  %v9498_v57 = vpop.f32.mrb[36].mxu0 }
 0x4a4   : > { %4339 = vst [vmem:[#allocation2 + $0x39] sm:$0xff] %v13100_v7  ;;  %v12395_v60 = vadd.f32 %v9498_v57, %v12370_v56  ;;  %v4069_v63 = vpop.f32.mrb[37].mxu0 }
 0x4a5   : > { %4338 = vst [vmem:[#allocation2 + $0x31] sm:$0xff] %v13102_v15  ;;  %v12400_v2 = vadd.f32 %v12370_v56, %v4069_v63 }
 0x4a6   : > { %v13096_v5 = vmax.f32 %v12395_v60, 0.0 }
 0x4a7   : > { %v13099_v8 = vmax.f32 %v12400_v2, 0.0  ;;  %v9501_v11 = vpop.f32.mrb[38].mxu0 }
 0x4a8   : > { %4341 = vst [vmem:[#allocation2 + $0x51] sm:$0xff] %v13096_v5  ;;  %v12407_v14 = vadd.f32 %v9501_v11, %v12370_v56  ;;  %v4079_v18 = vpop.f32.mrb[39].mxu0  ;;  %v12409_v20 = vld [vmem:[#allocation2 + $0x18] sm:$0xff]  ;;  %v12411_v21 = vld [vmem:[#allocation2 + $0x20] sm:$0xff] }
 0x4a9   : > { %4340 = vst [vmem:[#allocation2 + $0x49] sm:$0xff] %v13099_v8  ;;  %v12416_v23 = vadd.f32 %v12370_v56, %v4079_v18  ;;  %9573 = vmatprep.mubr.f32.mxu0 %v12409_v20 }
 0x4aa   : > { %v13094_v24 = vmax.f32 %v12407_v14, 0.0  ;;  %9574 = vmatmul.mubr.f32.gmra.mrb[66].mxu0 %v12411_v21 }
 0x4ab   : > { %v13095_v27 = vmax.f32 %v12416_v23, 0.0  ;;  %v9504_v30 = vpop.f32.mrb[40].mxu0 }
 0x4ac   : > { %4343 = vst [vmem:[#allocation2 + $0x69] sm:$0xff] %v13094_v24  ;;  %v12425_v37 = vadd.f32 %v9504_v30, %v12370_v56  ;;  %v4089_v32 = vpop.f32.mrb[41].mxu0  ;;  %v12427_v55 = vld [vmem:[#allocation2 + $0x30] sm:$0xff]  ;;  %v12429_v47 = vld [vmem:[#allocation2 + $0x38] sm:$0xff] }
 0x4ad   : > { %4342 = vst [vmem:[#allocation2 + $0x61] sm:$0xff] %v13095_v27  ;;  %v12434_v17 = vadd.f32 %v12370_v56, %v4089_v32  ;;  %9576 = vmatprep.mubr.f32.mxu0 %v12427_v55 }
 0x4ae   : > { %v13091_v49 = vmax.f32 %v12425_v37, 0.0  ;;  %9577 = vmatmul.mubr.f32.gmra.mrb[68].mxu0 %v12429_v47 }
 0x4af   : > { %v13092_v50 = vmax.f32 %v12434_v17, 0.0  ;;  %v9507_v16 = vpop.f32.mrb[42].mxu0 }
 0x4b0   : > { %4345 = vst [vmem:[#allocation2 + $0x81] sm:$0xff] %v13091_v49  ;;  %v12443_v19 = vadd.f32 %v9507_v16, %v12370_v56  ;;  %v4099_v52 = vpop.f32.mrb[43].mxu0  ;;  %v12445_v22 = vld [vmem:[#allocation2 + $0x48] sm:$0xff]  ;;  %v12447_v25 = vld [vmem:[#allocation2 + $0x50] sm:$0xff] }
 0x4b1   : > { %4344 = vst [vmem:[#allocation2 + $0x79] sm:$0xff] %v13092_v50  ;;  %v12452_v31 = vadd.f32 %v12370_v56, %v4099_v52  ;;  %9579 = vmatprep.mubr.f32.mxu1 %v12445_v22  ;;  %v4851_v52 = vld [vmem:[#allocation7 + $0xd0] sm:$0xff] }
 0x4b2   : > { %v13088_v35 = vmax.f32 %v12443_v19, 0.0  ;;  %9580 = vmatmul.mubr.f32.vlgmr.msra.gmra.mrb[32].mxu1 %v12447_v25 }
 0x4b3   : > { %v13090_v36 = vmax.f32 %v12452_v31, 0.0  ;;  %10613 = vmatpush3.bf16.msra.mxu1 %v12364_v62  ;;  %v9510_v38 = vpop.f32.mrb[44].mxu0 }
 0x4b4   : > { %4347 = vst [vmem:[#allocation2 + $0x99] sm:$0xff] %v13088_v35  ;;  %v12462_v40 = vadd.f32 %v9510_v38, %v12370_v56  ;;  %v4109_v41 = vpop.f32.mrb[45].mxu0  ;;  %v12464_v26 = vld [vmem:[#allocation2 + $0x60] sm:$0xff]  ;;  %v12466_v42 = vld [vmem:[#allocation2 + $0x68] sm:$0xff]  ;;  %10615 = vmatprep.subr.bf16.mxu1 %v10614_v28 }
 0x4b5   : > { %4346 = vst [vmem:[#allocation2 + $0x91] sm:$0xff] %v13090_v36  ;;  %v12471_v46 = vadd.f32 %v12370_v56, %v4109_v41  ;;  %9582 = vmatprep.mubr.f32.mxu1 %v12464_v26 }
 0x4b6   : > { %v13086_v44 = vmax.f32 %v12462_v40, 0.0  ;;  %9583 = vmatmul.mubr.f32.gmra.mrb[34].mxu1 %v12466_v42 }
 0x4b7   : > { %v13087_v48 = vmax.f32 %v12471_v46, 0.0  ;;  %v9513_v51 = vpop.f32.mrb[46].mxu0  ;;  %10617 = vmatpush3.bf16.msra.mxu1 %v10614_v28  ;;  %v4852_v28 = vld [vmem:[#allocation7 + $0xd8] sm:$0xff] }
 0x4b8   : > { %4349 = vst [vmem:[#allocation2 + $0xb1] sm:$0xff] %v13086_v44  ;;  %v12480_v43 = vadd.f32 %v9513_v51, %v12370_v56  ;;  %v4119_v59 = vpop.f32.mrb[47].mxu0  ;;  %v12482_v54 = vld [vmem:[#allocation2 + $0x78] sm:$0xff]  ;;  %v12484_v62 = vld [vmem:[#allocation2 + $0x80] sm:$0xff]  ;;  %10619 = vmatprep.subr.bf16.mxu1 %v10618_v29  ;;  %v10630_v51 = vpack.c.bf16 %v4852_v28, %v4851_v52 }
 0x4b9   : > { %4348 = vst [vmem:[#allocation2 + $0xa9] sm:$0xff] %v13087_v48  ;;  %v12489_v45 = vadd.f32 %v12370_v56, %v4119_v59  ;;  %9585 = vmatprep.mubr.f32.mxu1 %v12482_v54 }
 0x4ba   : > { %v13083_v57 = vmax.f32 %v12480_v43, 0.0  ;;  %9586 = vmatmul.mubr.f32.gmra.mrb[36].mxu1 %v12484_v62 }
 0x4bb   : > { %v13085_v63 = vmax.f32 %v12489_v45, 0.0  ;;  %v9516_v11 = vpop.f32.mrb[48].mxu0  ;;  %10621 = vmatpush3.bf16.msra.mxu1 %v10618_v29 }
 0x4bc   : > { %4351 = vst [vmem:[#allocation2 + $0xc9] sm:$0xff] %v13083_v57  ;;  %v12498_v18 = vadd.f32 %v9516_v11, %v12370_v56  ;;  %v4129_v30 = vpop.f32.mrb[49].mxu0  ;;  %v12500_v32 = vld [vmem:[#allocation2 + $0x90] sm:$0xff]  ;;  %v12502_v10 = vld [vmem:[#allocation2 + $0x98] sm:$0xff]  ;;  %10623 = vmatprep.subr.bf16.mxu1 %v10622_v58 }
 0x4bd   : > { %4350 = vst [vmem:[#allocation2 + $0xc1] sm:$0xff] %v13085_v63  ;;  %v12507_v16 = vadd.f32 %v12370_v56, %v4129_v30  ;;  %9588 = vmatprep.mubr.f32.mxu1 %v12500_v32 }
 0x4be   : > { %v13081_v33 = vmax.f32 %v12498_v18, 0.0  ;;  %9589 = vmatmul.mubr.f32.gmra.mrb[38].mxu1 %v12502_v10 }
 0x4bf   : > { %v13082_v34 = vmax.f32 %v12507_v16, 0.0  ;;  %v9519_v38 = vpop.f32.mrb[50].mxu0  ;;  %10625 = vmatpush3.bf16.msra.mxu1 %v10622_v58  ;;  %v4853_v58 = vld [vmem:[#allocation7 + $0xe0] sm:$0xff] }
 0x4c0   : > { %4353 = vst [vmem:[#allocation2 + $0xe1] sm:$0xff] %v13081_v33  ;;  %v12516_v41 = vadd.f32 %v9519_v38, %v12370_v56  ;;  %v4139_v29 = vpop.f32.mrb[51].mxu0  ;;  %v12518_v3 = vld [vmem:[#allocation2 + $0xa8] sm:$0xff]  ;;  %v12520_v53 = vld [vmem:[#allocation2 + $0xb0] sm:$0xff]  ;;  %10627 = vmatprep.subr.bf16.mxu1 %v10626_v13  ;;  %v12531_v38 = vpop.f32.mrb[0].mxu1 }
 0x4c1   : > { %4352 = vst [vmem:[#allocation2 + $0xd9] sm:$0xff] %v13082_v34  ;;  %v12525_v59 = vadd.f32 %v12370_v56, %v4139_v29  ;;  %9591 = vmatprep.mubr.f32.mxu1 %v12518_v3  ;;  %13206 = vst [vmem:[#allocation13_spill] sm:$0xff] %v12531_v38  ;;  %v10634_v34 = vpack.c.bf16 %v4854_v6, %v4853_v58  ;;  %v12542_v57 = vpop.f32.mrb[1].mxu1 }
 0x4c2   : > { %v13084_v9 = vmax.f32 %v12516_v41, 0.0  ;;  %9592 = vmatmul.mubr.f32.gmra.mrb[40].mxu1 %v12520_v53  ;;  %13207 = vst [vmem:[#allocation14_spill] sm:$0xff] %v12542_v57  ;;  %v631_v63 = vpop.f32.mrb[2].mxu1 }
 0x4c3   : > { %v13089_v11 = vmax.f32 %v12525_v59, 0.0  ;;  %v9522_v30 = vpop.f32.mrb[52].mxu0  ;;  %10629 = vmatpush3.bf16.msra.mxu1 %v10626_v13  ;;  %v633_v48 = vpop.f32.mrb[3].mxu1 }
 0x4c4   : > { %4355 = vst [vmem:[#allocation2 + $0xf9] sm:$0xff] %v13084_v9  ;;  %v12536_v52 = vadd.f32 %v9522_v30, %v12370_v56  ;;  %v4149_v28 = vpop.f32.mrb[53].mxu0  ;;  %v12538_v29 = vld [vmem:[#allocation2 + $0xc0] sm:$0xff]  ;;  %v12540_v33 = vld [vmem:[#allocation2 + $0xc8] sm:$0xff]  ;;  %10631 = vmatprep.subr.bf16.mxu1 %v10630_v51  ;;  %v637_v35 = vpop.f32.mrb[4].mxu1 }
 0x4c5   : > { %4354 = vst [vmem:[#allocation2 + $0xf1] sm:$0xff] %v13089_v11  ;;  %v12547_v13 = vadd.f32 %v12370_v56, %v4149_v28  ;;  %9594 = vmatprep.mubr.f32.mxu1 %v12538_v29  ;;  %v4855_v9 = vld [vmem:[#allocation7 + $0xf0] sm:$0xff]  ;;  %v4856_v30 = vld [vmem:[#allocation7 + $0xf8] sm:$0xff]  ;;  %v639_v50 = vpop.f32.mrb[5].mxu1  ;;  %v5211_v35 = vld [vmem:[#allocation7 + $0x100] sm:$0xff] }
 0x4c6   : > { %v13093_v44 = vmax.f32 %v12536_v52, 0.0  ;;  %9595 = vmatmul.mubr.f32.gmra.mrb[42].mxu1 %v12540_v33  ;;  %v10638_v49 = vpack.c.bf16 %v4856_v30, %v4855_v9 }
 0x4c7   : > { %v13097_v58 = vmax.f32 %v12547_v13, 0.0  ;;  %v9525_v6 = vpop.f32.mrb[54].mxu0  ;;  %10633 = vmatpush3.bf16.msra.mxu1 %v10630_v51  ;;  %v5212_v51 = vld [vmem:[#allocation7 + $0x108] sm:$0xff] }
 0x4c8   : > { %4357 = vst [vmem:[#allocation2 + $0x111] sm:$0xff] %v13093_v44  ;;  %v12556_v28 = vadd.f32 %v9525_v6, %v12370_v56  ;;  %v4159_v11 = vpop.f32.mrb[55].mxu0  ;;  %v12558_v36 = vld [vmem:[#allocation2 + $0xd8] sm:$0xff]  ;;  %v12560_v63 = vld [vmem:[#allocation2 + $0xe0] sm:$0xff]  ;;  %10635 = vmatprep.subr.bf16.mxu1 %v10634_v34  ;;  %v643_v44 = vpop.f32.mrb[6].mxu1 }
 0x4c9   : > { %4356 = vst [vmem:[#allocation2 + $0x109] sm:$0xff] %v13097_v58  ;;  %v10905_v48 = vadd.f32 %v12370_v56, %v4159_v11  ;;  %9597 = vmatprep.mubr.f32.mxu1 %v12558_v36  ;;  %v645_v24 = vpop.f32.mrb[7].mxu1  ;;  %v12579_v58 = vpack.c.bf16 %v5212_v51, %v5211_v35 }
 0x4ca   : > { %v13098_v6 = vmax.f32 %v12556_v28, 0.0  ;;  %9598 = vmatmul.mubr.f32.gmra.mrb[44].mxu1 %v12560_v63  ;;  %v649_v50 = vpop.f32.mrb[8].mxu1 }
 0x4cb   : > { %v12568_v27 = vmax.f32 %v10905_v48, 0.0  ;;  %v9528_v5 = vpop.f32.mrb[56].mxu0  ;;  %10637 = vmatpush3.bf16.msra.mxu1 %v10634_v34  ;;  %v651_v24 = vpop.f32.mrb[9].mxu1 }
 0x4cc   : > { %4359 = vst [vmem:[#allocation2 + $0x129] sm:$0xff] %v13098_v6  ;;  %v12573_v9 = vadd.f32 %v9528_v5, %v12370_v56  ;;  %v4169_v11 = vpop.f32.mrb[57].mxu0  ;;  %v12575_v30 = vld [vmem:[#allocation2 + $0xf0] sm:$0xff]  ;;  %v12577_v44 = vld [vmem:[#allocation2 + $0xf8] sm:$0xff]  ;;  %10639 = vmatprep.subr.bf16.mxu1 %v10638_v49  ;;  %v655_v48 = vpop.f32.mrb[10].mxu1 }
 0x4cd   : > { %4358 = vst [vmem:[#allocation2 + $0x121] sm:$0xff] %v12568_v27  ;;  %v10907_v34 = vadd.f32 %v12370_v56, %v4169_v11  ;;  %9600 = vmatprep.mubr.f32.mxu1 %v12575_v30  ;;  %v657_v5 = vpop.f32.mrb[11].mxu1 }
 0x4ce   : > { %v13101_v50 = vmax.f32 %v12573_v9, 0.0  ;;  %9601 = vmatmul.mubr.f32.gmra.mrb[46].mxu1 %v12577_v44  ;;  %v661_v7 = vpop.f32.mrb[12].mxu1 }
 0x4cf   : > { %v12586_v6 = vmax.f32 %v10907_v34, 0.0  ;;  %v9531_v8 = vpop.f32.mrb[58].mxu0  ;;  %10641 = vmatpush3.bf16.msra.mxu1 %v10638_v49  ;;  %v663_v48 = vpop.f32.mrb[13].mxu1 }
 0x4d0   : > { %4361 = vst [vmem:[#allocation2 + $0x141] sm:$0xff] %v13101_v50  ;;  %v10908_v35 = vadd.f32 %v9531_v8, %v12370_v56  ;;  %v4179_v51 = vpop.f32.mrb[59].mxu0  ;;  %v12591_v11 = vld [vmem:[#allocation2 + $0x108] sm:$0xff]  ;;  %v12593_v24 = vld [vmem:[#allocation2 + $0x110] sm:$0xff]  ;;  %10643 = vmatprep.subr.bf16.mxu1 %v12579_v58  ;;  %v667_v7 = vpop.f32.mrb[14].mxu1 }
 0x4d1   : > { %13208 = vst [vmem:[#allocation15_spill] sm:$0xff] %v12591_v11  ;;  %13209 = vst [vmem:[#allocation16_spill] sm:$0xff] %v12593_v24  ;;  %v10909_v34 = vadd.f32 %v12370_v56, %v4179_v51  ;;  %9603 = vmatprep.mubr.f32.mxu1 %v12591_v11  ;;  %v669_v8 = vpop.f32.mrb[15].mxu1 }
 0x4d2   : > { %4360 = vst [vmem:[#allocation2 + $0x139] sm:$0xff] %v12586_v6  ;;  %v12599_v49 = vmax.f32 %v10908_v35, 0.0  ;;  %9604 = vmatmul.mubr.f32.gmra.mrb[48].mxu1 %v12593_v24  ;;  %v673_v15 = vpop.f32.mrb[16].mxu1 }
 0x4d3   : > { %v12602_v5 = vmax.f32 %v10909_v34, 0.0  ;;  %v9534_v50 = vpop.f32.mrb[60].mxu0  ;;  %v675_v57 = vpop.f32.mrb[17].mxu1 }
 0x4d4   : > { %4363 = vst [vmem:[#allocation2 + $0x159] sm:$0xff] %v12599_v49  ;;  %v10910_v48 = vadd.f32 %v9534_v50, %v12370_v56  ;;  %v4189_v39 = vpop.f32.mrb[61].mxu0  ;;  %v12606_v0 = vld [vmem:[#allocation2 + $0x120] sm:$0xff]  ;;  %v12608_v51 = vld [vmem:[#allocation2 + $0x128] sm:$0xff]  ;;  %v679_v34 = vpop.f32.mrb[18].mxu1 }
 0x4d5   : > { %13210 = vst [vmem:[#allocation17_spill] sm:$0xff] %v12606_v0  ;;  %13211 = vst [vmem:[#allocation19_spill] sm:$0xff] %v12608_v51  ;;  %v10911_v35 = vadd.f32 %v12370_v56, %v4189_v39  ;;  %9606 = vmatprep.mubr.f32.mxu1 %v12606_v0  ;;  %v681_v15 = vpop.f32.mrb[19].mxu1  ;;  %v5218_v0 = vld [vmem:[#allocation7 + $0x138] sm:$0xff] }
 0x4d6   : > { %4362 = vst [vmem:[#allocation2 + $0x151] sm:$0xff] %v12602_v5  ;;  %v12613_v7 = vmax.f32 %v10910_v48, 0.0  ;;  %9607 = vmatmul.mubr.f32.gmra.mrb[50].mxu1 %v12608_v51  ;;  %v685_v38 = vpop.f32.mrb[20].mxu1  ;;  %v5217_v51 = vld [vmem:[#allocation7 + $0x130] sm:$0xff] }
 0x4d7   : > { %v12616_v8 = vmax.f32 %v10911_v35, 0.0  ;;  %v9537_v50 = vpop.f32.mrb[62].mxu0  ;;  %v687_v34 = vpop.f32.mrb[21].mxu1 }
 0x4d8   : > { %4365 = vst [vmem:[#allocation2 + $0x171] sm:$0xff] %v12613_v7  ;;  %v12620_v57 = vadd.f32 %v9537_v50, %v12370_v56  ;;  %v4199_v24 = vpop.f32.mrb[63].mxu0  ;;  %v4776_v34 = vld [vmem:[#allocation2 + $0x1] sm:$0xff] }
 0x4d9   : > { %v12622_v11 = vld [vmem:[#allocation2 + $0x138] sm:$0xff]  ;;  %v12624_v39 = vld [vmem:[#allocation2 + $0x140] sm:$0xff]  ;;  %4364 = vst [vmem:[#allocation2 + $0x169] sm:$0xff] %v12616_v8  ;;  %v12628_v48 = vadd.f32 %v12370_v56, %v4199_v24 }
 0x4da   : > { %13212 = vst [vmem:[#allocation18_spill] sm:$0xff] %v12620_v57  ;;  %13213 = vst [vmem:[#allocation20_spill] sm:$0xff] %v12622_v11  ;;  %9609 = vmatprep.mubr.f32.mxu1 %v12622_v11  ;;  %v13108_v38 = vmax.f32 %v12620_v57, 0.0  ;;  %v5213_v57 = vld [vmem:[#allocation7 + $0x110] sm:$0xff] }
 0x4db   : > { %13214 = vst [vmem:[#allocation11_spill] sm:$0xff] %v12624_v39  ;;  %13215 = vst [vmem:[#allocation12_spill] sm:$0xff] %v12628_v48  ;;  %9610 = vmatmul.mubr.f32.gmra.mrb[52].mxu1 %v12624_v39  ;;  %v13112_v35 = vmax.f32 %v12628_v48, 0.0  ;;  %v4777_v39 = vld [vmem:[#allocation2 + $0x9] sm:$0xff] }
 0x4dc   : > { %4367 = vst [vmem:[#allocation2 + $0x189] sm:$0xff] %v13108_v38  ;;  %v5214_v38 = vld [vmem:[#allocation7 + $0x118] sm:$0xff]  ;;  %v5215_v48 = vld [vmem:[#allocation7 + $0x120] sm:$0xff] }
 0x4dd   : > { %v12636_v15 = vld [vmem:[#allocation2 + $0x150] sm:$0xff]  ;;  %v12638_v50 = vld [vmem:[#allocation2 + $0x158] sm:$0xff]  ;;  %4366 = vst [vmem:[#allocation2 + $0x181] sm:$0xff] %v13112_v35  ;;  %v10646_v11 = vpack.c.bf16 %v5214_v38, %v5213_v57  ;;  %v10654_v57 = vpack.c.bf16 %v5218_v0, %v5217_v51  ;;  %v691_v0 = vpop.f32.mrb[22].mxu1 }
 0x4de   : > { %13216 = vst [vmem:[#allocation21_spill] sm:$0xff] %v12636_v15  ;;  %13217 = vst [vmem:[#allocation22_spill] sm:$0xff] %v12638_v50  ;;  %9612 = vmatprep.mubr.f32.mxu1 %v12636_v15  ;;  %v5216_v35 = vld [vmem:[#allocation7 + $0x128] sm:$0xff]  ;;  %v5219_v38 = vld [vmem:[#allocation7 + $0x140] sm:$0xff] }
 0x4df   : > { %9613 = vmatmul.mubr.f32.gmra.mrb[54].mxu1 %v12638_v50  ;;  %v13220_v50 = vmax.f32 %v12376_v61, 0.0  ;;  %v10650_v15 = vpack.c.bf16 %v5216_v35, %v5215_v48  ;;  %v13224_v61 = vmax.f32 %v12400_v2, 0.0  ;;  %v5221_v35 = vld [vmem:[#allocation7 + $0x150] sm:$0xff]  ;;  %v5223_v51 = vld [vmem:[#allocation7 + $0x160] sm:$0xff]  ;;  %v13227_v2 = vmax.f32 %v12407_v14, 0.0 }
 0x4e0   : > { %v12644_v56 = vld [vmem:[#allocation2 + $0x168] sm:$0xff]  ;;  %v12646_v24 = vld [vmem:[#allocation2 + $0x170] sm:$0xff] }
 0x4e1   : > { %13218 = vst [vmem:[#allocation23_spill] sm:$0xff] %v12644_v56  ;;  %13219 = vst [vmem:[#allocation24_spill] sm:$0xff] %v12646_v24  ;;  %9615 = vmatprep.mubr.f32.mxu1 %v12644_v56  ;;  %v13221_v56 = vmax.f32 %v12373_v1, 0.0  ;;  %v5222_v1 = vld [vmem:[#allocation7 + $0x158] sm:$0xff] }
 0x4e3   : > { %9616 = vmatmul.mubr.f32.gmra.mrb[56].mxu1 %v12646_v24  ;;  %v13222_v24 = vmax.f32 %v12388_v12, 0.0  ;;  %v13226_v12 = vmax.f32 %v12416_v23, 0.0  ;;  %v5225_v23 = vld [vmem:[#allocation7 + $0x170] sm:$0xff] }
 0x4e4   : > { %9650 = vmatprep.mubr.f32.mxu1 %v4776_v34 }
 0x4e7   : > { %9651 = vmatmul.mubr.f32.vlgmr.msra.gmra.mrb[58].mxu1 %v4777_v39  ;;  %v5220_v39 = vld [vmem:[#allocation7 + $0x148] sm:$0xff] }
 0x4e8   : > { %10645 = vmatpush3.bf16.msra.mxu1 %v12579_v58  ;;  %9653 = vmatprep.mubr.f32.mxu1 %v13220_v50  ;;  %v13223_v58 = vmax.f32 %v12383_v4, 0.0  ;;  %v10658_v48 = vpack.c.bf16 %v5220_v39, %v5219_v38  ;;  %v13225_v50 = vmax.f32 %v12395_v60, 0.0  ;;  %v693_v4 = vpop.f32.mrb[23].mxu1  ;;  %v5226_v38 = vld [vmem:[#allocation7 + $0x178] sm:$0xff]  ;;  %v13230_v39 = vmax.f32 %v12452_v31, 0.0 }
 0x4e9   : > { %10647 = vmatprep.subr.bf16.mxu1 %v10646_v11  ;;  %v10670_v14 = vpack.c.bf16 %v5226_v38, %v5225_v23  ;;  %v13236_v4 = vmax.f32 %v12489_v45, 0.0  ;;  %v13242_v45 = vmax.f32 %v12547_v13, 0.0  ;;  %v12712_v23 = vld [vmem:[#allocation2 + $0x22] sm:$0xff] }
 0x4ea   : > { %v5587_v38 = vld [vmem:[#allocation7 + $0x1b0] sm:$0xff] }
 0x4eb   : > { %9654 = vmatmul.mubr.f32.gmra.mrb[60].mxu1 %v13221_v56  ;;  %v5224_v56 = vld [vmem:[#allocation7 + $0x168] sm:$0xff] }
 0x4ec   : > { %9656 = vmatprep.mubr.f32.mxu1 %v13222_v24  ;;  %10649 = vmatpush3.bf16.msra.mxu1 %v10646_v11  ;;  %v10662_v11 = vpack.c.bf16 %v5222_v1, %v5221_v35  ;;  %v697_v24 = vpop.f32.mrb[24].mxu1  ;;  %v10666_v60 = vpack.c.bf16 %v5224_v56, %v5223_v51  ;;  %v5582_v35 = vld [vmem:[#allocation7 + $0x188] sm:$0xff] }
 0x4ed   : > { %10651 = vmatprep.subr.bf16.mxu1 %v10650_v15  ;;  %v699_v34 = vpop.f32.mrb[25].mxu1  ;;  %v13243_v24 = vmax.f32 %v12536_v52, 0.0  ;;  %v5147_v52 = vld [vmem:[#allocation2 + $0xa] sm:$0xff] }
 0x4ee   : > { %v12709_v34 = vld [vmem:[#allocation2 + $0x1a] sm:$0xff] }
 0x4ef   : > { %9657 = vmatmul.mubr.f32.gmra.mrb[62].mxu1 %v13223_v58  ;;  %v703_v58 = vpop.f32.mrb[26].mxu1 }
 0x4f0   : > { %9659 = vmatprep.mubr.f32.mxu1 %v13224_v61  ;;  %10653 = vmatpush3.bf16.msra.mxu1 %v10650_v15  ;;  %v13228_v15 = vmax.f32 %v12434_v17, 0.0  ;;  %v705_v61 = vpop.f32.mrb[27].mxu1  ;;  %v12673_v17 = vpop.f32.mrb[64].mxu0 }
 0x4f1   : > { %10655 = vmatprep.subr.bf16.mxu1 %v10654_v57  ;;  %13231 = vst [vmem:[#allocation25_spill] sm:$0xff] %v12673_v17  ;;  %v12675_v1 = vpop.f32.mrb[65].mxu0  ;;  %v709_v31 = vpop.f32.mrb[28].mxu1  ;;  %v5589_v61 = vld [vmem:[#allocation7 + $0x1c0] sm:$0xff]  ;;  %v5957_v17 = vld [vmem:[#allocation7 + $0x230] sm:$0xff] }
 0x4f2   : > { %13232 = vst [vmem:[#allocation26_spill] sm:$0xff] %v12675_v1  ;;  %v711_v0 = vpop.f32.mrb[29].mxu1  ;;  %v5591_v31 = vld [vmem:[#allocation7 + $0x1d0] sm:$0xff] }
 0x4f3   : > { %9660 = vmatmul.mubr.f32.gmra.mrb[32].mxu1 %v13225_v50  ;;  %v13233_v50 = vmax.f32 %v12443_v19, 0.0  ;;  %v715_v51 = vpop.f32.mrb[30].mxu1  ;;  %v13237_v19 = vmax.f32 %v12480_v43, 0.0  ;;  %v13244_v43 = vmax.f32 %v12556_v28, 0.0  ;;  %v5585_v28 = vld [vmem:[#allocation7 + $0x1a0] sm:$0xff]  ;;  %v12727_v0 = vld [vmem:[#allocation2 + $0x62] sm:$0xff] }
 0x4f4   : > { %9662 = vmatprep.mubr.f32.mxu1 %v13226_v12  ;;  %10657 = vmatpush3.bf16.msra.mxu1 %v10654_v57  ;;  %v13229_v57 = vmax.f32 %v12425_v37, 0.0  ;;  %v13234_v37 = vmax.f32 %v12471_v46, 0.0  ;;  %v717_v56 = vpop.f32.mrb[31].mxu1  ;;  %v13238_v46 = vmax.f32 %v12507_v16, 0.0  ;;  %v5146_v16 = vld [vmem:[#allocation2 + $0x2] sm:$0xff]  ;;  %v5593_v51 = vld [vmem:[#allocation7 + $0x1e0] sm:$0xff] }
 0x4f5   : > { %10659 = vmatprep.subr.bf16.mxu1 %v10658_v48  ;;  %v5594_v56 = vld [vmem:[#allocation7 + $0x1e8] sm:$0xff] }
 0x4f7   : > { %9663 = vmatmul.mubr.f32.gmra.mrb[34].mxu1 %v13227_v2  ;;  %v13239_v2 = vmax.f32 %v12498_v18, 0.0  ;;  %v13245_v18 = vmax.f32 %v12573_v9, 0.0 }
 0x4f8   : > { %9665 = vmatprep.mubr.f32.mxu1 %v13228_v15  ;;  %10661 = vmatpush3.bf16.msra.mxu1 %v10658_v48  ;;  %v5581_v48 = vld [vmem:[#allocation7 + $0x180] sm:$0xff]  ;;  %v13240_v15 = vmax.f32 %v12525_v59, 0.0  ;;  %v5584_v59 = vld [vmem:[#allocation7 + $0x198] sm:$0xff] }
 0x4f9   : > { %10663 = vmatprep.subr.bf16.mxu1 %v10662_v11  ;;  %v10674_v12 = vpack.c.bf16 %v5582_v35, %v5581_v48  ;;  %v5590_v48 = vld [vmem:[#allocation7 + $0x1c8] sm:$0xff]  ;;  %v12721_v35 = vld [vmem:[#allocation2 + $0x4a] sm:$0xff] }
 0x4fb   : > { %9666 = vmatmul.mubr.f32.gmra.mrb[36].mxu1 %v13229_v57  ;;  %v5588_v57 = vld [vmem:[#allocation7 + $0x1b8] sm:$0xff] }
 0x4fc   : > { %9668 = vmatprep.mubr.f32.mxu1 %v13230_v39  ;;  %10665 = vmatpush3.bf16.msra.mxu1 %v10662_v11  ;;  %v13235_v11 = vmax.f32 %v12462_v40, 0.0  ;;  %v13241_v40 = vmax.f32 %v12516_v41, 0.0  ;;  %v5583_v41 = vld [vmem:[#allocation7 + $0x190] sm:$0xff]  ;;  %v12715_v39 = vld [vmem:[#allocation2 + $0x32] sm:$0xff]  ;;  %v10686_v58 = vpack.c.bf16 %v5588_v57, %v5587_v38 }
 0x4fd   : > { %10667 = vmatprep.subr.bf16.mxu1 %v10666_v60  ;;  %v10678_v13 = vpack.c.bf16 %v5584_v59, %v5583_v41  ;;  %v12745_v41 = vld [vmem:[#allocation2 + $0xaa] sm:$0xff]  ;;  %v12763_v38 = vld [vmem:[#allocation2 + $0xf2] sm:$0xff]  ;;  %v12766_v57 = vld [vmem:[#allocation2 + $0xfa] sm:$0xff] }
 0x4ff   : > { %9669 = vmatmul.mubr.f32.gmra.mrb[38].mxu1 %v13233_v50  ;;  %v10690_v50 = vpack.c.bf16 %v5590_v48, %v5589_v61  ;;  %v12772_v61 = vld [vmem:[#allocation2 + $0x112] sm:$0xff]  ;;  %v12775_v48 = vld [vmem:[#allocation2 + $0x122] sm:$0xff] }
 0x500   : > { %9671 = vmatprep.mubr.f32.mxu1 %v13234_v37  ;;  %10669 = vmatpush3.bf16.msra.mxu1 %v10666_v60  ;;  %v5586_v60 = vld [vmem:[#allocation7 + $0x1a8] sm:$0xff] }
 0x501   : > { %10671 = vmatprep.subr.bf16.mxu1 %v10670_v14  ;;  %v10682_v9 = vpack.c.bf16 %v5586_v60, %v5585_v28  ;;  %v12724_v37 = vld [vmem:[#allocation2 + $0x52] sm:$0xff]  ;;  %v12754_v28 = vld [vmem:[#allocation2 + $0xca] sm:$0xff]  ;;  %v12757_v60 = vld [vmem:[#allocation2 + $0xda] sm:$0xff] }
 0x503   : > { %9672 = vmatmul.mubr.f32.gmra.mrb[40].mxu1 %v13235_v11 }
 0x504   : > { %9674 = vmatprep.mubr.f32.mxu1 %v13236_v4  ;;  %10673 = vmatpush3.bf16.msra.mxu1 %v10670_v14  ;;  %v12718_v14 = vld [vmem:[#allocation2 + $0x3a] sm:$0xff]  ;;  %v12730_v4 = vld [vmem:[#allocation2 + $0x6a] sm:$0xff] }
 0x505   : > { %10675 = vmatprep.subr.bf16.mxu1 %v10674_v12 }
 0x507   : > { %9675 = vmatmul.mubr.f32.gmra.mrb[42].mxu1 %v13237_v19  ;;  %v12733_v19 = vld [vmem:[#allocation2 + $0x7a] sm:$0xff] }
 0x508   : > { %9677 = vmatprep.mubr.f32.mxu1 %v13238_v46  ;;  %v10698_v46 = vpack.c.bf16 %v5594_v56, %v5593_v51  ;;  %v12790_v51 = vld [vmem:[#allocation2 + $0x15a] sm:$0xff]  ;;  %v12793_v56 = vld [vmem:[#allocation2 + $0x16a] sm:$0xff] }
 0x509   : > { %13246 = vst [vmem:[#allocation27_spill] sm:$0xff] %v12793_v56 }
 0x50b   : > { %9678 = vmatmul.mubr.f32.gmra.mrb[44].mxu1 %v13239_v2  ;;  %v12736_v2 = vld [vmem:[#allocation2 + $0x82] sm:$0xff] }
 0x50c   : > { %9680 = vmatprep.mubr.f32.mxu1 %v13240_v15  ;;  %v5595_v15 = vld [vmem:[#allocation7 + $0x1f0] sm:$0xff] }
 0x50f   : > { %9681 = vmatmul.mubr.f32.gmra.mrb[46].mxu1 %v13241_v40  ;;  %v5596_v40 = vld [vmem:[#allocation7 + $0x1f8] sm:$0xff] }
 0x510   : > { %9683 = vmatprep.mubr.f32.mxu1 %v13242_v45  ;;  %v12739_v45 = vld [vmem:[#allocation2 + $0x92] sm:$0xff] }
 0x513   : > { %9684 = vmatmul.mubr.f32.gmra.mrb[48].mxu1 %v13243_v24  ;;  %v10702_v24 = vpack.c.bf16 %v5596_v40, %v5595_v15  ;;  %v5953_v15 = vld [vmem:[#allocation7 + $0x210] sm:$0xff]  ;;  %v5954_v40 = vld [vmem:[#allocation7 + $0x218] sm:$0xff] }
 0x514   : > { %9686 = vmatprep.mubr.f32.mxu1 %v12568_v27 }
 0x517   : > { %9687 = vmatmul.mubr.f32.gmra.mrb[50].mxu1 %v13244_v43  ;;  %v12742_v43 = vld [vmem:[#allocation2 + $0x9a] sm:$0xff] }
 0x518   : > { %9689 = vmatprep.mubr.f32.mxu1 %v12586_v6 }
 0x51b   : > { %9690 = vmatmul.mubr.f32.gmra.mrb[52].mxu1 %v13245_v18  ;;  %v5951_v18 = vld [vmem:[#allocation7 + $0x200] sm:$0xff] }
 0x51c   : > { %9692 = vmatprep.mubr.f32.mxu1 %v12602_v5 }
 0x51f   : > { %9693 = vmatmul.mubr.f32.gmra.mrb[54].mxu1 %v12599_v49 }
 0x520   : > { %9695 = vmatprep.mubr.f32.mxu1 %v12616_v8 }
 0x523   : > { %9696 = vmatmul.mubr.f32.gmra.mrb[56].mxu1 %v12613_v7 }
 0x524   : > { %9730 = vmatprep.mubr.f32.mxu1 %v5146_v16  ;;  %v5952_v16 = vld [vmem:[#allocation7 + $0x208] sm:$0xff] }
 0x525   : > { %v10706_v59 = vpack.c.bf16 %v5952_v16, %v5951_v18  ;;  %v5955_v18 = vld [vmem:[#allocation7 + $0x220] sm:$0xff]  ;;  %v5956_v16 = vld [vmem:[#allocation7 + $0x228] sm:$0xff] }
 0x526   : > { %v10714_v1 = vpack.c.bf16 %v5956_v16, %v5955_v18  ;;  %v13256_v18 = vld [vmem:[#allocation20_spill] sm:$0xff]  ;;  %v13259_v16 = vld [vmem:[#allocation22_spill] sm:$0xff] }
 0x527   : > { %9731 = vmatmul.mubr.f32.vlgmr.msra.gmra.mrb[58].mxu1 %v5147_v52  ;;  %v12748_v52 = vld [vmem:[#allocation2 + $0xb2] sm:$0xff] }
 0x528   : > { %10677 = vmatpush3.bf16.msra.mxu1 %v10674_v12  ;;  %9733 = vmatprep.mubr.f32.mxu1 %v12709_v34  ;;  %v5592_v12 = vld [vmem:[#allocation7 + $0x1d8] sm:$0xff] }
 0x529   : > { %10679 = vmatprep.subr.bf16.mxu1 %v10678_v13  ;;  %v10694_v11 = vpack.c.bf16 %v5592_v12, %v5591_v31  ;;  %v12781_v31 = vld [vmem:[#allocation2 + $0x13a] sm:$0xff]  ;;  %v12784_v12 = vld [vmem:[#allocation2 + $0x142] sm:$0xff] }
 0x52b   : > { %9734 = vmatmul.mubr.f32.gmra.mrb[60].mxu1 %v12712_v23 }
 0x52c   : > { %9736 = vmatprep.mubr.f32.mxu1 %v12715_v39  ;;  %10681 = vmatpush3.bf16.msra.mxu1 %v10678_v13  ;;  %v12751_v13 = vld [vmem:[#allocation2 + $0xc2] sm:$0xff] }
 0x52d   : > { %10683 = vmatprep.subr.bf16.mxu1 %v10682_v9 }
 0x52f   : > { %9737 = vmatmul.mubr.f32.gmra.mrb[62].mxu1 %v12718_v14 }
 0x530   : > { %9739 = vmatprep.mubr.f32.mxu1 %v12721_v35  ;;  %10685 = vmatpush3.bf16.msra.mxu1 %v10682_v9  ;;  %v12760_v9 = vld [vmem:[#allocation2 + $0xe2] sm:$0xff] }
 0x531   : > { %10687 = vmatprep.subr.bf16.mxu1 %v10686_v58 }
 0x533   : > { %9740 = vmatmul.mubr.f32.gmra.mrb[32].mxu1 %v12724_v37 }
 0x534   : > { %9742 = vmatprep.mubr.f32.mxu1 %v12727_v0  ;;  %10689 = vmatpush3.bf16.msra.mxu1 %v10686_v58  ;;  %v12769_v58 = vld [vmem:[#allocation2 + $0x10a] sm:$0xff] }
 0x535   : > { %10691 = vmatprep.subr.bf16.mxu1 %v10690_v50 }
 0x537   : > { %9743 = vmatmul.mubr.f32.gmra.mrb[34].mxu1 %v12730_v4 }
 0x538   : > { %9745 = vmatprep.mubr.f32.mxu1 %v12733_v19  ;;  %10693 = vmatpush3.bf16.msra.mxu1 %v10690_v50  ;;  %v12778_v50 = vld [vmem:[#allocation2 + $0x12a] sm:$0xff] }
 0x539   : > { %10695 = vmatprep.subr.bf16.mxu1 %v10694_v11 }
 0x53b   : > { %9746 = vmatmul.mubr.f32.gmra.mrb[36].mxu1 %v12736_v2 }
 0x53c   : > { %9748 = vmatprep.mubr.f32.mxu1 %v12739_v45  ;;  %10697 = vmatpush3.bf16.msra.mxu1 %v10694_v11  ;;  %v12787_v11 = vld [vmem:[#allocation2 + $0x152] sm:$0xff] }
 0x53d   : > { %10699 = vmatprep.subr.bf16.mxu1 %v10698_v46 }
 0x53f   : > { %9749 = vmatmul.mubr.f32.gmra.mrb[38].mxu1 %v12742_v43 }
 0x540   : > { %9751 = vmatprep.mubr.f32.mxu1 %v12745_v41  ;;  %10701 = vmatpush3.bf16.msra.mxu1 %v10698_v46  ;;  %v12796_v46 = vld [vmem:[#allocation2 + $0x172] sm:$0xff] }
 0x541   : > { %10703 = vmatprep.subr.bf16.mxu1 %v10702_v24  ;;  %13247 = vst [vmem:[#allocation28_spill] sm:$0xff] %v12796_v46 }
 0x543   : > { %9752 = vmatmul.mubr.f32.gmra.mrb[40].mxu1 %v12748_v52 }
 0x544   : > { %9754 = vmatprep.mubr.f32.mxu1 %v12751_v13  ;;  %10705 = vmatpush3.bf16.msra.mxu1 %v10702_v24  ;;  %v10710_v24 = vpack.c.bf16 %v5954_v40, %v5953_v15  ;;  %v5960_v15 = vld [vmem:[#allocation7 + $0x248] sm:$0xff] }
 0x545   : > { %10707 = vmatprep.subr.bf16.mxu1 %v10706_v59 }
 0x547   : > { %9755 = vmatmul.mubr.f32.gmra.mrb[42].mxu1 %v12754_v28 }
 0x548   : > { %9757 = vmatprep.mubr.f32.mxu1 %v12757_v60 }
 0x54b   : > { %9758 = vmatmul.mubr.f32.gmra.mrb[44].mxu1 %v12760_v9 }
 0x54c   : > { %9760 = vmatprep.mubr.f32.mxu1 %v12763_v38 }
 0x54f   : > { %9761 = vmatmul.mubr.f32.gmra.mrb[46].mxu1 %v12766_v57 }
 0x550   : > { %9763 = vmatprep.mubr.f32.mxu1 %v12769_v58 }
 0x553   : > { %9764 = vmatmul.mubr.f32.gmra.mrb[48].mxu1 %v12772_v61 }
 0x554   : > { %9766 = vmatprep.mubr.f32.mxu1 %v12775_v48 }
 0x557   : > { %9767 = vmatmul.mubr.f32.gmra.mrb[50].mxu1 %v12778_v50 }
 0x558   : > { %9769 = vmatprep.mubr.f32.mxu1 %v12781_v31 }
 0x55b   : > { %9770 = vmatmul.mubr.f32.gmra.mrb[52].mxu1 %v12784_v12 }
 0x55c   : > { %9772 = vmatprep.mubr.f32.mxu1 %v12787_v11 }
 0x55f   : > { %9773 = vmatmul.mubr.f32.gmra.mrb[54].mxu1 %v12790_v51 }
 0x560   : > { %9775 = vmatprep.mubr.f32.mxu1 %v12793_v56  ;;  %v5958_v56 = vld [vmem:[#allocation7 + $0x238] sm:$0xff] }
 0x563   : > { %9776 = vmatmul.mubr.f32.gmra.mrb[56].mxu1 %v12796_v46  ;;  %v10718_v46 = vpack.c.bf16 %v5958_v56, %v5957_v17  ;;  %v5964_v17 = vld [vmem:[#allocation7 + $0x268] sm:$0xff]  ;;  %v6321_v56 = vld [vmem:[#allocation7 + $0x280] sm:$0xff] }
 0x564   : > { %9810 = vmatprep.mubr.f32.mxu1 %v12409_v20  ;;  %v5959_v20 = vld [vmem:[#allocation7 + $0x240] sm:$0xff] }
 0x567   : > { %9811 = vmatmul.mubr.f32.vlgmr.msra.gmra.mrb[58].mxu1 %v12411_v21  ;;  %v10722_v21 = vpack.c.bf16 %v5960_v15, %v5959_v20  ;;  %v12840_v20 = vld [vmem:[#allocation2 + $0x188] sm:$0xff]  ;;  %v6323_v15 = vld [vmem:[#allocation7 + $0x290] sm:$0xff] }
 0x568   : > { %10709 = vmatpush3.bf16.msra.mxu1 %v10706_v59  ;;  %9813 = vmatprep.mubr.f32.mxu1 %v12427_v55  ;;  %v5961_v55 = vld [vmem:[#allocation7 + $0x250] sm:$0xff]  ;;  %v5962_v59 = vld [vmem:[#allocation7 + $0x258] sm:$0xff] }
 0x569   : > { %10711 = vmatprep.subr.bf16.mxu1 %v10710_v24 }
 0x56b   : > { %9814 = vmatmul.mubr.f32.gmra.mrb[60].mxu1 %v12429_v47  ;;  %v10726_v47 = vpack.c.bf16 %v5962_v59, %v5961_v55  ;;  %v5886_v55 = vld [vmem:[#allocation2 + $0x19] sm:$0xff] }
 0x56c   : > { %9816 = vmatprep.mubr.f32.mxu1 %v12445_v22  ;;  %10713 = vmatpush3.bf16.msra.mxu1 %v10710_v24  ;;  %v5963_v22 = vld [vmem:[#allocation7 + $0x260] sm:$0xff] }
 0x56d   : > { %10715 = vmatprep.subr.bf16.mxu1 %v10714_v1  ;;  %v13255_v24 = vld [vmem:[#allocation19_spill] sm:$0xff] }
 0x56f   : > { %9817 = vmatmul.mubr.f32.gmra.mrb[62].mxu1 %v12447_v25  ;;  %v10730_v25 = vpack.c.bf16 %v5964_v17, %v5963_v22  ;;  %v6325_v22 = vld [vmem:[#allocation7 + $0x2a0] sm:$0xff]  ;;  %v6326_v17 = vld [vmem:[#allocation7 + $0x2a8] sm:$0xff] }
 0x570   : > { %9819 = vmatprep.mubr.f32.mxu1 %v12464_v26  ;;  %10717 = vmatpush3.bf16.msra.mxu1 %v10714_v1  ;;  %v5965_v26 = vld [vmem:[#allocation7 + $0x270] sm:$0xff]  ;;  %v5966_v1 = vld [vmem:[#allocation7 + $0x278] sm:$0xff] }
 0x571   : > { %10719 = vmatprep.subr.bf16.mxu1 %v10718_v46 }
 0x573   : > { %9820 = vmatmul.mubr.f32.gmra.mrb[32].mxu1 %v12466_v42  ;;  %v10734_v42 = vpack.c.bf16 %v5966_v1, %v5965_v26  ;;  %v10746_v26 = vpack.c.bf16 %v6326_v17, %v6325_v22  ;;  %v12846_v1 = vld [vmem:[#allocation2 + $0x39] sm:$0xff] }
 0x574   : > { %9822 = vmatprep.mubr.f32.mxu1 %v12482_v54  ;;  %10721 = vmatpush3.bf16.msra.mxu1 %v10718_v46  ;;  %v6322_v46 = vld [vmem:[#allocation7 + $0x288] sm:$0xff]  ;;  %v6335_v17 = vld [vmem:[#allocation7 + $0x2f0] sm:$0xff] }
 0x575   : > { %10723 = vmatprep.subr.bf16.mxu1 %v10722_v21  ;;  %v12870_v22 = vld [vmem:[#allocation2 + $0x99] sm:$0xff] }
 0x577   : > { %9823 = vmatmul.mubr.f32.gmra.mrb[34].mxu1 %v12484_v62  ;;  %v10738_v62 = vpack.c.bf16 %v6322_v46, %v6321_v56  ;;  %v6328_v56 = vld [vmem:[#allocation7 + $0x2b8] sm:$0xff] }
 0x578   : > { %9825 = vmatprep.mubr.f32.mxu1 %v12500_v32  ;;  %10725 = vmatpush3.bf16.msra.mxu1 %v10722_v21  ;;  %v6324_v21 = vld [vmem:[#allocation7 + $0x298] sm:$0xff] }
 0x579   : > { %10727 = vmatprep.subr.bf16.mxu1 %v10726_v47  ;;  %v10742_v59 = vpack.c.bf16 %v6324_v21, %v6323_v15  ;;  %v12849_v46 = vld [vmem:[#allocation2 + $0x49] sm:$0xff]  ;;  %v12864_v15 = vld [vmem:[#allocation2 + $0x81] sm:$0xff] }
 0x57a   : > { %v6333_v21 = vld [vmem:[#allocation7 + $0x2e0] sm:$0xff] }
 0x57b   : > { %9826 = vmatmul.mubr.f32.gmra.mrb[36].mxu1 %v12502_v10 }
 0x57c   : > { %9828 = vmatprep.mubr.f32.mxu1 %v12518_v3  ;;  %10729 = vmatpush3.bf16.msra.mxu1 %v10726_v47  ;;  %v13252_v3 = vld [vmem:[#allocation15_spill] sm:$0xff]  ;;  %v5887_v47 = vld [vmem:[#allocation2 + $0x21] sm:$0xff] }
 0x57d   : > { %10731 = vmatprep.subr.bf16.mxu1 %v10730_v25  ;;  %v12812_v54 = vpop.f32.mrb[66].mxu0 }
 0x57e   : > { %13248 = vst [vmem:[#allocation29_spill] sm:$0xff] %v12812_v54  ;;  %v12814_v40 = vpop.f32.mrb[67].mxu0 }
 0x57f   : > { %13249 = vst [vmem:[#allocation30_spill] sm:$0xff] %v12814_v40  ;;  %9829 = vmatmul.mubr.f32.gmra.mrb[38].mxu1 %v12520_v53  ;;  %v13253_v53 = vld [vmem:[#allocation16_spill] sm:$0xff]  ;;  %v13266_v40 = vld [vmem:[#allocation18_spill] sm:$0xff] }
 0x580   : > { %9831 = vmatprep.mubr.f32.mxu1 %v12538_v29  ;;  %10733 = vmatpush3.bf16.msra.mxu1 %v10730_v25  ;;  %v13254_v29 = vld [vmem:[#allocation17_spill] sm:$0xff]  ;;  %v12843_v25 = vld [vmem:[#allocation2 + $0x31] sm:$0xff]  ;;  %v13267_v54 = vmax.f32 %v13266_v40, 0.0  ;;  %v6702_v40 = vld [vmem:[#allocation7 + $0x358] sm:$0xff] }
 0x581   : > { %10735 = vmatprep.subr.bf16.mxu1 %v10734_v42  ;;  %v12818_v32 = vpop.f32.mrb[68].mxu0 }
 0x582   : > { %13250 = vst [vmem:[#allocation31_spill] sm:$0xff] %v12818_v32  ;;  %v12820_v10 = vpop.f32.mrb[69].mxu0  ;;  %v6694_v32 = vld [vmem:[#allocation7 + $0x318] sm:$0xff] }
 0x583   : > { %13251 = vst [vmem:[#allocation32_spill] sm:$0xff] %v12820_v10  ;;  %9832 = vmatmul.mubr.f32.gmra.mrb[40].mxu1 %v12540_v33  ;;  %v13257_v33 = vld [vmem:[#allocation11_spill] sm:$0xff]  ;;  %v6693_v10 = vld [vmem:[#allocation7 + $0x310] sm:$0xff] }
 0x584   : > { %9834 = vmatprep.mubr.f32.mxu1 %v12558_v36  ;;  %10737 = vmatpush3.bf16.msra.mxu1 %v10734_v42  ;;  %v13258_v36 = vld [vmem:[#allocation21_spill] sm:$0xff] }
 0x585   : > { %10739 = vmatprep.subr.bf16.mxu1 %v10738_v62  ;;  %v6327_v42 = vld [vmem:[#allocation7 + $0x2b0] sm:$0xff] }
 0x587   : > { %9835 = vmatmul.mubr.f32.gmra.mrb[42].mxu1 %v12560_v63  ;;  %v13260_v63 = vld [vmem:[#allocation23_spill] sm:$0xff] }
 0x588   : > { %9837 = vmatprep.mubr.f32.mxu1 %v12575_v30  ;;  %v13261_v30 = vld [vmem:[#allocation24_spill] sm:$0xff] }
 0x58b   : > { %9838 = vmatmul.mubr.f32.gmra.mrb[44].mxu1 %v12577_v44  ;;  %v12837_v44 = vld [vmem:[#allocation2 + $0x180] sm:$0xff] }
 0x58c   : > { %9840 = vmatprep.mubr.f32.mxu1 %v13252_v3  ;;  %v10750_v3 = vpack.c.bf16 %v6328_v56, %v6327_v42  ;;  %v12873_v42 = vld [vmem:[#allocation2 + $0xa9] sm:$0xff] }
 0x58f   : > { %9841 = vmatmul.mubr.f32.gmra.mrb[46].mxu1 %v13253_v53  ;;  %v12852_v53 = vld [vmem:[#allocation2 + $0x51] sm:$0xff] }
 0x590   : > { %9843 = vmatprep.mubr.f32.mxu1 %v13254_v29  ;;  %v6330_v29 = vld [vmem:[#allocation7 + $0x2c8] sm:$0xff] }
 0x593   : > { %9844 = vmatmul.mubr.f32.gmra.mrb[48].mxu1 %v13255_v24  ;;  %v12855_v24 = vld [vmem:[#allocation2 + $0x61] sm:$0xff] }
 0x594   : > { %9846 = vmatprep.mubr.f32.mxu1 %v13256_v18 }
 0x597   : > { %9847 = vmatmul.mubr.f32.gmra.mrb[50].mxu1 %v13257_v33  ;;  %v12858_v33 = vld [vmem:[#allocation2 + $0x69] sm:$0xff] }
 0x598   : > { %9849 = vmatprep.mubr.f32.mxu1 %v13258_v36  ;;  %v6331_v36 = vld [vmem:[#allocation7 + $0x2d0] sm:$0xff] }
 0x59b   : > { %9850 = vmatmul.mubr.f32.gmra.mrb[52].mxu1 %v13259_v16  ;;  %v6332_v16 = vld [vmem:[#allocation7 + $0x2d8] sm:$0xff] }
 0x59c   : > { %9852 = vmatprep.mubr.f32.mxu1 %v13260_v63  ;;  %v12861_v63 = vld [vmem:[#allocation2 + $0x79] sm:$0xff] }
 0x59f   : > { %9853 = vmatmul.mubr.f32.gmra.mrb[54].mxu1 %v13261_v30  ;;  %v10758_v30 = vpack.c.bf16 %v6332_v16, %v6331_v36  ;;  %v12882_v16 = vld [vmem:[#allocation2 + $0xc9] sm:$0xff] }
 0x5a0   : > { %9855 = vmatprep.mubr.f32.mxu1 %v12837_v44 }
 0x5a3   : > { %9856 = vmatmul.mubr.f32.gmra.mrb[56].mxu1 %v12840_v20 }
 0x5a4   : > { %9890 = vmatprep.mubr.f32.mxu1 %v5886_v55  ;;  %v6334_v55 = vld [vmem:[#allocation7 + $0x2e8] sm:$0xff] }
 0x5a7   : > { %9891 = vmatmul.mubr.f32.vlgmr.msra.gmra.mrb[58].mxu1 %v5887_v47  ;;  %v10762_v47 = vpack.c.bf16 %v6334_v55, %v6333_v21  ;;  %v12888_v21 = vld [vmem:[#allocation2 + $0xe1] sm:$0xff]  ;;  %v12891_v55 = vld [vmem:[#allocation2 + $0xf1] sm:$0xff] }
 0x5a8   : > { %10741 = vmatpush3.bf16.msra.mxu1 %v10738_v62  ;;  %9893 = vmatprep.mubr.f32.mxu1 %v12843_v25  ;;  %v6329_v62 = vld [vmem:[#allocation7 + $0x2c0] sm:$0xff] }
 0x5a9   : > { %10743 = vmatprep.subr.bf16.mxu1 %v10742_v59  ;;  %v10754_v18 = vpack.c.bf16 %v6330_v29, %v6329_v62  ;;  %v6691_v62 = vld [vmem:[#allocation7 + $0x300] sm:$0xff]  ;;  %v6692_v29 = vld [vmem:[#allocation7 + $0x308] sm:$0xff] }
 0x5aa   : > { %v10770_v36 = vpack.c.bf16 %v6692_v29, %v6691_v62  ;;  %v12908_v62 = vld [vmem:[#allocation2 + $0x141] sm:$0xff]  ;;  %v13264_v29 = vld [vmem:[#allocation12_spill] sm:$0xff] }
 0x5ab   : > { %9894 = vmatmul.mubr.f32.gmra.mrb[60].mxu1 %v12846_v1  ;;  %13263 = vst [vmem:[#allocation34_spill] sm:$0xff] %v12908_v62 }
 0x5ac   : > { %9896 = vmatprep.mubr.f32.mxu1 %v12849_v46  ;;  %10745 = vmatpush3.bf16.msra.mxu1 %v10742_v59  ;;  %v12867_v59 = vld [vmem:[#allocation2 + $0x91] sm:$0xff] }
 0x5ad   : > { %10747 = vmatprep.subr.bf16.mxu1 %v10746_v26 }
 0x5af   : > { %9897 = vmatmul.mubr.f32.gmra.mrb[62].mxu1 %v12852_v53 }
 0x5b0   : > { %9899 = vmatprep.mubr.f32.mxu1 %v12855_v24  ;;  %10749 = vmatpush3.bf16.msra.mxu1 %v10746_v26  ;;  %v6336_v26 = vld [vmem:[#allocation7 + $0x2f8] sm:$0xff] }
 0x5b1   : > { %10751 = vmatprep.subr.bf16.mxu1 %v10750_v3  ;;  %v10766_v56 = vpack.c.bf16 %v6336_v26, %v6335_v17  ;;  %v12897_v17 = vld [vmem:[#allocation2 + $0x109] sm:$0xff]  ;;  %v12900_v26 = vld [vmem:[#allocation2 + $0x111] sm:$0xff] }
 0x5b3   : > { %9900 = vmatmul.mubr.f32.gmra.mrb[32].mxu1 %v12858_v33 }
 0x5b4   : > { %9902 = vmatprep.mubr.f32.mxu1 %v12861_v63  ;;  %10753 = vmatpush3.bf16.msra.mxu1 %v10750_v3  ;;  %v12876_v3 = vld [vmem:[#allocation2 + $0xb1] sm:$0xff] }
 0x5b5   : > { %10755 = vmatprep.subr.bf16.mxu1 %v10754_v18 }
 0x5b7   : > { %9903 = vmatmul.mubr.f32.gmra.mrb[34].mxu1 %v12864_v15 }
 0x5b8   : > { %9905 = vmatprep.mubr.f32.mxu1 %v12867_v59  ;;  %10757 = vmatpush3.bf16.msra.mxu1 %v10754_v18  ;;  %v12879_v18 = vld [vmem:[#allocation2 + $0xc1] sm:$0xff] }
 0x5b9   : > { %10759 = vmatprep.subr.bf16.mxu1 %v10758_v30 }
 0x5bb   : > { %9906 = vmatmul.mubr.f32.gmra.mrb[36].mxu1 %v12870_v22 }
 0x5bc   : > { %9908 = vmatprep.mubr.f32.mxu1 %v12873_v42  ;;  %10761 = vmatpush3.bf16.msra.mxu1 %v10758_v30  ;;  %v12885_v30 = vld [vmem:[#allocation2 + $0xd9] sm:$0xff] }
 0x5bd   : > { %10763 = vmatprep.subr.bf16.mxu1 %v10762_v47 }
 0x5bf   : > { %9909 = vmatmul.mubr.f32.gmra.mrb[38].mxu1 %v12876_v3 }
 0x5c0   : > { %9911 = vmatprep.mubr.f32.mxu1 %v12879_v18  ;;  %10765 = vmatpush3.bf16.msra.mxu1 %v10762_v47  ;;  %v12894_v47 = vld [vmem:[#allocation2 + $0xf9] sm:$0xff] }
 0x5c1   : > { %10767 = vmatprep.subr.bf16.mxu1 %v10766_v56 }
 0x5c3   : > { %9912 = vmatmul.mubr.f32.gmra.mrb[40].mxu1 %v12882_v16 }
 0x5c4   : > { %9914 = vmatprep.mubr.f32.mxu1 %v12885_v30  ;;  %10769 = vmatpush3.bf16.msra.mxu1 %v10766_v56  ;;  %v12904_v56 = vld [vmem:[#allocation2 + $0x129] sm:$0xff] }
 0x5c5   : > { %10771 = vmatprep.subr.bf16.mxu1 %v10770_v36  ;;  %13262 = vst [vmem:[#allocation33_spill] sm:$0xff] %v12904_v56 }
 0x5c7   : > { %9915 = vmatmul.mubr.f32.gmra.mrb[42].mxu1 %v12888_v21 }
 0x5c8   : > { %9917 = vmatprep.mubr.f32.mxu1 %v12891_v55 }
 0x5cb   : > { %9918 = vmatmul.mubr.f32.gmra.mrb[44].mxu1 %v12894_v47 }
 0x5cc   : > { %9920 = vmatprep.mubr.f32.mxu1 %v12897_v17 }
 0x5cf   : > { %9921 = vmatmul.mubr.f32.gmra.mrb[46].mxu1 %v12900_v26 }
 0x5d0   : > { %9923 = vmatprep.mubr.f32.mxu1 %v12568_v27  ;;  %v13265_v27 = vmax.f32 %v13264_v29, 0.0  ;;  %v7070_v29 = vld [vmem:[#allocation7 + $0x3c8] sm:$0xff] }
 0x5d3   : > { %9924 = vmatmul.mubr.f32.gmra.mrb[48].mxu1 %v12904_v56  ;;  %v6696_v56 = vld [vmem:[#allocation7 + $0x328] sm:$0xff] }
 0x5d4   : > { %9926 = vmatprep.mubr.f32.mxu1 %v12586_v6  ;;  %v10774_v6 = vpack.c.bf16 %v6694_v32, %v6693_v10  ;;  %v6704_v32 = vld [vmem:[#allocation7 + $0x368] sm:$0xff]  ;;  %v6706_v10 = vld [vmem:[#allocation7 + $0x378] sm:$0xff] }
 0x5d7   : > { %9927 = vmatmul.mubr.f32.gmra.mrb[50].mxu1 %v12908_v62  ;;  %v6695_v62 = vld [vmem:[#allocation7 + $0x320] sm:$0xff] }
 0x5d8   : > { %9929 = vmatprep.mubr.f32.mxu1 %v12602_v5  ;;  %v6697_v5 = vld [vmem:[#allocation7 + $0x330] sm:$0xff] }
 0x5db   : > { %9930 = vmatmul.mubr.f32.gmra.mrb[52].mxu1 %v12599_v49  ;;  %v10778_v49 = vpack.c.bf16 %v6696_v56, %v6695_v62  ;;  %v6631_v56 = vld [vmem:[#allocation2 + $0x68] sm:$0xff]  ;;  %v7069_v62 = vld [vmem:[#allocation7 + $0x3c0] sm:$0xff] }
 0x5dc   : > { %9932 = vmatprep.mubr.f32.mxu1 %v12616_v8 }
 0x5df   : > { %9933 = vmatmul.mubr.f32.gmra.mrb[54].mxu1 %v12613_v7  ;;  %v6698_v7 = vld [vmem:[#allocation7 + $0x338] sm:$0xff] }
 0x5e0   : > { %9935 = vmatprep.mubr.f32.mxu1 %v13265_v27  ;;  %v10782_v8 = vpack.c.bf16 %v6698_v7, %v6697_v5  ;;  %v6632_v27 = vld [vmem:[#allocation2 + $0x78] sm:$0xff]  ;;  %v7071_v5 = vld [vmem:[#allocation7 + $0x3d0] sm:$0xff]  ;;  %v7072_v7 = vld [vmem:[#allocation7 + $0x3d8] sm:$0xff] }
 0x5e3   : > { %9936 = vmatmul.mubr.f32.gmra.mrb[56].mxu1 %v13267_v54  ;;  %v6700_v54 = vld [vmem:[#allocation7 + $0x348] sm:$0xff] }
 0x5e4   : > { %9970 = vmatprep.mubr.f32.mxu1 %v12709_v34  ;;  %v6699_v34 = vld [vmem:[#allocation7 + $0x340] sm:$0xff] }
 0x5e7   : > { %9971 = vmatmul.mubr.f32.vlgmr.msra.gmra.mrb[58].mxu1 %v12712_v23  ;;  %v10786_v23 = vpack.c.bf16 %v6700_v54, %v6699_v34  ;;  %v10822_v34 = vpack.c.bf16 %v7072_v7, %v7071_v5  ;;  %v6635_v54 = vld [vmem:[#allocation2 + $0x98] sm:$0xff]  ;;  %v7442_v7 = vld [vmem:[#allocation7 + $0x458] sm:$0xff] }
 0x5e8   : > { %10773 = vmatpush3.bf16.msra.mxu1 %v10770_v36  ;;  %9973 = vmatprep.mubr.f32.mxu1 %v12715_v39  ;;  %v6701_v39 = vld [vmem:[#allocation7 + $0x350] sm:$0xff]  ;;  %v7062_v36 = vld [vmem:[#allocation7 + $0x388] sm:$0xff] }
 0x5e9   : > { %10775 = vmatprep.subr.bf16.mxu1 %v10774_v6  ;;  %v7440_v5 = vld [vmem:[#allocation7 + $0x448] sm:$0xff] }
 0x5eb   : > { %9974 = vmatmul.mubr.f32.gmra.mrb[60].mxu1 %v12718_v14  ;;  %v10790_v14 = vpack.c.bf16 %v6702_v40, %v6701_v39  ;;  %v7074_v39 = vld [vmem:[#allocation7 + $0x3e8] sm:$0xff]  ;;  %v6636_v40 = vld [vmem:[#allocation2 + $0xa8] sm:$0xff] }
 0x5ec   : > { %9976 = vmatprep.mubr.f32.mxu1 %v12721_v35  ;;  %10777 = vmatpush3.bf16.msra.mxu1 %v10774_v6  ;;  %v6703_v35 = vld [vmem:[#allocation7 + $0x360] sm:$0xff]  ;;  %v10818_v6 = vpack.c.bf16 %v7070_v29, %v7069_v62 }
 0x5ed   : > { %10779 = vmatprep.subr.bf16.mxu1 %v10778_v49  ;;  %v7435_v29 = vld [vmem:[#allocation7 + $0x420] sm:$0xff] }
 0x5ef   : > { %9977 = vmatmul.mubr.f32.gmra.mrb[62].mxu1 %v12724_v37  ;;  %v10794_v37 = vpack.c.bf16 %v6704_v32, %v6703_v35  ;;  %v6637_v35 = vld [vmem:[#allocation2 + $0xb0] sm:$0xff]  ;;  %v7075_v32 = vld [vmem:[#allocation7 + $0x3f0] sm:$0xff] }
 0x5f0   : > { %9979 = vmatprep.mubr.f32.mxu1 %v12727_v0  ;;  %10781 = vmatpush3.bf16.msra.mxu1 %v10778_v49  ;;  %v6705_v0 = vld [vmem:[#allocation7 + $0x370] sm:$0xff] }
 0x5f1   : > { %10783 = vmatprep.subr.bf16.mxu1 %v10782_v8  ;;  %v6633_v49 = vld [vmem:[#allocation2 + $0x80] sm:$0xff] }
 0x5f3   : > { %9980 = vmatmul.mubr.f32.gmra.mrb[32].mxu1 %v12730_v4  ;;  %v10798_v4 = vpack.c.bf16 %v6706_v10, %v6705_v0  ;;  %v6638_v0 = vld [vmem:[#allocation2 + $0xc0] sm:$0xff] }
 0x5f4   : > { %9982 = vmatprep.mubr.f32.mxu1 %v12733_v19  ;;  %10785 = vmatpush3.bf16.msra.mxu1 %v10782_v8  ;;  %v7061_v19 = vld [vmem:[#allocation7 + $0x380] sm:$0xff] }
 0x5f5   : > { %10787 = vmatprep.subr.bf16.mxu1 %v10786_v23  ;;  %v6634_v8 = vld [vmem:[#allocation2 + $0x90] sm:$0xff] }
 0x5f7   : > { %9983 = vmatmul.mubr.f32.gmra.mrb[34].mxu1 %v12736_v2  ;;  %v10802_v2 = vpack.c.bf16 %v7062_v36, %v7061_v19  ;;  %v7431_v19 = vld [vmem:[#allocation7 + $0x400] sm:$0xff]  ;;  %v7432_v36 = vld [vmem:[#allocation7 + $0x408] sm:$0xff] }
 0x5f8   : > { %9985 = vmatprep.mubr.f32.mxu1 %v12739_v45  ;;  %10789 = vmatpush3.bf16.msra.mxu1 %v10786_v23  ;;  %v13268_v45 = vld [vmem:[#allocation27_spill] sm:$0xff] }
 0x5f9   : > { %10791 = vmatprep.subr.bf16.mxu1 %v10790_v14  ;;  %v7073_v23 = vld [vmem:[#allocation7 + $0x3e0] sm:$0xff] }
 0x5fb   : > { %9986 = vmatmul.mubr.f32.gmra.mrb[36].mxu1 %v12742_v43  ;;  %v13269_v43 = vld [vmem:[#allocation28_spill] sm:$0xff] }
 0x5fc   : > { %9988 = vmatprep.mubr.f32.mxu1 %v12745_v41  ;;  %10793 = vmatpush3.bf16.msra.mxu1 %v10790_v14  ;;  %v12949_v41 = vld [vmem:[#allocation2 + $0x182] sm:$0xff]  ;;  %v10826_v14 = vpack.c.bf16 %v7074_v39, %v7073_v23  ;;  %v7367_v23 = vld [vmem:[#allocation2 + $0x3a] sm:$0xff]  ;;  %v7368_v39 = vld [vmem:[#allocation2 + $0x4a] sm:$0xff] }
 0x5fd   : > { %10795 = vmatprep.subr.bf16.mxu1 %v10794_v37 }
 0x5ff   : > { %9989 = vmatmul.mubr.f32.gmra.mrb[38].mxu1 %v12748_v52  ;;  %v12952_v52 = vld [vmem:[#allocation2 + $0x18a] sm:$0xff] }
 0x600   : > { %9991 = vmatprep.mubr.f32.mxu1 %v12751_v13  ;;  %10797 = vmatpush3.bf16.msra.mxu1 %v10794_v37  ;;  %v7063_v13 = vld [vmem:[#allocation7 + $0x390] sm:$0xff]  ;;  %v7076_v37 = vld [vmem:[#allocation7 + $0x3f8] sm:$0xff] }
 0x601   : > { %10799 = vmatprep.subr.bf16.mxu1 %v10798_v4  ;;  %v10830_v10 = vpack.c.bf16 %v7076_v37, %v7075_v32  ;;  %v7372_v32 = vld [vmem:[#allocation2 + $0x7a] sm:$0xff]  ;;  %v7373_v37 = vld [vmem:[#allocation2 + $0x82] sm:$0xff] }
 0x603   : > { %9992 = vmatmul.mubr.f32.gmra.mrb[40].mxu1 %v12754_v28  ;;  %v7064_v28 = vld [vmem:[#allocation7 + $0x398] sm:$0xff] }
 0x604   : > { %9994 = vmatprep.mubr.f32.mxu1 %v12757_v60  ;;  %10801 = vmatpush3.bf16.msra.mxu1 %v10798_v4  ;;  %v6626_v60 = vld [vmem:[#allocation2 + $0x30] sm:$0xff]  ;;  %v6639_v4 = vld [vmem:[#allocation2 + $0xc8] sm:$0xff] }
 0x605   : > { %10803 = vmatprep.subr.bf16.mxu1 %v10802_v2 }
 0x607   : > { %9995 = vmatmul.mubr.f32.gmra.mrb[42].mxu1 %v12760_v9  ;;  %v10806_v9 = vpack.c.bf16 %v7064_v28, %v7063_v13  ;;  %v6642_v13 = vld [vmem:[#allocation2 + $0xf0] sm:$0xff]  ;;  %v6643_v28 = vld [vmem:[#allocation2 + $0xf8] sm:$0xff] }
 0x608   : > { %9997 = vmatprep.mubr.f32.mxu1 %v12763_v38  ;;  %v6627_v38 = vld [vmem:[#allocation2 + $0x38] sm:$0xff] }
 0x60b   : > { %9998 = vmatmul.mubr.f32.gmra.mrb[44].mxu1 %v12766_v57  ;;  %v7065_v57 = vld [vmem:[#allocation7 + $0x3a0] sm:$0xff] }
 0x60c   : > { %10000 = vmatprep.mubr.f32.mxu1 %v12769_v58  ;;  %v7066_v58 = vld [vmem:[#allocation7 + $0x3a8] sm:$0xff] }
 0x60f   : > { %10001 = vmatmul.mubr.f32.gmra.mrb[46].mxu1 %v12772_v61  ;;  %v6628_v61 = vld [vmem:[#allocation2 + $0x48] sm:$0xff] }
 0x610   : > { %10003 = vmatprep.mubr.f32.mxu1 %v12775_v48  ;;  %v10810_v48 = vpack.c.bf16 %v7066_v58, %v7065_v57  ;;  %v6647_v57 = vld [vmem:[#allocation2 + $0x128] sm:$0xff]  ;;  %v6648_v58 = vld [vmem:[#allocation2 + $0x138] sm:$0xff] }
 0x613   : > { %10004 = vmatmul.mubr.f32.gmra.mrb[48].mxu1 %v12778_v50  ;;  %v6629_v50 = vld [vmem:[#allocation2 + $0x50] sm:$0xff] }
 0x614   : > { %10006 = vmatprep.mubr.f32.mxu1 %v12781_v31  ;;  %v7067_v31 = vld [vmem:[#allocation7 + $0x3b0] sm:$0xff] }
 0x617   : > { %10007 = vmatmul.mubr.f32.gmra.mrb[50].mxu1 %v12784_v12  ;;  %v7068_v12 = vld [vmem:[#allocation7 + $0x3b8] sm:$0xff] }
 0x618   : > { %10009 = vmatprep.mubr.f32.mxu1 %v12787_v11  ;;  %v6630_v11 = vld [vmem:[#allocation2 + $0x60] sm:$0xff] }
 0x61b   : > { %10010 = vmatmul.mubr.f32.gmra.mrb[52].mxu1 %v12790_v51  ;;  %v10814_v51 = vpack.c.bf16 %v7068_v12, %v7067_v31  ;;  %v6652_v31 = vld [vmem:[#allocation2 + $0x168] sm:$0xff]  ;;  %v6653_v12 = vld [vmem:[#allocation2 + $0x170] sm:$0xff] }
 0x61c   : > { %10012 = vmatprep.mubr.f32.mxu1 %v13268_v45  ;;  %v10834_v45 = vpack.c.bf16 %v7432_v36, %v7431_v19  ;;  %v7377_v19 = vld [vmem:[#allocation2 + $0xb2] sm:$0xff]  ;;  %v7378_v36 = vld [vmem:[#allocation2 + $0xc2] sm:$0xff] }
 0x61f   : > { %10013 = vmatmul.mubr.f32.gmra.mrb[54].mxu1 %v13269_v43  ;;  %v6641_v43 = vld [vmem:[#allocation2 + $0xe0] sm:$0xff] }
 0x620   : > { %10015 = vmatprep.mubr.f32.mxu1 %v12949_v41 }
 0x623   : > { %10016 = vmatmul.mubr.f32.gmra.mrb[56].mxu1 %v12952_v52 }
 0x624   : > { %10050 = vmatprep.mubr.f32.mxu1 %v6626_v60  ;;  %v6644_v60 = vld [vmem:[#allocation2 + $0x108] sm:$0xff] }
 0x627   : > { %10051 = vmatmul.mubr.f32.vlgmr.msra.gmra.mrb[58].mxu1 %v6627_v38  ;;  %v6646_v38 = vld [vmem:[#allocation2 + $0x120] sm:$0xff] }
 0x628   : > { %10805 = vmatpush3.bf16.msra.mxu1 %v10802_v2  ;;  %10053 = vmatprep.mubr.f32.mxu1 %v6628_v61  ;;  %v6640_v2 = vld [vmem:[#allocation2 + $0xd8] sm:$0xff]  ;;  %v6649_v61 = vld [vmem:[#allocation2 + $0x140] sm:$0xff] }
 0x629   : > { %10807 = vmatprep.subr.bf16.mxu1 %v10806_v9 }
 0x62b   : > { %10054 = vmatmul.mubr.f32.gmra.mrb[60].mxu1 %v6629_v50  ;;  %v6651_v50 = vld [vmem:[#allocation2 + $0x158] sm:$0xff] }
 0x62c   : > { %10056 = vmatprep.mubr.f32.mxu1 %v6630_v11  ;;  %10809 = vmatpush3.bf16.msra.mxu1 %v10806_v9  ;;  %v6645_v9 = vld [vmem:[#allocation2 + $0x110] sm:$0xff]  ;;  %v11494_v11 = vld [vmem:[#allocation2] sm:$0xff] }
 0x62d   : > { %10811 = vmatprep.subr.bf16.mxu1 %v10810_v48 }
 0x62f   : > { %10057 = vmatmul.mubr.f32.gmra.mrb[62].mxu1 %v6631_v56  ;;  %v7434_v56 = vld [vmem:[#allocation7 + $0x418] sm:$0xff] }
 0x630   : > { %10059 = vmatprep.mubr.f32.mxu1 %v6632_v27  ;;  %10813 = vmatpush3.bf16.msra.mxu1 %v10810_v48  ;;  %v6650_v48 = vld [vmem:[#allocation2 + $0x150] sm:$0xff]  ;;  %v7436_v27 = vld [vmem:[#allocation7 + $0x428] sm:$0xff] }
 0x631   : > { %10815 = vmatprep.subr.bf16.mxu1 %v10814_v51 }
 0x633   : > { %10060 = vmatmul.mubr.f32.gmra.mrb[32].mxu1 %v6633_v49  ;;  %v7438_v49 = vld [vmem:[#allocation7 + $0x438] sm:$0xff] }
 0x634   : > { %10062 = vmatprep.mubr.f32.mxu1 %v6634_v8  ;;  %10817 = vmatpush3.bf16.msra.mxu1 %v10814_v51  ;;  %v7433_v51 = vld [vmem:[#allocation7 + $0x410] sm:$0xff]  ;;  %v7444_v8 = vld [vmem:[#allocation7 + $0x468] sm:$0xff] }
 0x635   : > { %10819 = vmatprep.subr.bf16.mxu1 %v10818_v6  ;;  %v10838_v62 = vpack.c.bf16 %v7434_v56, %v7433_v51  ;;  %v7397_v51 = vld [vmem:[#allocation2 + $0x1a2] sm:$0xff]  ;;  %v12984_v56 = vld [vmem:[%s13038_s5] ss:$0 sm:$0xff] }
 0x637   : > { %10063 = vmatmul.mubr.f32.gmra.mrb[34].mxu1 %v6635_v54  ;;  %v7366_v54 = vld [vmem:[#allocation2 + $0x32] sm:$0xff] }
 0x638   : > { %10065 = vmatprep.mubr.f32.mxu1 %v6636_v40  ;;  %10821 = vmatpush3.bf16.msra.mxu1 %v10818_v6  ;;  %v10842_v6 = vpack.c.bf16 %v7436_v27, %v7435_v29  ;;  %v7369_v40 = vld [vmem:[#allocation2 + $0x52] sm:$0xff]  ;;  %v13273_v27 = vld [vmem:[#allocation26_spill] sm:$0xff] }
 0x639   : > { %10823 = vmatprep.subr.bf16.mxu1 %v10822_v34 }
 0x63b   : > { %10066 = vmatmul.mubr.f32.gmra.mrb[36].mxu1 %v6637_v35  ;;  %v7371_v35 = vld [vmem:[#allocation2 + $0x6a] sm:$0xff] }
 0x63c   : > { %10068 = vmatprep.mubr.f32.mxu1 %v6638_v0  ;;  %10825 = vmatpush3.bf16.msra.mxu1 %v10822_v34  ;;  %v7446_v34 = vld [vmem:[#allocation7 + $0x478] sm:$0xff]  ;;  %v7374_v0 = vld [vmem:[#allocation2 + $0x92] sm:$0xff] }
 0x63d   : > { %10827 = vmatprep.subr.bf16.mxu1 %v10826_v14 }
 0x63f   : > { %10069 = vmatmul.mubr.f32.gmra.mrb[38].mxu1 %v6639_v4  ;;  %v7376_v4 = vld [vmem:[#allocation2 + $0xaa] sm:$0xff] }
 0x640   : > { %10071 = vmatprep.mubr.f32.mxu1 %v6640_v2  ;;  %10829 = vmatpush3.bf16.msra.mxu1 %v10826_v14  ;;  %v7370_v14 = vld [vmem:[#allocation2 + $0x62] sm:$0xff]  ;;  %v7379_v2 = vld [vmem:[#allocation2 + $0xca] sm:$0xff] }
 0x641   : > { %10831 = vmatprep.subr.bf16.mxu1 %v10830_v10 }
 0x643   : > { %10072 = vmatmul.mubr.f32.gmra.mrb[40].mxu1 %v6641_v43  ;;  %v7381_v43 = vld [vmem:[#allocation2 + $0xe2] sm:$0xff] }
 0x644   : > { %10074 = vmatprep.mubr.f32.mxu1 %v6642_v13  ;;  %10833 = vmatpush3.bf16.msra.mxu1 %v10830_v10  ;;  %v7375_v10 = vld [vmem:[#allocation2 + $0x9a] sm:$0xff]  ;;  %v7382_v13 = vld [vmem:[#allocation2 + $0xf2] sm:$0xff] }
 0x645   : > { %10835 = vmatprep.subr.bf16.mxu1 %v10834_v45 }
 0x647   : > { %10075 = vmatmul.mubr.f32.gmra.mrb[42].mxu1 %v6643_v28  ;;  %v7383_v28 = vld [vmem:[#allocation2 + $0xfa] sm:$0xff] }
 0x648   : > { %10077 = vmatprep.mubr.f32.mxu1 %v6644_v60  ;;  %v7384_v60 = vld [vmem:[#allocation2 + $0x10a] sm:$0xff] }
 0x64b   : > { %10078 = vmatmul.mubr.f32.gmra.mrb[44].mxu1 %v6645_v9  ;;  %v7385_v9 = vld [vmem:[#allocation2 + $0x112] sm:$0xff] }
 0x64c   : > { %10080 = vmatprep.mubr.f32.mxu1 %v6646_v38  ;;  %v7386_v38 = vld [vmem:[#allocation2 + $0x122] sm:$0xff] }
 0x64f   : > { %10081 = vmatmul.mubr.f32.gmra.mrb[46].mxu1 %v6647_v57  ;;  %v7387_v57 = vld [vmem:[#allocation2 + $0x12a] sm:$0xff] }
 0x650   : > { %10083 = vmatprep.mubr.f32.mxu1 %v6648_v58  ;;  %v7388_v58 = vld [vmem:[#allocation2 + $0x13a] sm:$0xff] }
 0x653   : > { %10084 = vmatmul.mubr.f32.gmra.mrb[48].mxu1 %v6649_v61  ;;  %v7389_v61 = vld [vmem:[#allocation2 + $0x142] sm:$0xff] }
 0x654   : > { %10086 = vmatprep.mubr.f32.mxu1 %v6650_v48  ;;  %v7390_v48 = vld [vmem:[#allocation2 + $0x152] sm:$0xff] }
 0x657   : > { %10087 = vmatmul.mubr.f32.gmra.mrb[50].mxu1 %v6651_v50  ;;  %v7391_v50 = vld [vmem:[#allocation2 + $0x15a] sm:$0xff] }
 0x658   : > { %10089 = vmatprep.mubr.f32.mxu1 %v6652_v31  ;;  %v7392_v31 = vld [vmem:[#allocation2 + $0x16a] sm:$0xff] }
 0x65b   : > { %10090 = vmatmul.mubr.f32.gmra.mrb[52].mxu1 %v6653_v12  ;;  %v7393_v12 = vld [vmem:[#allocation2 + $0x172] sm:$0xff] }
 0x65c   : > { %10092 = vmatprep.mubr.f32.mxu1 %v12837_v44  ;;  %v7437_v44 = vld [vmem:[#allocation7 + $0x430] sm:$0xff] }
 0x65f   : > { %10093 = vmatmul.mubr.f32.gmra.mrb[54].mxu1 %v12840_v20  ;;  %v10846_v20 = vpack.c.bf16 %v7438_v49, %v7437_v44 }
 0x660   : > { %10095 = vmatprep.mubr.f32.mxu1 %v11494_v11 }
 0x663   : > { %10096 = vmatmul.mubr.f32.gmra.mrb[56].mxu1 %v11494_v11  ;;  %v7396_v11 = vld [vmem:[#allocation2 + $0x19a] sm:$0xff] }
 0x664   : > { %10130 = vmatprep.mubr.f32.mxu1 %v12843_v25  ;;  %v7439_v25 = vld [vmem:[#allocation7 + $0x440] sm:$0xff] }
 0x667   : > { %10131 = vmatmul.mubr.f32.vlgmr.msra.gmra.mrb[58].mxu1 %v12846_v1  ;;  %v10850_v1 = vpack.c.bf16 %v7440_v5, %v7439_v25  ;;  %v13275_v5 = vld [vmem:[#allocation30_spill] sm:$0xff] }
 0x668   : > { %10837 = vmatpush3.bf16.msra.mxu1 %v10834_v45  ;;  %10133 = vmatprep.mubr.f32.mxu1 %v12849_v46  ;;  %v7441_v46 = vld [vmem:[#allocation7 + $0x450] sm:$0xff] }
 0x669   : > { %10839 = vmatprep.subr.bf16.mxu1 %v10838_v62  ;;  %v7380_v45 = vld [vmem:[#allocation2 + $0xda] sm:$0xff] }
 0x66b   : > { %10134 = vmatmul.mubr.f32.gmra.mrb[60].mxu1 %v12852_v53  ;;  %v10854_v53 = vpack.c.bf16 %v7442_v7, %v7441_v46 }
 0x66c   : > { %10136 = vmatprep.mubr.f32.mxu1 %v12855_v24  ;;  %10841 = vmatpush3.bf16.msra.mxu1 %v10838_v62  ;;  %v7443_v24 = vld [vmem:[#allocation7 + $0x460] sm:$0xff]  ;;  %v13272_v62 = vld [vmem:[#allocation25_spill] sm:$0xff] }
 0x66d   : > { %10843 = vmatprep.subr.bf16.mxu1 %v10842_v6  ;;  %v4713_v29 = vadd.f32 %v13272_v62, %v12984_v56 }
 0x66f   : > { %10137 = vmatmul.mubr.f32.gmra.mrb[62].mxu1 %v12858_v33  ;;  %v10858_v33 = vpack.c.bf16 %v7444_v8, %v7443_v24  ;;  %v13276_v8 = vld [vmem:[#allocation31_spill] sm:$0xff] }
 0x670   : > { %10139 = vmatprep.mubr.f32.mxu1 %v12861_v63  ;;  %10845 = vmatpush3.bf16.msra.mxu1 %v10842_v6  ;;  %v7445_v63 = vld [vmem:[#allocation7 + $0x470] sm:$0xff]  ;;  %v4712_v6 = vadd.f32 %v12984_v56, %v13273_v27 }
 0x671   : > { %10847 = vmatprep.subr.bf16.mxu1 %v10846_v20 }
 0x673   : > { %10140 = vmatmul.mubr.f32.gmra.mrb[32].mxu1 %v12864_v15  ;;  %v10862_v15 = vpack.c.bf16 %v7446_v34, %v7445_v63  ;;  %v13277_v63 = vld [vmem:[#allocation32_spill] sm:$0xff] }
 0x674   : > { %10142 = vmatprep.mubr.f32.mxu1 %v12867_v59  ;;  %10849 = vmatpush3.bf16.msra.mxu1 %v10846_v20  ;;  %v7016_v59 = vld [vmem:[#allocation2 + $0x121] sm:$0xff]  ;;  %v4716_v34 = vadd.f32 %v12984_v56, %v13277_v63 }
 0x675   : > { %10851 = vmatprep.subr.bf16.mxu1 %v10850_v1  ;;  %v13279_v63 = vld [vmem:[#allocation14_spill] sm:$0xff] }
 0x677   : > { %10143 = vmatmul.mubr.f32.gmra.mrb[34].mxu1 %v12870_v22  ;;  %v13270_v22 = vld [vmem:[#allocation33_spill] sm:$0xff] }
 0x678   : > { %10145 = vmatprep.mubr.f32.mxu1 %v12873_v42  ;;  %10853 = vmatpush3.bf16.msra.mxu1 %v10850_v1  ;;  %v7018_v42 = vld [vmem:[#allocation2 + $0x139] sm:$0xff]  ;;  %v4714_v1 = vadd.f32 %v12984_v56, %v13275_v5 }
 0x679   : > { %10855 = vmatprep.subr.bf16.mxu1 %v10854_v53 }
 0x67b   : > { %10146 = vmatmul.mubr.f32.gmra.mrb[36].mxu1 %v12876_v3  ;;  %v13271_v3 = vld [vmem:[#allocation34_spill] sm:$0xff] }
 0x67c   : > { %10148 = vmatprep.mubr.f32.mxu1 %v12879_v18  ;;  %10857 = vmatpush3.bf16.msra.mxu1 %v10854_v53  ;;  %v7020_v18 = vld [vmem:[#allocation2 + $0x151] sm:$0xff] }
 0x67d   : > { %10859 = vmatprep.subr.bf16.mxu1 %v10858_v33 }
 0x67f   : > { %10149 = vmatmul.mubr.f32.gmra.mrb[38].mxu1 %v12882_v16  ;;  %v7021_v16 = vld [vmem:[#allocation2 + $0x159] sm:$0xff] }
 0x680   : > { %10151 = vmatprep.mubr.f32.mxu1 %v12885_v30  ;;  %10861 = vmatpush3.bf16.msra.mxu1 %v10858_v33  ;;  %v7022_v30 = vld [vmem:[#allocation2 + $0x169] sm:$0xff]  ;;  %v4717_v33 = vadd.f32 %v13276_v8, %v12984_v56 }
 0x681   : > { %10863 = vmatprep.subr.bf16.mxu1 %v10862_v15 }
 0x683   : > { %10152 = vmatmul.mubr.f32.gmra.mrb[40].mxu1 %v12888_v21  ;;  %v7023_v21 = vld [vmem:[#allocation2 + $0x171] sm:$0xff] }
 0x684   : > { %10154 = vmatprep.mubr.f32.mxu1 %v12891_v55  ;;  %10865 = vmatpush3.bf16.msra.mxu1 %v10862_v15  ;;  %v7024_v55 = vld [vmem:[#allocation2 + $0x181] sm:$0xff] }
 0x687   : > { %10155 = vmatmul.mubr.f32.gmra.mrb[42].mxu1 %v12894_v47  ;;  %v7026_v47 = vld [vmem:[#allocation2 + $0x199] sm:$0xff] }
 0x688   : > { %10157 = vmatprep.mubr.f32.mxu1 %v12897_v17  ;;  %v7025_v17 = vld [vmem:[#allocation2 + $0x189] sm:$0xff] }
 0x68b   : > { %10158 = vmatmul.mubr.f32.gmra.mrb[44].mxu1 %v12900_v26  ;;  %v7027_v26 = vld [vmem:[#allocation2 + $0x1a1] sm:$0xff] }
 0x68c   : > { %10160 = vmatprep.mubr.f32.mxu1 %v7016_v59 }
 0x68f   : > { %10161 = vmatmul.mubr.f32.gmra.mrb[46].mxu1 %v13270_v22 }
 0x690   : > { %10163 = vmatprep.mubr.f32.mxu1 %v7018_v42 }
 0x693   : > { %10164 = vmatmul.mubr.f32.gmra.mrb[48].mxu1 %v13271_v3 }
 0x694   : > { %10166 = vmatprep.mubr.f32.mxu1 %v7020_v18 }
 0x697   : > { %10167 = vmatmul.mubr.f32.gmra.mrb[50].mxu1 %v7021_v16 }
 0x698   : > { %10169 = vmatprep.mubr.f32.mxu1 %v7022_v30 }
 0x69b   : > { %10170 = vmatmul.mubr.f32.gmra.mrb[52].mxu1 %v7023_v21 }
 0x69c   : > { %10172 = vmatprep.mubr.f32.mxu1 %v7024_v55 }
 0x69f   : > { %10173 = vmatmul.mubr.f32.gmra.mrb[54].mxu1 %v7025_v17 }
 0x6a0   : > { %10175 = vmatprep.mubr.f32.mxu1 %v7026_v47 }
 0x6a3   : > { %10176 = vmatmul.mubr.f32.gmra.mrb[56].mxu1 %v7027_v26 }
 0x6a4   : > { %10210 = vmatprep.mubr.f32.mxu1 %v7366_v54 }
 0x6a7   : > { %10211 = vmatmul.mubr.f32.vlgmr.msra.gmra.mrb[58].mxu1 %v7367_v23 }
 0x6a8   : > { %10213 = vmatprep.mubr.f32.mxu1 %v7368_v39 }
 0x6ab   : > { %10214 = vmatmul.mubr.f32.gmra.mrb[60].mxu1 %v7369_v40 }
 0x6ac   : > { %10216 = vmatprep.mubr.f32.mxu1 %v7370_v14 }
 0x6af   : > { %10217 = vmatmul.mubr.f32.gmra.mrb[62].mxu1 %v7371_v35 }
 0x6b0   : > { %10219 = vmatprep.mubr.f32.mxu1 %v7372_v32 }
 0x6b3   : > { %10220 = vmatmul.mubr.f32.gmra.mrb[32].mxu1 %v7373_v37 }
 0x6b4   : > { %10222 = vmatprep.mubr.f32.mxu1 %v7374_v0 }
 0x6b7   : > { %10223 = vmatmul.mubr.f32.gmra.mrb[34].mxu1 %v7375_v10 }
 0x6b8   : > { %10225 = vmatprep.mubr.f32.mxu1 %v7376_v4 }
 0x6bb   : > { %10226 = vmatmul.mubr.f32.gmra.mrb[36].mxu1 %v7377_v19 }
 0x6bc   : > { %10228 = vmatprep.mubr.f32.mxu1 %v7378_v36 }
 0x6bf   : > { %10229 = vmatmul.mubr.f32.gmra.mrb[38].mxu1 %v7379_v2 }
 0x6c0   : > { %10231 = vmatprep.mubr.f32.mxu1 %v7380_v45 }
 0x6c3   : > { %10232 = vmatmul.mubr.f32.gmra.mrb[40].mxu1 %v7381_v43 }
 0x6c4   : > { %10234 = vmatprep.mubr.f32.mxu1 %v7382_v13 }
 0x6c7   : > { %10235 = vmatmul.mubr.f32.gmra.mrb[42].mxu1 %v7383_v28 }
 0x6c8   : > { %10237 = vmatprep.mubr.f32.mxu1 %v7384_v60 }
 0x6cb   : > { %10238 = vmatmul.mubr.f32.gmra.mrb[44].mxu1 %v7385_v9 }
 0x6cc   : > { %10240 = vmatprep.mubr.f32.mxu1 %v7386_v38 }
 0x6cf   : > { %10241 = vmatmul.mubr.f32.gmra.mrb[46].mxu1 %v7387_v57 }
 0x6d0   : > { %10243 = vmatprep.mubr.f32.mxu1 %v7388_v58 }
 0x6d3   : > { %10244 = vmatmul.mubr.f32.gmra.mrb[48].mxu1 %v7389_v61 }
 0x6d4   : > { %10246 = vmatprep.mubr.f32.mxu1 %v7390_v48 }
 0x6d7   : > { %10247 = vmatmul.mubr.f32.gmra.mrb[50].mxu1 %v7391_v50 }
 0x6d8   : > { %10249 = vmatprep.mubr.f32.mxu1 %v7392_v31 }
 0x6db   : > { %10250 = vmatmul.mubr.f32.gmra.mrb[52].mxu1 %v7393_v12 }
 0x6dc   : > { %10252 = vmatprep.mubr.f32.mxu1 %v12949_v41 }
 0x6df   : > { %10253 = vmatmul.mubr.f32.gmra.mrb[54].mxu1 %v12952_v52  ;;  %v13274_v52 = vld [vmem:[#allocation29_spill] sm:$0xff] }
 0x6e0   : > { %10255 = vmatprep.mubr.f32.mxu1 %v7396_v11  ;;  %v4715_v25 = vadd.f32 %v13274_v52, %v12984_v56 }
 0x6e3   : > { %10256 = vmatmul.mubr.f32.gmra.mrb[56].mxu1 %v7397_v51 }
 0x77a   : > { %v10212_v44 = vpop.f32.mrb[58].mxu1 }
 0x77b   : > { %v10915_v49 = vadd.f32 %v10212_v44, %v4713_v29  ;;  %v7513_v41 = vpop.f32.mrb[59].mxu1 }
 0x77c   : > { %v10917_v20 = vadd.f32 %v7513_v41, %v4712_v6 }
 0x77e   : > { %7768 = vxpose.xlu0.b32.start [1/16] (narrow) %v10917_v20, 8  ;;  %v10215_v46 = vpop.f32.mrb[60].mxu1 }
 0x77f   : > { %v10919_v7 = vadd.f32 %v10215_v46, %v4715_v25  ;;  %v7523_v53 = vpop.f32.mrb[61].mxu1 }
 0x780   : > { %v10921_v24 = vadd.f32 %v7523_v53, %v4714_v1  ;;  %v13278_v53 = vld [vmem:[#allocation13_spill] sm:$0xff] }
 0x782   : > { %7769 = vxpose.xlu0.b32.cont [2/16] (narrow) %v10915_v49, 8  ;;  %v10218_v15 = vpop.f32.mrb[62].mxu1 }
 0x783   : > { %v10923_v59 = vadd.f32 %v10218_v15, %v4717_v33  ;;  %v7533_v22 = vpop.f32.mrb[63].mxu1 }
 0x784   : > { %v10925_v42 = vadd.f32 %v7533_v22, %v4716_v34 }
 0x786   : > { %7770 = vxpose.xlu0.b32.cont [3/16] (narrow) %v10921_v24, 8  ;;  %v10221_v3 = vpop.f32.mrb[32].mxu1 }
 0x787   : > { %v7543_v18 = vpop.f32.mrb[33].mxu1  ;;  %v10926_v39 = vadd.f32 %v10221_v3, %v12984_v56 }
 0x788   : > { %v10927_v26 = vadd.f32 %v12984_v56, %v7543_v18 }
 0x78a   : > { %7771 = vxpose.xlu0.b32.cont [4/16] (narrow) %v10919_v7, 8  ;;  %v10224_v16 = vpop.f32.mrb[34].mxu1 }
 0x78b   : > { %v7553_v30 = vpop.f32.mrb[35].mxu1  ;;  %v10928_v10 = vadd.f32 %v10224_v16, %v12984_v56 }
 0x78c   : > { %v10929_v35 = vadd.f32 %v12984_v56, %v7553_v30 }
 0x78e   : > { %7772 = vxpose.xlu0.b32.cont [5/16] (narrow) %v10925_v42, 8  ;;  %v10227_v21 = vpop.f32.mrb[36].mxu1 }
 0x78f   : > { %v7563_v55 = vpop.f32.mrb[37].mxu1  ;;  %v10930_v28 = vadd.f32 %v10227_v21, %v12984_v56 }
 0x790   : > { %v10931_v2 = vadd.f32 %v12984_v56, %v7563_v55 }
 0x792   : > { %7773 = vxpose.xlu0.b32.cont [6/16] (narrow) %v10923_v59, 8  ;;  %v10230_v47 = vpop.f32.mrb[38].mxu1 }
 0x793   : > { %v7573_v17 = vpop.f32.mrb[39].mxu1  ;;  %v10932_v50 = vadd.f32 %v10230_v47, %v12984_v56 }
 0x794   : > { %v10933_v57 = vadd.f32 %v12984_v56, %v7573_v17 }
 0x796   : > { %7774 = vxpose.xlu0.b32.cont [7/16] (narrow) %v10927_v26, 8  ;;  %v10233_v54 = vpop.f32.mrb[40].mxu1 }
 0x797   : > { %v7583_v23 = vpop.f32.mrb[41].mxu1  ;;  %v10934_v6 = vadd.f32 %v10233_v54, %v12984_v56 }
 0x798   : > { %v10935_v51 = vadd.f32 %v12984_v56, %v7583_v23 }
 0x79a   : > { %7775 = vxpose.xlu0.b32.cont [8/16] (narrow) %v10926_v39, 8  ;;  %v10236_v40 = vpop.f32.mrb[42].mxu1 }
 0x79b   : > { %v7593_v14 = vpop.f32.mrb[43].mxu1  ;;  %v10936_v4 = vadd.f32 %v10236_v40, %v12984_v56 }
 0x79c   : > { %v10937_v32 = vadd.f32 %v12984_v56, %v7593_v14 }
 0x79e   : > { %7776 = vxpose.xlu0.b32.cont [9/16] (narrow) %v10929_v35, 8  ;;  %7800 = vxpose.xlu1.b32.start [1/16] (narrow) %v10937_v32, 8  ;;  %v10239_v37 = vpop.f32.mrb[44].mxu1 }
 0x79f   : > { %v7603_v0 = vpop.f32.mrb[45].mxu1  ;;  %v10938_v60 = vadd.f32 %v10239_v37, %v12984_v56 }
 0x7a0   : > { %v10939_v45 = vadd.f32 %v12984_v56, %v7603_v0 }
 0x7a2   : > { %7777 = vxpose.xlu0.b32.cont [10/16] (narrow) %v10928_v10, 8  ;;  %7801 = vxpose.xlu1.b32.cont [2/16] (narrow) %v10936_v4, 8  ;;  %v10242_v19 = vpop.f32.mrb[46].mxu1 }
 0x7a3   : > { %v7613_v36 = vpop.f32.mrb[47].mxu1  ;;  %v10940_v31 = vadd.f32 %v10242_v19, %v12984_v56 }
 0x7a4   : > { %v10941_v58 = vadd.f32 %v12984_v56, %v7613_v36 }
 0x7a6   : > { %7778 = vxpose.xlu0.b32.cont [11/16] (narrow) %v10931_v2, 8  ;;  %7802 = vxpose.xlu1.b32.cont [3/16] (narrow) %v10939_v45, 8  ;;  %v10245_v43 = vpop.f32.mrb[48].mxu1 }
 0x7a7   : > { %v7623_v13 = vpop.f32.mrb[49].mxu1  ;;  %v10942_v44 = vadd.f32 %v10245_v43, %v12984_v56 }
 0x7a8   : > { %v10943_v62 = vadd.f32 %v12984_v56, %v7623_v13 }
 0x7aa   : > { %7779 = vxpose.xlu0.b32.cont [12/16] (narrow) %v10930_v28, 8  ;;  %7803 = vxpose.xlu1.b32.cont [4/16] (narrow) %v10938_v60, 8  ;;  %v10248_v9 = vpop.f32.mrb[50].mxu1 }
 0x7ab   : > { %v7633_v38 = vpop.f32.mrb[51].mxu1  ;;  %v10944_v41 = vadd.f32 %v10248_v9, %v12984_v56 }
 0x7ac   : > { %v10945_v49 = vadd.f32 %v12984_v56, %v7633_v38 }
 0x7ae   : > { %7780 = vxpose.xlu0.b32.cont [13/16] (narrow) %v10933_v57, 8  ;;  %7804 = vxpose.xlu1.b32.cont [5/16] (narrow) %v10941_v58, 8  ;;  %v10251_v61 = vpop.f32.mrb[52].mxu1 }
 0x7af   : > { %v7643_v48 = vpop.f32.mrb[53].mxu1  ;;  %v10946_v52 = vadd.f32 %v10251_v61, %v12984_v56 }
 0x7b0   : > { %v10947_v20 = vadd.f32 %v12984_v56, %v7643_v48 }
 0x7b2   : > { %7781 = vxpose.xlu0.b32.cont [14/16] (narrow) %v10932_v50, 8  ;;  %7805 = vxpose.xlu1.b32.cont [6/16] (narrow) %v10940_v31, 8  ;;  %v10254_v12 = vpop.f32.mrb[54].mxu1 }
 0x7b3   : > { %v7653_v11 = vpop.f32.mrb[55].mxu1  ;;  %v10948_v5 = vadd.f32 %v10254_v12, %v12984_v56 }
 0x7b4   : > { %v10949_v25 = vadd.f32 %v12984_v56, %v7653_v11 }
 0x7b6   : > { %7782 = vxpose.xlu0.b32.cont [15/16] (narrow) %v10935_v51, 8  ;;  %7806 = vxpose.xlu1.b32.cont [7/16] (narrow) %v10943_v62, 8  ;;  %v10257_v29 = vpop.f32.mrb[56].mxu1 }
 0x7b7   : > { %v7663_v27 = vpop.f32.mrb[57].mxu1  ;;  %v10950_v46 = vadd.f32 %v10257_v29, %v12984_v56 }
 0x7b8   : > { %v10951_v1 = vadd.f32 %v12984_v56, %v7663_v27 }
 0x7ba   : > { %7783 = vxpose.xlu0.b32.end [16/16] (narrow) %v10934_v6, 8  ;;  %7807 = vxpose.xlu1.b32.cont [8/16] (narrow) %v10942_v44, 8 }
 0x7be   : > { %7808 = vxpose.xlu1.b32.cont [9/16] (narrow) %v10945_v49, 8 }
 0x7c2   : > { %7809 = vxpose.xlu1.b32.cont [10/16] (narrow) %v10944_v41, 8 }
 0x7c6   : > { %7810 = vxpose.xlu1.b32.cont [11/16] (narrow) %v10947_v20, 8 }
 0x7ca   : > { %7811 = vxpose.xlu1.b32.cont [12/16] (narrow) %v10946_v52, 8 }
 0x7ce   : > { %7812 = vxpose.xlu1.b32.cont [13/16] (narrow) %v10949_v25, 8 }
 0x7d2   : > { %7813 = vxpose.xlu1.b32.cont [14/16] (narrow) %v10948_v5, 8 }
 0x7d6   : > { %7814 = vxpose.xlu1.b32.cont [15/16] (narrow) %v10951_v1, 8 }
 0x7da   : > { %7815 = vxpose.xlu1.b32.end [16/16] (narrow) %v10950_v46, 8 }
 0x7fe   : > { %v7784_v7 = vpop.trf.xlu0 }
 0x7ff   : > { %v7834_v24 = vadd.f32 %v7784_v7, %v13278_v53 }
 0x801   : > { %v7836_v8 = vmax.f32 %v7834_v24, 0.0 }
 0x803   : > { %7838 = vst [vmem:[%s308_s22] sm:$0x3f] %v7836_v8 }
 0x81e   : > { %v7816_v33 = vpop.trf.xlu1 }
 0x81f   : > { %v7835_v34 = vadd.f32 %v7816_v33, %v13279_v63 }
 0x821   : > { %v7837_v15 = vmax.f32 %v7835_v34, 0.0 }
 0x823   : > { %7839 = vst [vmem:[%s308_s22 + $0x8] sm:$0x3f] %v7837_v15 }
 0x824 PF: > { %s19_s24 = sadd.s32 1, %s11565_s24  }
 0x825   : > { %p16_p5 = scmp.ge.s32.totalorder %s19_s24, 4  }
 0x827   :  { %18 = sbr.rel (!%p16_p5) target bundleno = 2 (0x2), region = 105 }
 0x82e   :  { %7861 = vsyncpa [#allocation6], 1 }
 0x82f   :  { %7863 = vsyncpa [#allocation6 + $0x1], 1 }
 0x830   :  { %7864 = vsyncpa [#allocation8], 1 }

</bundles_post_ra>
